<compile_context>
chip_gen: v5e
topology: v5e:2x2
jax: 0.10.0
libtpu: 0.0.40
codegen_flags: <defaults>
</compile_context>

<pallas_src>
import numpy as np

import jax
import jax.numpy as jnp
from jax.experimental import pallas as pl
from jax.experimental.pallas import tpu as pltpu


# ----------------------------------------------------------------------------
# Model configuration
# ----------------------------------------------------------------------------
BOARD_X, BOARD_Y, BOARD_Z = 4, 4, 4
ACTION_SIZE = BOARD_X * BOARD_Y            # 16
NUM_CHANNELS = 8
KERNEL_SIZE = 3
NUM_BLOCKS = 1
BLOCK_REPEATS = 2
NUM_HEAD_CONVS = 1                         # == len(dense_layers) when action2D
INPUT_CHANNELS = 1

SPATIAL = BOARD_X * BOARD_Y * BOARD_Z                     # 64
IN_FLAT = INPUT_CHANNELS * SPATIAL                        # 64
FLAT = NUM_CHANNELS * SPATIAL                             # 512
HEAD_W = ACTION_SIZE + 1                                  # 17: Pi cols + V col


# ----------------------------------------------------------------------------
# The single fused Pallas kernel
# ----------------------------------------------------------------------------
def _fused_forward_kernel(x_ref,
                          m0_ref, b0_ref,        # conv0               (64, 512), (1, 512)
                          mstk_ref, bstk_ref,    # body+head convs  (4, 512, 512), (4, 512)
                          mhd_ref, bhd_ref,      # fused Pi|V head     (512, 17), (1, 17)
                          logpi_ref, v_ref):
    f32 = jnp.float32
    x = x_ref[...]                                                     # (N, 64)

    # conv0: Conv3d(1 -> C), stride 1, padding k//2, no activation.
    h = jnp.dot(x, m0_ref[...], preferred_element_type=f32) + b0_ref[...]      # (N, 512)

    # Residual 'add' block: left = convB(relu(convA(h))), right = convR(h),
    # h = relu(left + right).  Residual add + ReLU fused here.
    l = jnp.maximum(jnp.dot(h, mstk_ref[0], preferred_element_type=f32) + bstk_ref[0], 0.0)
    l = jnp.dot(l, mstk_ref[1], preferred_element_type=f32) + bstk_ref[1]
    r = jnp.dot(h, mstk_ref[2], preferred_element_type=f32) + bstk_ref[2]
    h = jnp.maximum(l + r, 0.0)

    # Head: conv -> relu.
    h = jnp.maximum(jnp.dot(h, mstk_ref[3], preferred_element_type=f32) + bstk_ref[3], 0.0)

    # Fused Pi + V heads in one MXU pass:
    #   cols 0..15 : Pi head = raw view (N, C*Z, X, Y) -> Conv2d(C*Z -> 1)
    #                pre-lowered to a dense (512,16) matrix on the flat layout,
    #   col  16    : V head  = Linear(512 -> 1) weight column.
    pv = jnp.dot(h, mhd_ref[...], preferred_element_type=f32) + bhd_ref[...]   # (N, 17)
    pi = pv[:, :ACTION_SIZE]                                                   # (N, 16)
    v = pv[:, ACTION_SIZE:ACTION_SIZE + 1]                                     # (N, 1)

    # log_softmax(pi, dim=1) and tanh(v) fused into the same kernel.
    m = jnp.max(pi, axis=1, keepdims=True)
    lse = jnp.log(jnp.sum(jnp.exp(pi - m), axis=1, keepdims=True)) + m
    logpi_ref[...] = pi - lse
    v_ref[...] = jnp.tanh(v)


def forward(packed, x):
    """Fused forward.  packed: tuple from pack_params().  x: (N,1,X,Y,Z)."""
    x_flat = x.reshape(-1, IN_FLAT).astype(jnp.float32)     # s = x.view(-1,1,X,Y,Z), flat
    n = x_flat.shape[0]
    vmem = pl.BlockSpec(memory_space=pltpu.MemorySpace.VMEM)   # whole array, VMEM-resident
    return pl.pallas_call(
        _fused_forward_kernel,
        out_shape=(jax.ShapeDtypeStruct((n, ACTION_SIZE), jnp.float32),
                   jax.ShapeDtypeStruct((n, 1), jnp.float32)),
        in_specs=[vmem] * (1 + len(packed)),
        out_specs=(vmem, vmem),
    )(x_flat, *packed)


# ----------------------------------------------------------------------------
# Weight packing: lower each conv to a dense per-sample transfer matrix
# (exact — convolution with fixed padding/stride is a linear map).
# ----------------------------------------------------------------------------
def _conv3d_to_matrix(w, X, Y, Z):
    """PyTorch Conv3d (stride=1, padding=k//2) as a matrix M so that
    out_flat = in_flat @ M on row-major NCDHW-per-sample flattened vectors."""
    w = np.asarray(w, np.float32)
    Cout, Cin, k = w.shape[0], w.shape[1], w.shape[2]
    p = k // 2
    S = X * Y * Z
    M = np.zeros((Cin * S, Cout * S), np.float32)
    xo, yo, zo = np.meshgrid(np.arange(X), np.arange(Y), np.arange(Z), indexing="ij")
    fo = ((xo * Y + yo) * Z + zo).ravel()
    for dx in range(k):
        for dy in range(k):
            for dz in range(k):
                xi, yi, zi = xo + dx - p, yo + dy - p, zo + dz - p
                valid = ((xi >= 0) & (xi < X) & (yi >= 0) & (yi < Y)
                         & (zi >= 0) & (zi < Z)).ravel()
                fi = ((xi * Y + yi) * Z + zi).ravel()
                fo_v, fi_v = fo[valid], fi[valid]
                for ci in range(Cin):
                    for co in range(Cout):
                        M[ci * S + fi_v, co * S + fo_v] += w[co, ci, dx, dy, dz]
    return M


def _conv2d_to_matrix(w, H, W):
    """PyTorch Conv2d (stride=1, padding=k//2) as a matrix on the raw-view
    flat layout f = channel*H*W + h*W + w (exactly PyTorch's .view order)."""
    w = np.asarray(w, np.float32)
    Cout, Cin, k = w.shape[0], w.shape[1], w.shape[2]
    p = k // 2
    S = H * W
    M = np.zeros((Cin * S, Cout * S), np.float32)
    ho, wo = np.meshgrid(np.arange(H), np.arange(W), indexing="ij")
    fo = (ho * W + wo).ravel()
    for dh in range(k):
        for dw in range(k):
            hi, wi = ho + dh - p, wo + dw - p
            valid = ((hi >= 0) & (hi < H) & (wi >= 0) & (wi < W)).ravel()
            fi = (hi * W + wi).ravel()
            fo_v, fi_v = fo[valid], fi[valid]
            for ci in range(Cin):
                for co in range(Cout):
                    M[ci * S + fi_v, co * S + fo_v] += w[co, ci, dh, dw]
    return M


def pack_params(params):
    """One-time host-side packing of PyTorch-layout params into the fused-kernel
    operands (all f32)."""
    X, Y, Z = BOARD_X, BOARD_Y, BOARD_Z

    def bias_vec(b, reps):
        return np.repeat(np.asarray(b, np.float32), reps).reshape(1, -1)

    w0, b0 = params["conv0"]
    blk = params["blocks"][0]
    (wa, ba), (wb, bb) = blk["left"]
    wr, br = blk["right"]
    wh, bh = params["head"][0]
    wp, bp = params["pi"]
    wv, bv = params["v"]

    # conv0 (1 -> C)
    m0 = _conv3d_to_matrix(w0, X, Y, Z)                                  # (64, 512)
    b0v = bias_vec(b0, SPATIAL)                                          # (1, 512)

    # block left A, left B, right, head conv — stacked into one operand each
    mstk = np.stack([_conv3d_to_matrix(wa, X, Y, Z),
                     _conv3d_to_matrix(wb, X, Y, Z),
                     _conv3d_to_matrix(wr, X, Y, Z),
                     _conv3d_to_matrix(wh, X, Y, Z)], axis=0)            # (4, 512, 512)
    bstk = np.concatenate([bias_vec(ba, SPATIAL), bias_vec(bb, SPATIAL),
                           bias_vec(br, SPATIAL), bias_vec(bh, SPATIAL)],
                          axis=0)                                        # (4, 512)

    # Pi Conv2d lowered to (512,16), with the V Linear weight appended as a
    # 17th column so both heads share one MXU pass.
    mpi = _conv2d_to_matrix(wp, BOARD_X, BOARD_Y)                        # (512, 16)
    wv_col = np.asarray(wv, np.float32).reshape(1, FLAT).T               # (512, 1)
    mhd = np.concatenate([mpi, wv_col], axis=1)                          # (512, 17)
    bhd = np.concatenate([bias_vec(bp, ACTION_SIZE),
                          np.asarray(bv, np.float32).reshape(1, 1)],
                         axis=1)                                         # (1, 17)

    packed = (m0, b0v, mstk, bstk, mhd, bhd)
    return tuple(jnp.asarray(a) for a in packed)


# ----------------------------------------------------------------------------
# Parameter init (PyTorch layouts)
# ----------------------------------------------------------------------------
def _init_conv3d(key, cout, cin, k):
    kw, kb = jax.random.split(key)
    fan_in = cin * k ** 3
    w = jax.random.normal(kw, (cout, cin, k, k, k), jnp.float32) / jnp.sqrt(fan_in)
    b = 0.01 * jax.random.normal(kb, (cout,), jnp.float32)
    return w, b


def _init_conv2d(key, cout, cin, k):
    kw, kb = jax.random.split(key)
    fan_in = cin * k ** 2
    w = jax.random.normal(kw, (cout, cin, k, k), jnp.float32) / jnp.sqrt(fan_in)
    b = 0.01 * jax.random.normal(kb, (cout,), jnp.float32)
    return w, b


def _init_linear(key, nout, nin):
    kw, kb = jax.random.split(key)
    w = jax.random.normal(kw, (nout, nin), jnp.float32) / jnp.sqrt(nin)
    b = 0.01 * jax.random.normal(kb, (nout,), jnp.float32)
    return w, b


def init_params(key):
    keys = jax.random.split(key, 16)
    C, k = NUM_CHANNELS, KERNEL_SIZE
    params = {}
    params["conv0"] = _init_conv3d(keys[0], C, INPUT_CHANNELS, k)
    blocks = []
    ki = 1
    for _ in range(NUM_BLOCKS):
        left = [_init_conv3d(keys[ki + r], C, C, k) for r in range(BLOCK_REPEATS)]
        right = _init_conv3d(keys[ki + BLOCK_REPEATS], C, C, k)
        ki += BLOCK_REPEATS + 1
        blocks.append({"left": left, "right": right})
    params["blocks"] = blocks
    params["head"] = [_init_conv3d(keys[ki + i], C, C, k) for i in range(NUM_HEAD_CONVS)]
    ki += NUM_HEAD_CONVS
    params["pi"] = _init_conv2d(keys[ki], 1, C * BOARD_Z, k)
    params["v"] = _init_linear(keys[ki + 1], 1, C * BOARD_X * BOARD_Y * BOARD_Z)
    return params


# ----------------------------------------------------------------------------
# Plain-JAX reference (im2col convs) used only to validate the fused kernel
# ----------------------------------------------------------------------------
def _ref_conv3d(x, w, b):
    N, Cin, X, Y, Z = x.shape
    Cout, _, k, _, _ = w.shape
    p = k // 2
    xp = jnp.pad(x, ((0, 0), (0, 0), (p, p), (p, p), (p, p)))
    cols = []
    for dx in range(k):
        for dy in range(k):
            for dz in range(k):
                cols.append(xp[:, :, dx:dx + X, dy:dy + Y, dz:dz + Z])
    patches = jnp.stack(cols, 0).transpose(1, 3, 4, 5, 2, 0).reshape(N * X * Y * Z, Cin * k ** 3)
    out = patches @ w.reshape(Cout, Cin * k ** 3).T + b
    return out.reshape(N, X, Y, Z, Cout).transpose(0, 4, 1, 2, 3)


def _ref_conv2d(x, w, b):
    N, Cin, H, W = x.shape
    Cout, _, k, _ = w.shape
    p = k // 2
    xp = jnp.pad(x, ((0, 0), (0, 0), (p, p), (p, p)))
    cols = []
    for dh in range(k):
        for dw in range(k):
            cols.append(xp[:, :, dh:dh + H, dw:dw + W])
    patches = jnp.stack(cols, 0).transpose(1, 3, 4, 2, 0).reshape(N * H * W, Cin * k ** 2)
    out = patches @ w.reshape(Cout, Cin * k ** 2).T + b
    return out.reshape(N, H, W, Cout).transpose(0, 3, 1, 2)


def reference_forward(params, x):
    C = NUM_CHANNELS
    s = x.reshape(-1, INPUT_CHANNELS, BOARD_X, BOARD_Y, BOARD_Z).astype(jnp.float32)
    N = s.shape[0]
    w, b = params["conv0"]
    s = _ref_conv3d(s, w, b)
    blk = params["blocks"][0]
    (wa, ba), (wb, bb) = blk["left"]
    wr, br = blk["right"]
    l = jnp.maximum(_ref_conv3d(s, wa, ba), 0.0)
    l = _ref_conv3d(l, wb, bb)
    r = _ref_conv3d(s, wr, br)
    s = jnp.maximum(l + r, 0.0)
    wh, bh = params["head"][0]
    s = jnp.maximum(_ref_conv3d(s, wh, bh), 0.0)
    # Pi head: raw view -> conv2d -> view (exactly PyTorch's Reshape semantics)
    wp, bp = params["pi"]
    p2 = _ref_conv2d(s.reshape(N, C * BOARD_Z, BOARD_X, BOARD_Y), wp, bp)
    pi = p2.reshape(N, ACTION_SIZE)
    # V head
    wv, bv = params["v"]
    v = s.reshape(N, -1) @ wv.T + bv
    return jax.nn.log_softmax(pi, axis=1), jnp.tanh(v)


# ----------------------------------------------------------------------------
if __name__ == "__main__":
    key = jax.random.PRNGKey(0)
    kp, kx = jax.random.split(key)
    params = init_params(kp)
    packed = pack_params(params)          # one-time host-side weight packing
    x = jax.random.normal(kx, (2, INPUT_CHANNELS, BOARD_X, BOARD_Y, BOARD_Z),
                          jnp.float32)

    fwd = jax.jit(forward)
    log_pi, v = fwd(packed, x)
    jax.block_until_ready((log_pi, v))

    # sanity + cross-check against the plain-JAX reference of the same graph
    ref_log_pi, ref_v = jax.jit(reference_forward)(params, x)
    jax.block_until_ready((ref_log_pi, ref_v))

    assert log_pi.shape == (2, ACTION_SIZE) and v.shape == (2, 1)
    assert bool(jnp.all(jnp.isfinite(log_pi))) and bool(jnp.all(jnp.isfinite(v)))
    assert bool(jnp.allclose(jnp.sum(jnp.exp(log_pi), axis=1), 1.0, atol=1e-4))
    assert bool(jnp.allclose(log_pi, ref_log_pi, atol=2e-2, rtol=2e-2))
    assert bool(jnp.allclose(v, ref_v, atol=2e-2, rtol=2e-2))
    print("KERNEL_OK")
</pallas_src>

<mosaic_0001>
module attributes {stable_mosaic.version = 11 : i64} {
  func.func @_fused_forward_kernel(%arg0: memref<2x64xf32, #tpu.memory_space<vmem>>, %arg1: memref<64x512xf32, #tpu.memory_space<vmem>>, %arg2: memref<1x512xf32, #tpu.memory_space<vmem>>, %arg3: memref<4x512x512xf32, #tpu.memory_space<vmem>>, %arg4: memref<4x512xf32, #tpu.memory_space<vmem>>, %arg5: memref<512x17xf32, #tpu.memory_space<vmem>>, %arg6: memref<1x17xf32, #tpu.memory_space<vmem>>, %arg7: memref<2x16xf32, #tpu.memory_space<vmem>>, %arg8: memref<2x1xf32, #tpu.memory_space<vmem>>) attributes {dimension_semantics = [], scalar_prefetch = 0 : i64, scratch_operands = 0 : i64, tpu.core_type = #tpu.core_type<tc>} {
    %c0 = arith.constant 0 : index
    %c0_0 = arith.constant 0 : index
    %0 = vector.load %arg0[%c0, %c0_0] : memref<2x64xf32, #tpu.memory_space<vmem>>, vector<2x64xf32>
    %c0_1 = arith.constant 0 : index
    %c0_2 = arith.constant 0 : index
    %1 = vector.load %arg1[%c0_1, %c0_2] : memref<64x512xf32, #tpu.memory_space<vmem>>, vector<64x512xf32>
    %cst = arith.constant dense<0.000000e+00> : vector<2x512xf32>
    %2 = tpu.matmul %0, %1, %cst {dimension_numbers = #tpu.dot_dimension_numbers<[1], [0], [0], [1], [0, 0, 1, 1], [], []>} : vector<2x64xf32>, vector<64x512xf32>, vector<2x512xf32> -> vector<2x512xf32>
    %c0_3 = arith.constant 0 : index
    %c0_4 = arith.constant 0 : index
    %3 = vector.load %arg2[%c0_3, %c0_4] : memref<1x512xf32, #tpu.memory_space<vmem>>, vector<1x512xf32>
    %4 = vector.broadcast %3 : vector<1x512xf32> to vector<2x512xf32>
    %5 = arith.addf %2, %4 : vector<2x512xf32>
    %c0_5 = arith.constant 0 : index
    %c0_6 = arith.constant 0 : index
    %c0_7 = arith.constant 0 : index
    %6 = vector.load %arg3[%c0_5, %c0_6, %c0_7] : memref<4x512x512xf32, #tpu.memory_space<vmem>>, vector<1x512x512xf32>
    %7 = vector.shape_cast %6 : vector<1x512x512xf32> to vector<512x512xf32>
    %cst_8 = arith.constant dense<0.000000e+00> : vector<2x512xf32>
    %8 = tpu.matmul %5, %7, %cst_8 {dimension_numbers = #tpu.dot_dimension_numbers<[1], [0], [0], [1], [0, 0, 1, 1], [], []>} : vector<2x512xf32>, vector<512x512xf32>, vector<2x512xf32> -> vector<2x512xf32>
    %c0_9 = arith.constant 0 : index
    %c0_10 = arith.constant 0 : index
    %9 = vector.load %arg4[%c0_9, %c0_10] : memref<4x512xf32, #tpu.memory_space<vmem>>, vector<1x512xf32>
    %10 = vector.shape_cast %9 : vector<1x512xf32> to vector<512xf32>
    %11 = vector.shape_cast %10 : vector<512xf32> to vector<1x512xf32>
    %12 = vector.broadcast %11 : vector<1x512xf32> to vector<2x512xf32>
    %13 = arith.addf %8, %12 : vector<2x512xf32>
    %cst_11 = arith.constant 0.000000e+00 : f32
    %14 = vector.broadcast %cst_11 : f32 to vector<2x512xf32>
    %15 = arith.maximumf %13, %14 : vector<2x512xf32>
    %c1 = arith.constant 1 : index
    %c0_12 = arith.constant 0 : index
    %c0_13 = arith.constant 0 : index
    %16 = vector.load %arg3[%c1, %c0_12, %c0_13] : memref<4x512x512xf32, #tpu.memory_space<vmem>>, vector<1x512x512xf32>
    %17 = vector.shape_cast %16 : vector<1x512x512xf32> to vector<512x512xf32>
    %cst_14 = arith.constant dense<0.000000e+00> : vector<2x512xf32>
    %18 = tpu.matmul %15, %17, %cst_14 {dimension_numbers = #tpu.dot_dimension_numbers<[1], [0], [0], [1], [0, 0, 1, 1], [], []>} : vector<2x512xf32>, vector<512x512xf32>, vector<2x512xf32> -> vector<2x512xf32>
    %c1_15 = arith.constant 1 : index
    %c0_16 = arith.constant 0 : index
    %19 = vector.load %arg4[%c1_15, %c0_16] : memref<4x512xf32, #tpu.memory_space<vmem>>, vector<1x512xf32>
    %20 = vector.shape_cast %19 : vector<1x512xf32> to vector<512xf32>
    %21 = vector.shape_cast %20 : vector<512xf32> to vector<1x512xf32>
    %22 = vector.broadcast %21 : vector<1x512xf32> to vector<2x512xf32>
    %23 = arith.addf %18, %22 : vector<2x512xf32>
    %c2 = arith.constant 2 : index
    %c0_17 = arith.constant 0 : index
    %c0_18 = arith.constant 0 : index
    %24 = vector.load %arg3[%c2, %c0_17, %c0_18] : memref<4x512x512xf32, #tpu.memory_space<vmem>>, vector<1x512x512xf32>
    %25 = vector.shape_cast %24 : vector<1x512x512xf32> to vector<512x512xf32>
    %cst_19 = arith.constant dense<0.000000e+00> : vector<2x512xf32>
    %26 = tpu.matmul %5, %25, %cst_19 {dimension_numbers = #tpu.dot_dimension_numbers<[1], [0], [0], [1], [0, 0, 1, 1], [], []>} : vector<2x512xf32>, vector<512x512xf32>, vector<2x512xf32> -> vector<2x512xf32>
    %c2_20 = arith.constant 2 : index
    %c0_21 = arith.constant 0 : index
    %27 = vector.load %arg4[%c2_20, %c0_21] : memref<4x512xf32, #tpu.memory_space<vmem>>, vector<1x512xf32>
    %28 = vector.shape_cast %27 : vector<1x512xf32> to vector<512xf32>
    %29 = vector.shape_cast %28 : vector<512xf32> to vector<1x512xf32>
    %30 = vector.broadcast %29 : vector<1x512xf32> to vector<2x512xf32>
    %31 = arith.addf %26, %30 : vector<2x512xf32>
    %32 = arith.addf %23, %31 : vector<2x512xf32>
    %cst_22 = arith.constant 0.000000e+00 : f32
    %33 = vector.broadcast %cst_22 : f32 to vector<2x512xf32>
    %34 = arith.maximumf %32, %33 : vector<2x512xf32>
    %c3 = arith.constant 3 : index
    %c0_23 = arith.constant 0 : index
    %c0_24 = arith.constant 0 : index
    %35 = vector.load %arg3[%c3, %c0_23, %c0_24] : memref<4x512x512xf32, #tpu.memory_space<vmem>>, vector<1x512x512xf32>
    %36 = vector.shape_cast %35 : vector<1x512x512xf32> to vector<512x512xf32>
    %cst_25 = arith.constant dense<0.000000e+00> : vector<2x512xf32>
    %37 = tpu.matmul %34, %36, %cst_25 {dimension_numbers = #tpu.dot_dimension_numbers<[1], [0], [0], [1], [0, 0, 1, 1], [], []>} : vector<2x512xf32>, vector<512x512xf32>, vector<2x512xf32> -> vector<2x512xf32>
    %c3_26 = arith.constant 3 : index
    %c0_27 = arith.constant 0 : index
    %38 = vector.load %arg4[%c3_26, %c0_27] : memref<4x512xf32, #tpu.memory_space<vmem>>, vector<1x512xf32>
    %39 = vector.shape_cast %38 : vector<1x512xf32> to vector<512xf32>
    %40 = vector.shape_cast %39 : vector<512xf32> to vector<1x512xf32>
    %41 = vector.broadcast %40 : vector<1x512xf32> to vector<2x512xf32>
    %42 = arith.addf %37, %41 : vector<2x512xf32>
    %cst_28 = arith.constant 0.000000e+00 : f32
    %43 = vector.broadcast %cst_28 : f32 to vector<2x512xf32>
    %44 = arith.maximumf %42, %43 : vector<2x512xf32>
    %c0_29 = arith.constant 0 : index
    %c0_30 = arith.constant 0 : index
    %45 = vector.load %arg5[%c0_29, %c0_30] : memref<512x17xf32, #tpu.memory_space<vmem>>, vector<512x17xf32>
    %cst_31 = arith.constant dense<0.000000e+00> : vector<2x17xf32>
    %46 = tpu.matmul %44, %45, %cst_31 {dimension_numbers = #tpu.dot_dimension_numbers<[1], [0], [0], [1], [0, 0, 1, 1], [], []>} : vector<2x512xf32>, vector<512x17xf32>, vector<2x17xf32> -> vector<2x17xf32>
    %c0_32 = arith.constant 0 : index
    %c0_33 = arith.constant 0 : index
    %47 = vector.load %arg6[%c0_32, %c0_33] : memref<1x17xf32, #tpu.memory_space<vmem>>, vector<1x17xf32>
    %48 = vector.broadcast %47 : vector<1x17xf32> to vector<2x17xf32>
    %49 = arith.addf %46, %48 : vector<2x17xf32>
    %50 = vector.extract_strided_slice %49 {offsets = [0, 0], sizes = [2, 16], strides = [1, 1]} : vector<2x17xf32> to vector<2x16xf32>
    %51 = vector.extract_strided_slice %49 {offsets = [0, 16], sizes = [2, 1], strides = [1, 1]} : vector<2x17xf32> to vector<2x1xf32>
    %cst_34 = arith.constant dense<0xFF800000> : vector<2xf32>
    %52 = vector.multi_reduction <maximumf>, %50, %cst_34 [1] : vector<2x16xf32> to vector<2xf32>
    %53 = vector.shape_cast %52 : vector<2xf32> to vector<2x1xf32>
    %54 = vector.broadcast %53 : vector<2x1xf32> to vector<2x16xf32>
    %55 = arith.subf %50, %54 : vector<2x16xf32>
    %56 = math.exp %55 : vector<2x16xf32>
    %cst_35 = arith.constant dense<0.000000e+00> : vector<2xf32>
    %57 = vector.multi_reduction <add>, %56, %cst_35 [1] : vector<2x16xf32> to vector<2xf32>
    %58 = vector.shape_cast %57 : vector<2xf32> to vector<2x1xf32>
    %59 = math.log %58 : vector<2x1xf32>
    %60 = arith.addf %59, %53 : vector<2x1xf32>
    %61 = vector.broadcast %60 : vector<2x1xf32> to vector<2x16xf32>
    %62 = arith.subf %50, %61 : vector<2x16xf32>
    %c0_36 = arith.constant 0 : index
    %c0_37 = arith.constant 0 : index
    %63 = vector.load %arg7[%c0_36, %c0_37] : memref<2x16xf32, #tpu.memory_space<vmem>>, vector<2x16xf32>
    tpu.vector_store %arg7[%c0_36, %c0_37], %62 {strides = array<i32>} : memref<2x16xf32, #tpu.memory_space<vmem>>, vector<2x16xf32>,
    %64 = math.tanh %51 : vector<2x1xf32>
    %c0_38 = arith.constant 0 : index
    %c0_39 = arith.constant 0 : index
    %65 = vector.load %arg8[%c0_38, %c0_39] : memref<2x1xf32, #tpu.memory_space<vmem>>, vector<2x1xf32>
    tpu.vector_store %arg8[%c0_38, %c0_39], %64 {strides = array<i32>} : memref<2x1xf32, #tpu.memory_space<vmem>>, vector<2x1xf32>,
    return
  }
}

</mosaic_0001>

<bundles_post_ra>
// kernel: forward.1
= control target key start
LH: loop header
LB: loop body
LE: loop exit
PB: predicated region body
PF: predicated region fallthrough
CT: control target
= control target key end

     0   :  { %14 = vsyncpa [#allocation3], 0  ;;  %s3386_s0 = inlined_call_operand.vmem [shape: f32[2,64], index: 0, kind: input, shape index: {}]   ;;  %s3387_s1 = inlined_call_operand.hbm [shape: f32[64,512], index: 1, kind: input, shape index: {}]   ;;  %s3388_s2 = inlined_call_operand.hbm [shape: f32[1,512], index: 2, kind: input, shape index: {}]   ;;  %s3389_s3 = inlined_call_operand.hbm [shape: f32[4,512,512], index: 3, kind: input, shape index: {}]   ;;  %s3390_s4 = inlined_call_operand.hbm [shape: f32[4,512], index: 4, kind: input, shape index: {}]   ;;  %s3391_s5 = inlined_call_operand.vmem [shape: f32[512,17], index: 5, kind: input, shape index: {}]   ;;  %s3392_s6 = inlined_call_operand.hbm [shape: f32[1,17], index: 6, kind: input, shape index: {}]   ;;  %s3393_s7 = inlined_call_operand.hbm [shape: f32[2,16], index: 7, kind: output, shape index: {0}]   ;;  %s3394_s8 = inlined_call_operand.vmem [shape: f32[2,1], index: 8, kind: output, shape index: {1}]  }
   0x1   :  { %15 = vsyncpa [#allocation6], 0 }
   0x2   :  { %16 = vsyncpa [#allocation9], 0  ;;  %s38_s29 = sshll.u32 %s3388_s2, 4  ;;  %s39_s29 = int_to_ptr.hbm [resolvable:$true] %s38_s29 }
   0x3   :  { %17 = vsyncpa [#allocation4], 0  ;;  %s2960_s30 = smov [#allocation5]   ;;  %s62_s12 = sshll.u32 %s3390_s4, 4  ;;  %s63_s12 = int_to_ptr.hbm [resolvable:$true] %s62_s12 }
   0x4   :  { %s40_s9 = sshll.u32 %s2960_s30, 4  ;;  %s2961_s13 = smov [#allocation8]   ;;  %s41_s9 = int_to_ptr.vmem [resolvable:$true] %s40_s9 }
   0x5   :  { %43 = dma.hbm_to_vmem [thread:$0]  %s39_s29, 64, %s41_s9, [#allocation6]  }
   0x6   :  { %s64_s14 = sshll.u32 %s2961_s13, 4  ;;  %s24_s17 = sshll.u32 %s3387_s1, 4  ;;  %s65_s14 = int_to_ptr.vmem [resolvable:$true] %s64_s14  ;;  %s25_s17 = int_to_ptr.hbm [resolvable:$true] %s24_s17 }
   0x7   :  { %67 = dma.hbm_to_vmem [thread:$0]  %s63_s12, 256, %s65_s14, [#allocation9]  }
   0x8   :  { %s2962_s2 = smov [#allocation2]   ;;  %s48_s21 = sshll.u32 %s3389_s3, 4  ;;  %s49_s21 = int_to_ptr.hbm [resolvable:$true] %s48_s21 }
   0x9   :  { %s26_s18 = sshll.u32 %s2962_s2, 4  ;;  %s2963_s22 = smov 512   ;;  %s27_s18 = int_to_ptr.vmem [resolvable:$true] %s26_s18 }
   0xa   :  { %s2964_s4 = smov 32   ;;  %s2965_s23 = smov [#allocation7]  }
   0xb   :  { %32 = dma.hbm_to_vmem [thread:$0]  %s25_s17, 4096, %s27_s18, [#allocation3], %s2963_s22, %s2963_s22, %s2964_s4  }
   0xc   :  { %s50_s24 = sshll.u32 %s2965_s23, 4  ;;  %s75_s1 = sshll.u32 %s3392_s6, 4  ;;  %s51_s24 = int_to_ptr.vmem [resolvable:$true] %s50_s24  ;;  %s76_s1 = int_to_ptr.hbm [resolvable:$true] %s75_s1 }
   0xd   :  { %56 = dma.hbm_to_vmem [thread:$0]  %s49_s21, 131072, %s51_s24, [#allocation6], %s2963_s22, %s2963_s22, %s2964_s4  }
   0xe   :  { %s2966_s27 = smov [#allocation10]  }
   0xf   :  { %s77_s28 = sshll.u32 %s2966_s27, 4  ;;  %s78_s28 = int_to_ptr.vmem [resolvable:$true] %s77_s28 }
  0x10   :  { %80 = dma.hbm_to_vmem [thread:$0]  %s76_s1, 16, %s78_s28, [#allocation9]  }
  0x11   :  { %2952 = dma.done.wait [#allocation3], 4096  }
  0x12   :  { %2953 = vsyncadd [#allocation3], 4294963200 }
  0x13   :  { %2954 = dma.done.wait [#allocation6], 131136  }
  0x14   :  { %2955 = vsyncadd [#allocation6], 4294836160 }
  0x15   :  { %2956 = dma.done.wait [#allocation9], 272  }
  0x16   :  { %2957 = vsyncadd [#allocation9], 4294967024  ;;  %v130_v0 = vld [vmem:[#allocation2 + $0xe0] sm:$0xff]  ;;  %v131_v1 = vld [vmem:[#allocation2 + $0xe8] sm:$0xff]  ;;  %vm144_vm0 = vcmask 523264   ;;  %vm2742_vm1 = vcmask 123904  }
  0x17   :  { %v132_v2 = vld [vmem:[#allocation2 + $0xf0] sm:$0xff]  ;;  %156 = vmatpush.msra.mxu0 %v130_v0  ;;  %176 = vmatpush.msra.mxu1 %v131_v1  ;;  %v133_v3 = vld [vmem:[#allocation2 + $0xf8] sm:$0xff]  ;;  %v126_v4 = vld [vmem:[#allocation2 + $0xc0] sm:$0xff]  ;;  %vm2762_vm2 = vcmask 1024   ;;  %s2968_s4 = smov [#allocation11]   ;;  %s2771_s26 = sshll.u32 %s3393_s7, 4  ;;  %s2772_s26 = int_to_ptr.hbm [resolvable:$true] %s2771_s26 }
  0x18   :  { %v127_v5 = vld [vmem:[#allocation2 + $0xc8] sm:$0xff]  ;;  %196 = vmatpush.msra.mxu2 %v132_v2  ;;  %216 = vmatpush.msra.mxu3 %v133_v3  ;;  %v128_v6 = vld [vmem:[#allocation2 + $0xd0] sm:$0xff]  ;;  %v129_v7 = vld [vmem:[#allocation2 + $0xd8] sm:$0xff]  ;;  %s2769_s23 = sshll.u32 %s2968_s4, 4  ;;  %s2770_s23 = int_to_ptr.vmem [resolvable:$true] %s2769_s23 }
  0x19   :  { %v122_v8 = vld [vmem:[#allocation2 + $0xa0] sm:$0xff]  ;;  %157 = vmatpush.msra.mxu0 %v126_v4  ;;  %177 = vmatpush.msra.mxu1 %v127_v5  ;;  %v123_v9 = vld [vmem:[#allocation2 + $0xa8] sm:$0xff]  ;;  %v124_v10 = vld [vmem:[#allocation2 + $0xb0] sm:$0xff] }
  0x1a   :  { %v125_v11 = vld [vmem:[#allocation2 + $0xb8] sm:$0xff]  ;;  %197 = vmatpush.msra.mxu2 %v128_v6  ;;  %217 = vmatpush.msra.mxu3 %v129_v7  ;;  %v118_v12 = vld [vmem:[#allocation2 + $0x80] sm:$0xff]  ;;  %v119_v13 = vld [vmem:[#allocation2 + $0x88] sm:$0xff] }
  0x1b   :  { %158 = vmatpush.msra.mxu0 %v122_v8  ;;  %178 = vmatpush.msra.mxu1 %v123_v9  ;;  %v120_v14 = vld [vmem:[#allocation2 + $0x90] sm:$0xff]  ;;  %v121_v15 = vld [vmem:[#allocation2 + $0x98] sm:$0xff]  ;;  %v114_v16 = vld [vmem:[#allocation2 + $0x60] sm:$0xff] }
  0x1c   :  { %198 = vmatpush.msra.mxu2 %v124_v10  ;;  %218 = vmatpush.msra.mxu3 %v125_v11  ;;  %v115_v17 = vld [vmem:[#allocation2 + $0x68] sm:$0xff]  ;;  %v116_v18 = vld [vmem:[#allocation2 + $0x70] sm:$0xff]  ;;  %v117_v19 = vld [vmem:[#allocation2 + $0x78] sm:$0xff] }
  0x1d   :  { %159 = vmatpush.msra.mxu0 %v118_v12  ;;  %179 = vmatpush.msra.mxu1 %v119_v13  ;;  %v110_v20 = vld [vmem:[#allocation2 + $0x40] sm:$0xff]  ;;  %v111_v21 = vld [vmem:[#allocation2 + $0x48] sm:$0xff]  ;;  %v112_v22 = vld [vmem:[#allocation2 + $0x50] sm:$0xff] }
  0x1e   :  { %199 = vmatpush.msra.mxu2 %v120_v14  ;;  %219 = vmatpush.msra.mxu3 %v121_v15  ;;  %v113_v23 = vld [vmem:[#allocation2 + $0x58] sm:$0xff]  ;;  %v106_v24 = vld [vmem:[#allocation2 + $0x20] sm:$0xff]  ;;  %v107_v25 = vld [vmem:[#allocation2 + $0x28] sm:$0xff] }
  0x1f   :  { %160 = vmatpush.msra.mxu0 %v114_v16  ;;  %180 = vmatpush.msra.mxu1 %v115_v17  ;;  %v108_v26 = vld [vmem:[#allocation2 + $0x30] sm:$0xff]  ;;  %v109_v27 = vld [vmem:[#allocation2 + $0x38] sm:$0xff]  ;;  %v102_v28 = vld [vmem:[#allocation2] sm:$0xff] }
  0x20   :  { %200 = vmatpush.msra.mxu2 %v116_v18  ;;  %220 = vmatpush.msra.mxu3 %v117_v19  ;;  %v103_v29 = vld [vmem:[#allocation2 + $0x8] sm:$0xff]  ;;  %v104_v30 = vld [vmem:[#allocation2 + $0x10] sm:$0xff]  ;;  %v105_v31 = vld [vmem:[#allocation2 + $0x18] sm:$0xff] }
  0x21   :  { %161 = vmatpush.msra.mxu0 %v110_v20  ;;  %181 = vmatpush.msra.mxu1 %v111_v21  ;;  %v101_v32 = vld [vmem:[%s3386_s0] sm:$0x3]  ;;  %v288_v33 = vld [vmem:[#allocation7 + $0x1e0] sm:$0xff] }
  0x22   :  { %201 = vmatpush.msra.mxu2 %v112_v22  ;;  %221 = vmatpush.msra.mxu3 %v113_v23  ;;  %v352_v34 = vld [vmem:[#allocation7 + $0x3e0] sm:$0xff] }
  0x23   :  { %162 = vmatpush.msra.mxu0 %v106_v24  ;;  %182 = vmatpush.msra.mxu1 %v107_v25  ;;  %v416_v35 = vld [vmem:[#allocation7 + $0x5e0] sm:$0xff] }
  0x24   :  { %202 = vmatpush.msra.mxu2 %v108_v26  ;;  %222 = vmatpush.msra.mxu3 %v109_v27  ;;  %v480_v36 = vld [vmem:[#allocation7 + $0x7e0] sm:$0xff] }
  0x25   :  { %163 = vmatpush.msra.mxu0 %v102_v28  ;;  %183 = vmatpush.msra.mxu1 %v103_v29  ;;  %v284_v37 = vld [vmem:[#allocation7 + $0x1c0] sm:$0xff] }
  0x26   :  { %203 = vmatpush.msra.mxu2 %v104_v30  ;;  %223 = vmatpush.msra.mxu3 %v105_v31  ;;  %v348_v38 = vld [vmem:[#allocation7 + $0x3c0] sm:$0xff]  ;;  %v289_v31 = vld [vmem:[#allocation7 + $0x1e8] sm:$0xff] }
  0x27   :  { %2787 = vmatmul.msk.f32.vlgmr.msra.gmra.mxu0 %vm144_vm0, %v101_v32  ;;  %2788 = vmatmul.msk.f32.vlgmr.msra.gmra.mxu1 %vm144_vm0, %v101_v32  ;;  %v412_v39 = vld [vmem:[#allocation7 + $0x5c0] sm:$0xff] }
  0x28   :  { %2789 = vmatmul.msk.f32.vlgmr.msra.gmra.mxu2 %vm144_vm0, %v101_v32  ;;  %2790 = vmatmul.msk.f32.vlgmr.msra.gmra.mxu3 %vm144_vm0, %v101_v32  ;;  %v476_v40 = vld [vmem:[#allocation7 + $0x7c0] sm:$0xff]  ;;  %v353_v32 = vld [vmem:[#allocation7 + $0x3e8] sm:$0xff] }
  0x29   :  { %494 = vmatpush.msrb.mxu0 %v288_v33  ;;  %514 = vmatpush.msrb.mxu1 %v352_v34  ;;  %v280_v41 = vld [vmem:[#allocation7 + $0x1a0] sm:$0xff] }
  0x2a   :  { %v344_v42 = vld [vmem:[#allocation7 + $0x3a0] sm:$0xff]  ;;  %534 = vmatpush.msrb.mxu2 %v416_v35  ;;  %554 = vmatpush.msrb.mxu3 %v480_v36  ;;  %v285_v35 = vld [vmem:[#allocation7 + $0x1c8] sm:$0xff] }
  0x2b   :  { %495 = vmatpush.msrb.mxu0 %v284_v37  ;;  %515 = vmatpush.msrb.mxu1 %v348_v38  ;;  %v408_v43 = vld [vmem:[#allocation7 + $0x5a0] sm:$0xff]  ;;  %v349_v36 = vld [vmem:[#allocation7 + $0x3c8] sm:$0xff] }
  0x2c   :  { %v472_v44 = vld [vmem:[#allocation7 + $0x7a0] sm:$0xff]  ;;  %535 = vmatpush.msrb.mxu2 %v412_v39  ;;  %555 = vmatpush.msrb.mxu3 %v476_v40  ;;  %v417_v37 = vld [vmem:[#allocation7 + $0x5e8] sm:$0xff] }
  0x2d   :  { %v276_v45 = vld [vmem:[#allocation7 + $0x180] sm:$0xff]  ;;  %496 = vmatpush.msrb.mxu0 %v280_v41  ;;  %516 = vmatpush.msrb.mxu1 %v344_v42  ;;  %v481_v38 = vld [vmem:[#allocation7 + $0x7e8] sm:$0xff] }
  0x2e   :  { %v340_v46 = vld [vmem:[#allocation7 + $0x380] sm:$0xff]  ;;  %536 = vmatpush.msrb.mxu2 %v408_v43  ;;  %556 = vmatpush.msrb.mxu3 %v472_v44  ;;  %v281_v39 = vld [vmem:[#allocation7 + $0x1a8] sm:$0xff] }
  0x2f   :  { %v404_v47 = vld [vmem:[#allocation7 + $0x580] sm:$0xff]  ;;  %497 = vmatpush.msrb.mxu0 %v276_v45  ;;  %517 = vmatpush.msrb.mxu1 %v340_v46  ;;  %v345_v40 = vld [vmem:[#allocation7 + $0x3a8] sm:$0xff] }
  0x30   :  { %v468_v48 = vld [vmem:[#allocation7 + $0x780] sm:$0xff]  ;;  %537 = vmatpush.msrb.mxu2 %v404_v47  ;;  %v413_v41 = vld [vmem:[#allocation7 + $0x5c8] sm:$0xff] }
  0x31   :  { %v272_v49 = vld [vmem:[#allocation7 + $0x160] sm:$0xff]  ;;  %557 = vmatpush.msrb.mxu3 %v468_v48  ;;  %v477_v42 = vld [vmem:[#allocation7 + $0x7c8] sm:$0xff] }
  0x32   :  { %v336_v50 = vld [vmem:[#allocation7 + $0x360] sm:$0xff]  ;;  %498 = vmatpush.msrb.mxu0 %v272_v49  ;;  %v277_v43 = vld [vmem:[#allocation7 + $0x188] sm:$0xff] }
  0x33   :  { %v400_v51 = vld [vmem:[#allocation7 + $0x560] sm:$0xff]  ;;  %518 = vmatpush.msrb.mxu1 %v336_v50  ;;  %v341_v44 = vld [vmem:[#allocation7 + $0x388] sm:$0xff] }
  0x34   :  { %v464_v52 = vld [vmem:[#allocation7 + $0x760] sm:$0xff]  ;;  %538 = vmatpush.msrb.mxu2 %v400_v51  ;;  %v409_v45 = vld [vmem:[#allocation7 + $0x5a8] sm:$0xff] }
  0x35   :  { %v268_v53 = vld [vmem:[#allocation7 + $0x140] sm:$0xff]  ;;  %558 = vmatpush.msrb.mxu3 %v464_v52  ;;  %v473_v46 = vld [vmem:[#allocation7 + $0x7a8] sm:$0xff] }
  0x36   :  { %v332_v54 = vld [vmem:[#allocation7 + $0x340] sm:$0xff]  ;;  %499 = vmatpush.msrb.mxu0 %v268_v53  ;;  %v273_v47 = vld [vmem:[#allocation7 + $0x168] sm:$0xff] }
  0x37   :  { %v396_v55 = vld [vmem:[#allocation7 + $0x540] sm:$0xff]  ;;  %519 = vmatpush.msrb.mxu1 %v332_v54  ;;  %v337_v48 = vld [vmem:[#allocation7 + $0x368] sm:$0xff] }
  0x38   :  { %v460_v56 = vld [vmem:[#allocation7 + $0x740] sm:$0xff]  ;;  %539 = vmatpush.msrb.mxu2 %v396_v55  ;;  %v405_v49 = vld [vmem:[#allocation7 + $0x588] sm:$0xff] }
  0x39   :  { %v264_v57 = vld [vmem:[#allocation7 + $0x120] sm:$0xff]  ;;  %559 = vmatpush.msrb.mxu3 %v460_v56  ;;  %v469_v50 = vld [vmem:[#allocation7 + $0x788] sm:$0xff] }
  0x3a   :  { %v328_v58 = vld [vmem:[#allocation7 + $0x320] sm:$0xff]  ;;  %500 = vmatpush.msrb.mxu0 %v264_v57  ;;  %v269_v51 = vld [vmem:[#allocation7 + $0x148] sm:$0xff] }
  0x3b   :  { %v392_v59 = vld [vmem:[#allocation7 + $0x520] sm:$0xff]  ;;  %520 = vmatpush.msrb.mxu1 %v328_v58  ;;  %v333_v52 = vld [vmem:[#allocation7 + $0x348] sm:$0xff] }
  0x3c   :  { %v456_v60 = vld [vmem:[#allocation7 + $0x720] sm:$0xff]  ;;  %540 = vmatpush.msrb.mxu2 %v392_v59  ;;  %v401_v53 = vld [vmem:[#allocation7 + $0x568] sm:$0xff] }
  0x3d   :  { %v260_v61 = vld [vmem:[#allocation7 + $0x100] sm:$0xff]  ;;  %560 = vmatpush.msrb.mxu3 %v456_v60  ;;  %v465_v54 = vld [vmem:[#allocation7 + $0x768] sm:$0xff] }
  0x3e   :  { %v324_v62 = vld [vmem:[#allocation7 + $0x300] sm:$0xff]  ;;  %501 = vmatpush.msrb.mxu0 %v260_v61  ;;  %v265_v55 = vld [vmem:[#allocation7 + $0x128] sm:$0xff] }
  0x3f   :  { %v388_v63 = vld [vmem:[#allocation7 + $0x500] sm:$0xff]  ;;  %521 = vmatpush.msrb.mxu1 %v324_v62  ;;  %v329_v56 = vld [vmem:[#allocation7 + $0x328] sm:$0xff] }
  0x40   :  { %v452_v0 = vld [vmem:[#allocation7 + $0x700] sm:$0xff]  ;;  %541 = vmatpush.msrb.mxu2 %v388_v63  ;;  %v397_v57 = vld [vmem:[#allocation7 + $0x548] sm:$0xff] }
  0x41   :  { %v256_v1 = vld [vmem:[#allocation7 + $0xe0] sm:$0xff]  ;;  %561 = vmatpush.msrb.mxu3 %v452_v0  ;;  %v461_v58 = vld [vmem:[#allocation7 + $0x748] sm:$0xff] }
  0x42   :  { %v320_v2 = vld [vmem:[#allocation7 + $0x2e0] sm:$0xff]  ;;  %502 = vmatpush.msrb.mxu0 %v256_v1  ;;  %v261_v59 = vld [vmem:[#allocation7 + $0x108] sm:$0xff] }
  0x43   :  { %v384_v3 = vld [vmem:[#allocation7 + $0x4e0] sm:$0xff]  ;;  %522 = vmatpush.msrb.mxu1 %v320_v2  ;;  %v325_v60 = vld [vmem:[#allocation7 + $0x308] sm:$0xff] }
  0x44   :  { %v448_v4 = vld [vmem:[#allocation7 + $0x6e0] sm:$0xff]  ;;  %542 = vmatpush.msrb.mxu2 %v384_v3  ;;  %v393_v61 = vld [vmem:[#allocation7 + $0x528] sm:$0xff] }
  0x45   :  { %v252_v5 = vld [vmem:[#allocation7 + $0xc0] sm:$0xff]  ;;  %562 = vmatpush.msrb.mxu3 %v448_v4  ;;  %v457_v62 = vld [vmem:[#allocation7 + $0x728] sm:$0xff] }
  0x46   :  { %v316_v6 = vld [vmem:[#allocation7 + $0x2c0] sm:$0xff]  ;;  %503 = vmatpush.msrb.mxu0 %v252_v5  ;;  %v257_v63 = vld [vmem:[#allocation7 + $0xe8] sm:$0xff] }
  0x47   :  { %v380_v7 = vld [vmem:[#allocation7 + $0x4c0] sm:$0xff]  ;;  %523 = vmatpush.msrb.mxu1 %v316_v6  ;;  %v321_v0 = vld [vmem:[#allocation7 + $0x2e8] sm:$0xff] }
  0x48   :  { %v444_v8 = vld [vmem:[#allocation7 + $0x6c0] sm:$0xff]  ;;  %543 = vmatpush.msrb.mxu2 %v380_v7  ;;  %v389_v1 = vld [vmem:[#allocation7 + $0x508] sm:$0xff] }
  0x49   :  { %v248_v9 = vld [vmem:[#allocation7 + $0xa0] sm:$0xff]  ;;  %563 = vmatpush.msrb.mxu3 %v444_v8  ;;  %v453_v2 = vld [vmem:[#allocation7 + $0x708] sm:$0xff] }
  0x4a   :  { %v312_v10 = vld [vmem:[#allocation7 + $0x2a0] sm:$0xff]  ;;  %504 = vmatpush.msrb.mxu0 %v248_v9  ;;  %v253_v3 = vld [vmem:[#allocation7 + $0xc8] sm:$0xff] }
  0x4b   :  { %v376_v11 = vld [vmem:[#allocation7 + $0x4a0] sm:$0xff]  ;;  %524 = vmatpush.msrb.mxu1 %v312_v10  ;;  %v317_v4 = vld [vmem:[#allocation7 + $0x2c8] sm:$0xff] }
  0x4c   :  { %v440_v12 = vld [vmem:[#allocation7 + $0x6a0] sm:$0xff]  ;;  %544 = vmatpush.msrb.mxu2 %v376_v11  ;;  %v385_v5 = vld [vmem:[#allocation7 + $0x4e8] sm:$0xff] }
  0x4d   :  { %v244_v13 = vld [vmem:[#allocation7 + $0x80] sm:$0xff]  ;;  %564 = vmatpush.msrb.mxu3 %v440_v12  ;;  %v449_v6 = vld [vmem:[#allocation7 + $0x6e8] sm:$0xff] }
  0x4e   :  { %v308_v14 = vld [vmem:[#allocation7 + $0x280] sm:$0xff]  ;;  %505 = vmatpush.msrb.mxu0 %v244_v13  ;;  %v249_v7 = vld [vmem:[#allocation7 + $0xa8] sm:$0xff] }
  0x4f   :  { %v372_v15 = vld [vmem:[#allocation7 + $0x480] sm:$0xff]  ;;  %525 = vmatpush.msrb.mxu1 %v308_v14  ;;  %v313_v8 = vld [vmem:[#allocation7 + $0x2a8] sm:$0xff] }
  0x50   :  { %v436_v16 = vld [vmem:[#allocation7 + $0x680] sm:$0xff]  ;;  %545 = vmatpush.msrb.mxu2 %v372_v15  ;;  %v381_v9 = vld [vmem:[#allocation7 + $0x4c8] sm:$0xff] }
  0x51   :  { %v240_v17 = vld [vmem:[#allocation7 + $0x60] sm:$0xff]  ;;  %565 = vmatpush.msrb.mxu3 %v436_v16  ;;  %v445_v10 = vld [vmem:[#allocation7 + $0x6c8] sm:$0xff] }
  0x52   :  { %v304_v18 = vld [vmem:[#allocation7 + $0x260] sm:$0xff]  ;;  %506 = vmatpush.msrb.mxu0 %v240_v17  ;;  %v245_v11 = vld [vmem:[#allocation7 + $0x88] sm:$0xff] }
  0x53   :  { %v368_v19 = vld [vmem:[#allocation7 + $0x460] sm:$0xff]  ;;  %526 = vmatpush.msrb.mxu1 %v304_v18  ;;  %v309_v12 = vld [vmem:[#allocation7 + $0x288] sm:$0xff] }
  0x54   :  { %v432_v20 = vld [vmem:[#allocation7 + $0x660] sm:$0xff]  ;;  %546 = vmatpush.msrb.mxu2 %v368_v19  ;;  %v377_v13 = vld [vmem:[#allocation7 + $0x4a8] sm:$0xff] }
  0x55   :  { %v236_v21 = vld [vmem:[#allocation7 + $0x40] sm:$0xff]  ;;  %566 = vmatpush.msrb.mxu3 %v432_v20  ;;  %v441_v14 = vld [vmem:[#allocation7 + $0x6a8] sm:$0xff] }
  0x56   :  { %v300_v22 = vld [vmem:[#allocation7 + $0x240] sm:$0xff]  ;;  %507 = vmatpush.msrb.mxu0 %v236_v21  ;;  %v241_v15 = vld [vmem:[#allocation7 + $0x68] sm:$0xff] }
  0x57   :  { %v364_v23 = vld [vmem:[#allocation7 + $0x440] sm:$0xff]  ;;  %527 = vmatpush.msrb.mxu1 %v300_v22  ;;  %v305_v16 = vld [vmem:[#allocation7 + $0x268] sm:$0xff] }
  0x58   :  { %v428_v24 = vld [vmem:[#allocation7 + $0x640] sm:$0xff]  ;;  %547 = vmatpush.msrb.mxu2 %v364_v23  ;;  %v237_v17 = vld [vmem:[#allocation7 + $0x48] sm:$0xff] }
  0x59   :  { %v232_v25 = vld [vmem:[#allocation7 + $0x20] sm:$0xff]  ;;  %567 = vmatpush.msrb.mxu3 %v428_v24  ;;  %v301_v18 = vld [vmem:[#allocation7 + $0x248] sm:$0xff] }
  0x5a   :  { %v296_v26 = vld [vmem:[#allocation7 + $0x220] sm:$0xff]  ;;  %508 = vmatpush.msrb.mxu0 %v232_v25  ;;  %v233_v19 = vld [vmem:[#allocation7 + $0x28] sm:$0xff] }
  0x5b   :  { %v360_v27 = vld [vmem:[#allocation7 + $0x420] sm:$0xff]  ;;  %528 = vmatpush.msrb.mxu1 %v296_v26  ;;  %v297_v20 = vld [vmem:[#allocation7 + $0x228] sm:$0xff] }
  0x5c   :  { %v424_v28 = vld [vmem:[#allocation7 + $0x620] sm:$0xff]  ;;  %548 = vmatpush.msrb.mxu2 %v360_v27  ;;  %v373_v21 = vld [vmem:[#allocation7 + $0x488] sm:$0xff] }
  0x5d   :  { %v228_v29 = vld [vmem:[#allocation7] sm:$0xff]  ;;  %568 = vmatpush.msrb.mxu3 %v424_v28  ;;  %v437_v22 = vld [vmem:[#allocation7 + $0x688] sm:$0xff] }
  0x5e   :  { %v292_v30 = vld [vmem:[#allocation7 + $0x200] sm:$0xff]  ;;  %509 = vmatpush.msrb.mxu0 %v228_v29  ;;  %v229_v23 = vld [vmem:[#allocation7 + $0x8] sm:$0xff] }
  0x5f   :  { %v356_v33 = vld [vmem:[#allocation7 + $0x400] sm:$0xff]  ;;  %529 = vmatpush.msrb.mxu1 %v292_v30  ;;  %v293_v24 = vld [vmem:[#allocation7 + $0x208] sm:$0xff] }
  0x60   :  { %v420_v34 = vld [vmem:[#allocation7 + $0x600] sm:$0xff]  ;;  %574 = vmatpush.msra.mxu0 %v289_v31  ;;  %549 = vmatpush.msrb.mxu2 %v356_v33  ;;  %v369_v25 = vld [vmem:[#allocation7 + $0x468] sm:$0xff]  ;;  %v134_v33 = vld [vmem:[#allocation5] sm:$0xf] }
  0x61   :  { %594 = vmatpush.msra.mxu1 %v353_v32  ;;  %569 = vmatpush.msrb.mxu3 %v420_v34  ;;  %v433_v26 = vld [vmem:[#allocation7 + $0x668] sm:$0xff]  ;;  %v136_v34 = vperm.slane %v134_v33, 0 }
  0x62   :  { %575 = vmatpush.msra.mxu0 %v285_v35  ;;  %614 = vmatpush.msra.mxu2 %v417_v37  ;;  %v365_v27 = vld [vmem:[#allocation7 + $0x448] sm:$0xff]  ;;  %v137_v35 = vperm.slane %v134_v33, 1 }
  0x63   :  { %595 = vmatpush.msra.mxu1 %v349_v36  ;;  %634 = vmatpush.msra.mxu3 %v481_v38  ;;  %v429_v28 = vld [vmem:[#allocation7 + $0x648] sm:$0xff] }
  0x64   :  { %576 = vmatpush.msra.mxu0 %v281_v39  ;;  %615 = vmatpush.msra.mxu2 %v413_v41  ;;  %v361_v29 = vld [vmem:[#allocation7 + $0x428] sm:$0xff]  ;;  %v354_v41 = vld [vmem:[#allocation7 + $0x3f0] sm:$0xff] }
  0x65   :  { %596 = vmatpush.msra.mxu1 %v345_v40  ;;  %635 = vmatpush.msra.mxu3 %v477_v42  ;;  %v425_v30 = vld [vmem:[#allocation7 + $0x628] sm:$0xff]  ;;  %v290_v40 = vld [vmem:[#allocation7 + $0x1f0] sm:$0xff] }
  0x66   :  { %577 = vmatpush.msra.mxu0 %v277_v43  ;;  %616 = vmatpush.msra.mxu2 %v409_v45  ;;  %v357_v31 = vld [vmem:[#allocation7 + $0x408] sm:$0xff]  ;;  %v286_v42 = vld [vmem:[#allocation7 + $0x1d0] sm:$0xff]  ;;  %v139_v45 = vperm.slane %v134_v33, 3 }
  0x67   :  { %597 = vmatpush.msra.mxu1 %v341_v44  ;;  %636 = vmatpush.msra.mxu3 %v473_v46  ;;  %v421_v32 = vld [vmem:[#allocation7 + $0x608] sm:$0xff]  ;;  %v350_v43 = vld [vmem:[#allocation7 + $0x3d0] sm:$0xff]  ;;  %v138_v44 = vperm.slane %v134_v33, 2 }
  0x68   :  { %578 = vmatpush.msra.mxu0 %v273_v47  ;;  %617 = vmatpush.msra.mxu2 %v405_v49  ;;  %v282_v46 = vld [vmem:[#allocation7 + $0x1b0] sm:$0xff] }
  0x69   :  { %598 = vmatpush.msra.mxu1 %v337_v48  ;;  %637 = vmatpush.msra.mxu3 %v469_v50  ;;  %v346_v47 = vld [vmem:[#allocation7 + $0x3b0] sm:$0xff] }
  0x6a   :  { %579 = vmatpush.msra.mxu0 %v269_v51  ;;  %618 = vmatpush.msra.mxu2 %v401_v53  ;;  %v342_v53 = vld [vmem:[#allocation7 + $0x390] sm:$0xff] }
  0x6b   :  { %599 = vmatpush.msra.mxu1 %v333_v52  ;;  %638 = vmatpush.msra.mxu3 %v465_v54  ;;  %v278_v52 = vld [vmem:[#allocation7 + $0x190] sm:$0xff] }
  0x6c   :  { %580 = vmatpush.msra.mxu0 %v265_v55  ;;  %619 = vmatpush.msra.mxu2 %v397_v57  ;;  %v418_v54 = vld [vmem:[#allocation7 + $0x5f0] sm:$0xff] }
  0x6d   :  { %600 = vmatpush.msra.mxu1 %v329_v56  ;;  %639 = vmatpush.msra.mxu3 %v461_v58  ;;  %v482_v55 = vld [vmem:[#allocation7 + $0x7f0] sm:$0xff] }
  0x6e   :  { %581 = vmatpush.msra.mxu0 %v261_v59  ;;  %620 = vmatpush.msra.mxu2 %v393_v61  ;;  %v338_v56 = vld [vmem:[#allocation7 + $0x370] sm:$0xff] }
  0x6f   :  { %601 = vmatpush.msra.mxu1 %v325_v60  ;;  %640 = vmatpush.msra.mxu3 %v457_v62  ;;  %v274_v57 = vld [vmem:[#allocation7 + $0x170] sm:$0xff] }
  0x70   :  { %582 = vmatpush.msra.mxu0 %v257_v63  ;;  %621 = vmatpush.msra.mxu2 %v389_v1  ;;  %v414_v58 = vld [vmem:[#allocation7 + $0x5d0] sm:$0xff] }
  0x71   :  { %602 = vmatpush.msra.mxu1 %v321_v0  ;;  %641 = vmatpush.msra.mxu3 %v453_v2  ;;  %v478_v59 = vld [vmem:[#allocation7 + $0x7d0] sm:$0xff] }
  0x72   :  { %583 = vmatpush.msra.mxu0 %v253_v3  ;;  %622 = vmatpush.msra.mxu2 %v385_v5  ;;  %v270_v60 = vld [vmem:[#allocation7 + $0x150] sm:$0xff] }
  0x73   :  { %603 = vmatpush.msra.mxu1 %v317_v4  ;;  %642 = vmatpush.msra.mxu3 %v449_v6  ;;  %v334_v61 = vld [vmem:[#allocation7 + $0x350] sm:$0xff] }
  0x74   :  { %584 = vmatpush.msra.mxu0 %v249_v7  ;;  %623 = vmatpush.msra.mxu2 %v381_v9  ;;  %v410_v62 = vld [vmem:[#allocation7 + $0x5b0] sm:$0xff] }
  0x75   :  { %604 = vmatpush.msra.mxu1 %v313_v8  ;;  %643 = vmatpush.msra.mxu3 %v445_v10  ;;  %v474_v63 = vld [vmem:[#allocation7 + $0x7b0] sm:$0xff] }
  0x76   :  { %585 = vmatpush.msra.mxu0 %v245_v11  ;;  %624 = vmatpush.msra.mxu2 %v377_v13  ;;  %v266_v0 = vld [vmem:[#allocation7 + $0x130] sm:$0xff] }
  0x77   :  { %605 = vmatpush.msra.mxu1 %v309_v12  ;;  %644 = vmatpush.msra.mxu3 %v441_v14  ;;  %v330_v1 = vld [vmem:[#allocation7 + $0x330] sm:$0xff] }
  0x78   :  { %586 = vmatpush.msra.mxu0 %v241_v15  ;;  %625 = vmatpush.msra.mxu2 %v373_v21  ;;  %v406_v2 = vld [vmem:[#allocation7 + $0x590] sm:$0xff] }
  0x79   :  { %606 = vmatpush.msra.mxu1 %v305_v16  ;;  %645 = vmatpush.msra.mxu3 %v437_v22  ;;  %v470_v3 = vld [vmem:[#allocation7 + $0x790] sm:$0xff] }
  0x7a   :  { %587 = vmatpush.msra.mxu0 %v237_v17  ;;  %626 = vmatpush.msra.mxu2 %v369_v25  ;;  %v262_v4 = vld [vmem:[#allocation7 + $0x110] sm:$0xff] }
  0x7b   :  { %607 = vmatpush.msra.mxu1 %v301_v18  ;;  %646 = vmatpush.msra.mxu3 %v433_v26  ;;  %v326_v5 = vld [vmem:[#allocation7 + $0x310] sm:$0xff] }
  0x7c   :  { %588 = vmatpush.msra.mxu0 %v233_v19  ;;  %627 = vmatpush.msra.mxu2 %v365_v27  ;;  %v402_v6 = vld [vmem:[#allocation7 + $0x570] sm:$0xff] }
  0x7d   :  { %608 = vmatpush.msra.mxu1 %v297_v20  ;;  %647 = vmatpush.msra.mxu3 %v429_v28  ;;  %v466_v7 = vld [vmem:[#allocation7 + $0x770] sm:$0xff] }
  0x7e   :  { %589 = vmatpush.msra.mxu0 %v229_v23  ;;  %628 = vmatpush.msra.mxu2 %v361_v29  ;;  %v258_v8 = vld [vmem:[#allocation7 + $0xf0] sm:$0xff] }
  0x7f   :  { %609 = vmatpush.msra.mxu1 %v293_v24  ;;  %648 = vmatpush.msra.mxu3 %v425_v30  ;;  %v322_v9 = vld [vmem:[#allocation7 + $0x2f0] sm:$0xff] }
  0x80   :  { %629 = vmatpush.msra.mxu2 %v357_v31  ;;  %v398_v10 = vld [vmem:[#allocation7 + $0x550] sm:$0xff] }
  0x81   :  { %649 = vmatpush.msra.mxu3 %v421_v32  ;;  %v462_v11 = vld [vmem:[#allocation7 + $0x750] sm:$0xff] }
  0x82   :  { %v254_v12 = vld [vmem:[#allocation7 + $0xd0] sm:$0xff] }
  0x83   :  { %v318_v13 = vld [vmem:[#allocation7 + $0x2d0] sm:$0xff] }
  0x84   :  { %v394_v14 = vld [vmem:[#allocation7 + $0x530] sm:$0xff] }
  0x85   :  { %v458_v15 = vld [vmem:[#allocation7 + $0x730] sm:$0xff] }
  0x86   :  { %v250_v16 = vld [vmem:[#allocation7 + $0xb0] sm:$0xff] }
  0x87   :  { %v314_v17 = vld [vmem:[#allocation7 + $0x2b0] sm:$0xff] }
  0x88   :  { %v390_v18 = vld [vmem:[#allocation7 + $0x510] sm:$0xff] }
  0x89   :  { %v454_v19 = vld [vmem:[#allocation7 + $0x710] sm:$0xff] }
  0x8a   :  { %v246_v20 = vld [vmem:[#allocation7 + $0x90] sm:$0xff] }
  0x8b   :  { %v310_v21 = vld [vmem:[#allocation7 + $0x290] sm:$0xff] }
  0x8c   :  { %v386_v22 = vld [vmem:[#allocation7 + $0x4f0] sm:$0xff] }
  0x8d   :  { %v450_v23 = vld [vmem:[#allocation7 + $0x6f0] sm:$0xff] }
  0x8e   :  { %v242_v24 = vld [vmem:[#allocation7 + $0x70] sm:$0xff] }
  0x8f   :  { %v306_v25 = vld [vmem:[#allocation7 + $0x270] sm:$0xff] }
  0x90   :  { %v382_v26 = vld [vmem:[#allocation7 + $0x4d0] sm:$0xff] }
  0x91   :  { %v446_v27 = vld [vmem:[#allocation7 + $0x6d0] sm:$0xff] }
  0x92   :  { %v238_v28 = vld [vmem:[#allocation7 + $0x50] sm:$0xff] }
  0x93   :  { %v302_v29 = vld [vmem:[#allocation7 + $0x250] sm:$0xff] }
  0x94   :  { %v378_v30 = vld [vmem:[#allocation7 + $0x4b0] sm:$0xff] }
  0x95   :  { %v442_v31 = vld [vmem:[#allocation7 + $0x6b0] sm:$0xff] }
  0x96   :  { %v234_v32 = vld [vmem:[#allocation7 + $0x30] sm:$0xff] }
  0x97   :  { %v298_v33 = vld [vmem:[#allocation7 + $0x230] sm:$0xff] }
  0xa4   :  { %v165_v36 = vpop.f32.mrf.mxu0  ;;  %v185_v37 = vpop.f32.mrf.mxu1 }
  0xa5   :  { %v3032_v38 = vadd.f32 %v165_v36, %v136_v34  ;;  %v3034_v39 = vadd.f32 %v185_v37, %v137_v35  ;;  %v374_v34 = vld [vmem:[#allocation7 + $0x490] sm:$0xff] }
  0xa6   :  { %v438_v35 = vld [vmem:[#allocation7 + $0x690] sm:$0xff] }
  0xa7   :  { %510 = vmatmul.f32.vlgmr.msrb.gmra.mxu0 %v3032_v38  ;;  %530 = vmatmul.f32.vlgmr.msrb.gmra.mxu1 %v3034_v39  ;;  %v230_v36 = vld [vmem:[#allocation7 + $0x10] sm:$0xff] }
  0xa8   :  { %654 = vmatpush.msrb.mxu0 %v290_v40  ;;  %674 = vmatpush.msrb.mxu1 %v354_v41  ;;  %v294_v37 = vld [vmem:[#allocation7 + $0x210] sm:$0xff] }
  0xa9   :  { %v370_v40 = vld [vmem:[#allocation7 + $0x470] sm:$0xff] }
  0xaa   :  { %655 = vmatpush.msrb.mxu0 %v286_v42  ;;  %675 = vmatpush.msrb.mxu1 %v350_v43  ;;  %v434_v41 = vld [vmem:[#allocation7 + $0x670] sm:$0xff]  ;;  %v291_v42 = vld [vmem:[#allocation7 + $0x1f8] sm:$0xff] }
  0xab   :  { %v205_v48 = vpop.f32.mrf.mxu2  ;;  %v225_v49 = vpop.f32.mrf.mxu3  ;;  %v355_v43 = vld [vmem:[#allocation7 + $0x3f8] sm:$0xff] }
  0xac   :  { %v3038_v50 = vadd.f32 %v205_v48, %v138_v44  ;;  %v3040_v51 = vadd.f32 %v225_v49, %v139_v45  ;;  %656 = vmatpush.msrb.mxu0 %v282_v46  ;;  %676 = vmatpush.msrb.mxu1 %v346_v47  ;;  %v366_v44 = vld [vmem:[#allocation7 + $0x450] sm:$0xff]  ;;  %v287_v46 = vld [vmem:[#allocation7 + $0x1d8] sm:$0xff] }
  0xad   :  { %v430_v45 = vld [vmem:[#allocation7 + $0x650] sm:$0xff]  ;;  %v351_v47 = vld [vmem:[#allocation7 + $0x3d8] sm:$0xff] }
  0xae   :  { %550 = vmatmul.f32.vlgmr.msrb.gmra.mxu2 %v3038_v50  ;;  %570 = vmatmul.f32.vlgmr.msrb.gmra.mxu3 %v3040_v51  ;;  %v362_v48 = vld [vmem:[#allocation7 + $0x430] sm:$0xff] }
  0xaf   :  { %657 = vmatpush.msrb.mxu0 %v278_v52  ;;  %677 = vmatpush.msrb.mxu1 %v342_v53  ;;  %v426_v49 = vld [vmem:[#allocation7 + $0x630] sm:$0xff]  ;;  %v283_v52 = vld [vmem:[#allocation7 + $0x1b8] sm:$0xff] }
  0xb0   :  { %694 = vmatpush.msrb.mxu2 %v418_v54  ;;  %714 = vmatpush.msrb.mxu3 %v482_v55  ;;  %v347_v53 = vld [vmem:[#allocation7 + $0x3b8] sm:$0xff]  ;;  %v358_v54 = vld [vmem:[#allocation7 + $0x410] sm:$0xff] }
  0xb1   :  { %590 = vmatmul.f32.vlgmr.msra.gmra.mxu0 %v3032_v38  ;;  %678 = vmatpush.msrb.mxu1 %v338_v56  ;;  %v422_v55 = vld [vmem:[#allocation7 + $0x610] sm:$0xff]  ;;  %v279_v56 = vld [vmem:[#allocation7 + $0x198] sm:$0xff] }
  0xb2   :  { %658 = vmatpush.msrb.mxu0 %v274_v57  ;;  %695 = vmatpush.msrb.mxu2 %v414_v58  ;;  %v343_v57 = vld [vmem:[#allocation7 + $0x398] sm:$0xff] }
  0xb3   :  { %715 = vmatpush.msrb.mxu3 %v478_v59  ;;  %610 = vmatmul.f32.vlgmr.msra.gmra.mxu1 %v3034_v39  ;;  %v419_v58 = vld [vmem:[#allocation7 + $0x5f8] sm:$0xff] }
  0xb4   :  { %659 = vmatpush.msrb.mxu0 %v270_v60  ;;  %679 = vmatpush.msrb.mxu1 %v334_v61  ;;  %v483_v59 = vld [vmem:[#allocation7 + $0x7f8] sm:$0xff] }
  0xb5   :  { %696 = vmatpush.msrb.mxu2 %v410_v62  ;;  %716 = vmatpush.msrb.mxu3 %v474_v63  ;;  %v275_v60 = vld [vmem:[#allocation7 + $0x178] sm:$0xff] }
  0xb6   :  { %660 = vmatpush.msrb.mxu0 %v266_v0  ;;  %680 = vmatpush.msrb.mxu1 %v330_v1  ;;  %v339_v61 = vld [vmem:[#allocation7 + $0x378] sm:$0xff] }
  0xb7   :  { %697 = vmatpush.msrb.mxu2 %v406_v2  ;;  %717 = vmatpush.msrb.mxu3 %v470_v3  ;;  %v415_v62 = vld [vmem:[#allocation7 + $0x5d8] sm:$0xff] }
  0xb8   :  { %630 = vmatmul.f32.vlgmr.msra.gmra.mxu2 %v3038_v50  ;;  %650 = vmatmul.f32.vlgmr.msra.gmra.mxu3 %v3040_v51  ;;  %v479_v63 = vld [vmem:[#allocation7 + $0x7d8] sm:$0xff] }
  0xb9   :  { %661 = vmatpush.msrb.mxu0 %v262_v4  ;;  %681 = vmatpush.msrb.mxu1 %v326_v5  ;;  %v271_v0 = vld [vmem:[#allocation7 + $0x158] sm:$0xff] }
  0xba   :  { %698 = vmatpush.msrb.mxu2 %v402_v6  ;;  %718 = vmatpush.msrb.mxu3 %v466_v7  ;;  %v335_v1 = vld [vmem:[#allocation7 + $0x358] sm:$0xff] }
  0xbb   :  { %662 = vmatpush.msrb.mxu0 %v258_v8  ;;  %682 = vmatpush.msrb.mxu1 %v322_v9  ;;  %v411_v2 = vld [vmem:[#allocation7 + $0x5b8] sm:$0xff] }
  0xbc   :  { %699 = vmatpush.msrb.mxu2 %v398_v10  ;;  %719 = vmatpush.msrb.mxu3 %v462_v11  ;;  %v475_v3 = vld [vmem:[#allocation7 + $0x7b8] sm:$0xff] }
  0xbd   :  { %663 = vmatpush.msrb.mxu0 %v254_v12  ;;  %683 = vmatpush.msrb.mxu1 %v318_v13  ;;  %v267_v4 = vld [vmem:[#allocation7 + $0x138] sm:$0xff] }
  0xbe   :  { %700 = vmatpush.msrb.mxu2 %v394_v14  ;;  %720 = vmatpush.msrb.mxu3 %v458_v15  ;;  %v331_v5 = vld [vmem:[#allocation7 + $0x338] sm:$0xff] }
  0xbf   :  { %664 = vmatpush.msrb.mxu0 %v250_v16  ;;  %684 = vmatpush.msrb.mxu1 %v314_v17  ;;  %v407_v6 = vld [vmem:[#allocation7 + $0x598] sm:$0xff] }
  0xc0   :  { %701 = vmatpush.msrb.mxu2 %v390_v18  ;;  %721 = vmatpush.msrb.mxu3 %v454_v19  ;;  %v471_v7 = vld [vmem:[#allocation7 + $0x798] sm:$0xff] }
  0xc1   :  { %665 = vmatpush.msrb.mxu0 %v246_v20  ;;  %685 = vmatpush.msrb.mxu1 %v310_v21  ;;  %v263_v8 = vld [vmem:[#allocation7 + $0x118] sm:$0xff] }
  0xc2   :  { %702 = vmatpush.msrb.mxu2 %v386_v22  ;;  %722 = vmatpush.msrb.mxu3 %v450_v23  ;;  %v327_v9 = vld [vmem:[#allocation7 + $0x318] sm:$0xff] }
  0xc3   :  { %666 = vmatpush.msrb.mxu0 %v242_v24  ;;  %686 = vmatpush.msrb.mxu1 %v306_v25  ;;  %v403_v10 = vld [vmem:[#allocation7 + $0x578] sm:$0xff] }
  0xc4   :  { %703 = vmatpush.msrb.mxu2 %v382_v26  ;;  %723 = vmatpush.msrb.mxu3 %v446_v27  ;;  %v467_v11 = vld [vmem:[#allocation7 + $0x778] sm:$0xff] }
  0xc5   :  { %667 = vmatpush.msrb.mxu0 %v238_v28  ;;  %687 = vmatpush.msrb.mxu1 %v302_v29  ;;  %v259_v12 = vld [vmem:[#allocation7 + $0xf8] sm:$0xff] }
  0xc6   :  { %704 = vmatpush.msrb.mxu2 %v378_v30  ;;  %724 = vmatpush.msrb.mxu3 %v442_v31  ;;  %v323_v13 = vld [vmem:[#allocation7 + $0x2f8] sm:$0xff] }
  0xc7   :  { %668 = vmatpush.msrb.mxu0 %v234_v32  ;;  %688 = vmatpush.msrb.mxu1 %v298_v33  ;;  %v399_v14 = vld [vmem:[#allocation7 + $0x558] sm:$0xff] }
  0xc8   :  { %705 = vmatpush.msrb.mxu2 %v374_v34  ;;  %725 = vmatpush.msrb.mxu3 %v438_v35  ;;  %v463_v15 = vld [vmem:[#allocation7 + $0x758] sm:$0xff] }
  0xc9   :  { %669 = vmatpush.msrb.mxu0 %v230_v36  ;;  %689 = vmatpush.msrb.mxu1 %v294_v37  ;;  %v255_v16 = vld [vmem:[#allocation7 + $0xd8] sm:$0xff] }
  0xca   :  { %706 = vmatpush.msrb.mxu2 %v370_v40  ;;  %726 = vmatpush.msrb.mxu3 %v434_v41  ;;  %v319_v17 = vld [vmem:[#allocation7 + $0x2d8] sm:$0xff] }
  0xcb   :  { %670 = vmatmul.f32.vlgmr.msrb.gmra.mxu0 %v3032_v38  ;;  %690 = vmatmul.f32.vlgmr.msrb.gmra.mxu1 %v3034_v39  ;;  %v395_v18 = vld [vmem:[#allocation7 + $0x538] sm:$0xff] }
  0xcc   :  { %734 = vmatpush.msra.mxu0 %v291_v42  ;;  %754 = vmatpush.msra.mxu1 %v355_v43  ;;  %v459_v19 = vld [vmem:[#allocation7 + $0x738] sm:$0xff] }
  0xcd   :  { %707 = vmatpush.msrb.mxu2 %v366_v44  ;;  %727 = vmatpush.msrb.mxu3 %v430_v45  ;;  %v251_v20 = vld [vmem:[#allocation7 + $0xb8] sm:$0xff] }
  0xce   :  { %735 = vmatpush.msra.mxu0 %v287_v46  ;;  %755 = vmatpush.msra.mxu1 %v351_v47  ;;  %v315_v21 = vld [vmem:[#allocation7 + $0x2b8] sm:$0xff] }
  0xcf   :  { %708 = vmatpush.msrb.mxu2 %v362_v48  ;;  %728 = vmatpush.msrb.mxu3 %v426_v49  ;;  %v391_v22 = vld [vmem:[#allocation7 + $0x518] sm:$0xff]  ;;  %v879_v48 = vld [vmem:[#allocation7 + $0x9e0] sm:$0xff] }
  0xd0   :  { %736 = vmatpush.msra.mxu0 %v283_v52  ;;  %756 = vmatpush.msra.mxu1 %v347_v53  ;;  %v455_v23 = vld [vmem:[#allocation7 + $0x718] sm:$0xff]  ;;  %v943_v49 = vld [vmem:[#allocation7 + $0xbe0] sm:$0xff] }
  0xd1   :  { %709 = vmatpush.msrb.mxu2 %v358_v54  ;;  %729 = vmatpush.msrb.mxu3 %v422_v55  ;;  %v247_v24 = vld [vmem:[#allocation7 + $0x98] sm:$0xff]  ;;  %v875_v54 = vld [vmem:[#allocation7 + $0x9c0] sm:$0xff] }
  0xd2   :  { %710 = vmatmul.f32.vlgmr.msrb.gmra.mxu2 %v3038_v50  ;;  %730 = vmatmul.f32.vlgmr.msrb.gmra.mxu3 %v3040_v51  ;;  %v311_v25 = vld [vmem:[#allocation7 + $0x298] sm:$0xff]  ;;  %v939_v55 = vld [vmem:[#allocation7 + $0xbc0] sm:$0xff] }
  0xd3   :  { %737 = vmatpush.msra.mxu0 %v279_v56  ;;  %757 = vmatpush.msra.mxu1 %v343_v57  ;;  %v387_v26 = vld [vmem:[#allocation7 + $0x4f8] sm:$0xff] }
  0xd4   :  { %774 = vmatpush.msra.mxu2 %v419_v58  ;;  %794 = vmatpush.msra.mxu3 %v483_v59  ;;  %v451_v27 = vld [vmem:[#allocation7 + $0x6f8] sm:$0xff]  ;;  %v871_v58 = vld [vmem:[#allocation7 + $0x9a0] sm:$0xff] }
  0xd5   :  { %738 = vmatpush.msra.mxu0 %v275_v60  ;;  %758 = vmatpush.msra.mxu1 %v339_v61  ;;  %v243_v28 = vld [vmem:[#allocation7 + $0x78] sm:$0xff]  ;;  %v935_v59 = vld [vmem:[#allocation7 + $0xba0] sm:$0xff] }
  0xd6   :  { %775 = vmatpush.msra.mxu2 %v415_v62  ;;  %795 = vmatpush.msra.mxu3 %v479_v63  ;;  %v307_v29 = vld [vmem:[#allocation7 + $0x278] sm:$0xff]  ;;  %v1007_v60 = vld [vmem:[#allocation7 + $0xde0] sm:$0xff] }
  0xd7   :  { %739 = vmatpush.msra.mxu0 %v271_v0  ;;  %759 = vmatpush.msra.mxu1 %v335_v1  ;;  %v383_v30 = vld [vmem:[#allocation7 + $0x4d8] sm:$0xff]  ;;  %v867_v61 = vld [vmem:[#allocation7 + $0x980] sm:$0xff] }
  0xd8   :  { %776 = vmatpush.msra.mxu2 %v411_v2  ;;  %796 = vmatpush.msra.mxu3 %v475_v3  ;;  %v447_v31 = vld [vmem:[#allocation7 + $0x6d8] sm:$0xff]  ;;  %v931_v62 = vld [vmem:[#allocation7 + $0xb80] sm:$0xff] }
  0xd9   :  { %740 = vmatpush.msra.mxu0 %v267_v4  ;;  %760 = vmatpush.msra.mxu1 %v331_v5  ;;  %v239_v32 = vld [vmem:[#allocation7 + $0x58] sm:$0xff]  ;;  %v1003_v63 = vld [vmem:[#allocation7 + $0xdc0] sm:$0xff] }
  0xda   :  { %777 = vmatpush.msra.mxu2 %v407_v6  ;;  %797 = vmatpush.msra.mxu3 %v471_v7  ;;  %v303_v33 = vld [vmem:[#allocation7 + $0x258] sm:$0xff]  ;;  %v863_v0 = vld [vmem:[#allocation7 + $0x960] sm:$0xff] }
  0xdb   :  { %741 = vmatpush.msra.mxu0 %v263_v8  ;;  %761 = vmatpush.msra.mxu1 %v327_v9  ;;  %v379_v34 = vld [vmem:[#allocation7 + $0x4b8] sm:$0xff]  ;;  %v927_v1 = vld [vmem:[#allocation7 + $0xb60] sm:$0xff] }
  0xdc   :  { %778 = vmatpush.msra.mxu2 %v403_v10  ;;  %798 = vmatpush.msra.mxu3 %v467_v11  ;;  %v443_v35 = vld [vmem:[#allocation7 + $0x6b8] sm:$0xff]  ;;  %v999_v2 = vld [vmem:[#allocation7 + $0xda0] sm:$0xff] }
  0xdd   :  { %742 = vmatpush.msra.mxu0 %v259_v12  ;;  %762 = vmatpush.msra.mxu1 %v323_v13  ;;  %v235_v36 = vld [vmem:[#allocation7 + $0x38] sm:$0xff]  ;;  %v859_v3 = vld [vmem:[#allocation7 + $0x940] sm:$0xff] }
  0xde   :  { %779 = vmatpush.msra.mxu2 %v399_v14  ;;  %799 = vmatpush.msra.mxu3 %v463_v15  ;;  %v299_v37 = vld [vmem:[#allocation7 + $0x238] sm:$0xff]  ;;  %v923_v4 = vld [vmem:[#allocation7 + $0xb40] sm:$0xff] }
  0xdf   :  { %743 = vmatpush.msra.mxu0 %v255_v16  ;;  %763 = vmatpush.msra.mxu1 %v319_v17  ;;  %v375_v40 = vld [vmem:[#allocation7 + $0x498] sm:$0xff]  ;;  %v995_v5 = vld [vmem:[#allocation7 + $0xd80] sm:$0xff] }
  0xe0   :  { %780 = vmatpush.msra.mxu2 %v395_v18  ;;  %800 = vmatpush.msra.mxu3 %v459_v19  ;;  %v439_v41 = vld [vmem:[#allocation7 + $0x698] sm:$0xff]  ;;  %v855_v6 = vld [vmem:[#allocation7 + $0x920] sm:$0xff] }
  0xe1   :  { %744 = vmatpush.msra.mxu0 %v251_v20  ;;  %764 = vmatpush.msra.mxu1 %v315_v21  ;;  %v231_v42 = vld [vmem:[#allocation7 + $0x18] sm:$0xff]  ;;  %v919_v7 = vld [vmem:[#allocation7 + $0xb20] sm:$0xff] }
  0xe2   :  { %781 = vmatpush.msra.mxu2 %v391_v22  ;;  %801 = vmatpush.msra.mxu3 %v455_v23  ;;  %v295_v43 = vld [vmem:[#allocation7 + $0x218] sm:$0xff]  ;;  %v991_v8 = vld [vmem:[#allocation7 + $0xd60] sm:$0xff] }
  0xe3   :  { %745 = vmatpush.msra.mxu0 %v247_v24  ;;  %765 = vmatpush.msra.mxu1 %v311_v25  ;;  %v371_v44 = vld [vmem:[#allocation7 + $0x478] sm:$0xff]  ;;  %v851_v9 = vld [vmem:[#allocation7 + $0x900] sm:$0xff] }
  0xe4   :  { %782 = vmatpush.msra.mxu2 %v387_v26  ;;  %802 = vmatpush.msra.mxu3 %v451_v27  ;;  %v435_v45 = vld [vmem:[#allocation7 + $0x678] sm:$0xff]  ;;  %v915_v10 = vld [vmem:[#allocation7 + $0xb00] sm:$0xff] }
  0xe5   :  { %746 = vmatpush.msra.mxu0 %v243_v28  ;;  %766 = vmatpush.msra.mxu1 %v307_v29  ;;  %v367_v46 = vld [vmem:[#allocation7 + $0x458] sm:$0xff]  ;;  %v987_v11 = vld [vmem:[#allocation7 + $0xd40] sm:$0xff] }
  0xe6   :  { %783 = vmatpush.msra.mxu2 %v383_v30  ;;  %803 = vmatpush.msra.mxu3 %v447_v31  ;;  %v431_v47 = vld [vmem:[#allocation7 + $0x658] sm:$0xff]  ;;  %v847_v12 = vld [vmem:[#allocation7 + $0x8e0] sm:$0xff] }
  0xe7   :  { %747 = vmatpush.msra.mxu0 %v239_v32  ;;  %767 = vmatpush.msra.mxu1 %v303_v33  ;;  %v363_v52 = vld [vmem:[#allocation7 + $0x438] sm:$0xff]  ;;  %v911_v13 = vld [vmem:[#allocation7 + $0xae0] sm:$0xff]  ;;  %v880_v32 = vld [vmem:[#allocation7 + $0x9e8] sm:$0xff] }
  0xe8   :  { %784 = vmatpush.msra.mxu2 %v379_v34  ;;  %804 = vmatpush.msra.mxu3 %v443_v35  ;;  %v427_v53 = vld [vmem:[#allocation7 + $0x638] sm:$0xff]  ;;  %v843_v14 = vld [vmem:[#allocation7 + $0x8c0] sm:$0xff]  ;;  %v944_v33 = vld [vmem:[#allocation7 + $0xbe8] sm:$0xff] }
  0xe9   :  { %748 = vmatpush.msra.mxu0 %v235_v36  ;;  %768 = vmatpush.msra.mxu1 %v299_v37  ;;  %v359_v56 = vld [vmem:[#allocation7 + $0x418] sm:$0xff]  ;;  %v907_v15 = vld [vmem:[#allocation7 + $0xac0] sm:$0xff]  ;;  %v876_v34 = vld [vmem:[#allocation7 + $0x9c8] sm:$0xff] }
  0xea   :  { %785 = vmatpush.msra.mxu2 %v375_v40  ;;  %805 = vmatpush.msra.mxu3 %v439_v41  ;;  %v423_v57 = vld [vmem:[#allocation7 + $0x618] sm:$0xff]  ;;  %v839_v16 = vld [vmem:[#allocation7 + $0x8a0] sm:$0xff]  ;;  %v940_v35 = vld [vmem:[#allocation7 + $0xbc8] sm:$0xff] }
  0xeb   :  { %749 = vmatpush.msra.mxu0 %v231_v42  ;;  %769 = vmatpush.msra.mxu1 %v295_v43  ;;  %v903_v17 = vld [vmem:[#allocation7 + $0xaa0] sm:$0xff]  ;;  %v872_v37 = vld [vmem:[#allocation7 + $0x9a8] sm:$0xff] }
  0xec   :  { %786 = vmatpush.msra.mxu2 %v371_v44  ;;  %806 = vmatpush.msra.mxu3 %v435_v45  ;;  %v835_v18 = vld [vmem:[#allocation7 + $0x880] sm:$0xff]  ;;  %v936_v40 = vld [vmem:[#allocation7 + $0xba8] sm:$0xff] }
  0xed   :  { %750 = vmatmul.f32.vlgmr.msra.gmra.mxu0 %v3032_v38  ;;  %770 = vmatmul.f32.vlgmr.msra.gmra.mxu1 %v3034_v39  ;;  %v899_v19 = vld [vmem:[#allocation7 + $0xa80] sm:$0xff]  ;;  %v868_v42 = vld [vmem:[#allocation7 + $0x988] sm:$0xff] }
  0xee   :  { %787 = vmatpush.msra.mxu2 %v367_v46  ;;  %807 = vmatpush.msra.mxu3 %v431_v47  ;;  %v831_v20 = vld [vmem:[#allocation7 + $0x860] sm:$0xff]  ;;  %v932_v43 = vld [vmem:[#allocation7 + $0xb88] sm:$0xff] }
  0xef   :  { %1086 = vmatpush.msrb.mxu0 %v879_v48  ;;  %1106 = vmatpush.msrb.mxu1 %v943_v49  ;;  %v895_v21 = vld [vmem:[#allocation7 + $0xa60] sm:$0xff]  ;;  %v864_v44 = vld [vmem:[#allocation7 + $0x968] sm:$0xff] }
  0xf0   :  { %788 = vmatpush.msra.mxu2 %v363_v52  ;;  %808 = vmatpush.msra.mxu3 %v427_v53  ;;  %v983_v22 = vld [vmem:[#allocation7 + $0xd20] sm:$0xff]  ;;  %v928_v45 = vld [vmem:[#allocation7 + $0xb68] sm:$0xff] }
  0xf1   :  { %1087 = vmatpush.msrb.mxu0 %v875_v54  ;;  %1107 = vmatpush.msrb.mxu1 %v939_v55  ;;  %v827_v23 = vld [vmem:[#allocation7 + $0x840] sm:$0xff]  ;;  %v860_v46 = vld [vmem:[#allocation7 + $0x948] sm:$0xff] }
  0xf2   :  { %789 = vmatpush.msra.mxu2 %v359_v56  ;;  %809 = vmatpush.msra.mxu3 %v423_v57  ;;  %v891_v24 = vld [vmem:[#allocation7 + $0xa40] sm:$0xff]  ;;  %v924_v47 = vld [vmem:[#allocation7 + $0xb48] sm:$0xff] }
  0xf3   :  { %790 = vmatmul.f32.vlgmr.msra.gmra.mxu2 %v3038_v50  ;;  %810 = vmatmul.f32.vlgmr.msra.gmra.mxu3 %v3040_v51  ;;  %v979_v25 = vld [vmem:[#allocation7 + $0xd00] sm:$0xff]  ;;  %v856_v52 = vld [vmem:[#allocation7 + $0x928] sm:$0xff] }
  0xf4   :  { %1088 = vmatpush.msrb.mxu0 %v871_v58  ;;  %1108 = vmatpush.msrb.mxu1 %v935_v59  ;;  %v975_v26 = vld [vmem:[#allocation7 + $0xce0] sm:$0xff]  ;;  %v920_v53 = vld [vmem:[#allocation7 + $0xb28] sm:$0xff] }
  0xf5   :  { %1126 = vmatpush.msrb.mxu2 %v1007_v60  ;;  %v823_v27 = vld [vmem:[#allocation7 + $0x820] sm:$0xff]  ;;  %v852_v55 = vld [vmem:[#allocation7 + $0x908] sm:$0xff] }
  0xf6   :  { %1089 = vmatpush.msrb.mxu0 %v867_v61  ;;  %1109 = vmatpush.msrb.mxu1 %v931_v62  ;;  %v887_v28 = vld [vmem:[#allocation7 + $0xa20] sm:$0xff]  ;;  %v916_v56 = vld [vmem:[#allocation7 + $0xb08] sm:$0xff] }
  0xf7   :  { %1127 = vmatpush.msrb.mxu2 %v1003_v63  ;;  %v971_v29 = vld [vmem:[#allocation7 + $0xcc0] sm:$0xff]  ;;  %v848_v59 = vld [vmem:[#allocation7 + $0x8e8] sm:$0xff] }
  0xf8   :  { %1090 = vmatpush.msrb.mxu0 %v863_v0  ;;  %1110 = vmatpush.msrb.mxu1 %v927_v1  ;;  %v819_v30 = vld [vmem:[#allocation7 + $0x800] sm:$0xff]  ;;  %v912_v60 = vld [vmem:[#allocation7 + $0xae8] sm:$0xff] }
  0xf9   :  { %1128 = vmatpush.msrb.mxu2 %v999_v2  ;;  %v883_v31 = vld [vmem:[#allocation7 + $0xa00] sm:$0xff]  ;;  %v1008_v61 = vld [vmem:[#allocation7 + $0xde8] sm:$0xff] }
  0xfa   :  { %1091 = vmatpush.msrb.mxu0 %v859_v3  ;;  %1111 = vmatpush.msrb.mxu1 %v923_v4  ;;  %v967_v36 = vld [vmem:[#allocation7 + $0xca0] sm:$0xff]  ;;  %v844_v62 = vld [vmem:[#allocation7 + $0x8c8] sm:$0xff] }
  0xfb   :  { %1129 = vmatpush.msrb.mxu2 %v995_v5  ;;  %v963_v41 = vld [vmem:[#allocation7 + $0xc80] sm:$0xff]  ;;  %v908_v63 = vld [vmem:[#allocation7 + $0xac8] sm:$0xff] }
  0xfc   :  { %1092 = vmatpush.msrb.mxu0 %v855_v6  ;;  %1112 = vmatpush.msrb.mxu1 %v919_v7  ;;  %v959_v48 = vld [vmem:[#allocation7 + $0xc60] sm:$0xff]  ;;  %v840_v0 = vld [vmem:[#allocation7 + $0x8a8] sm:$0xff] }
  0xfd   :  { %1130 = vmatpush.msrb.mxu2 %v991_v8  ;;  %v955_v49 = vld [vmem:[#allocation7 + $0xc40] sm:$0xff]  ;;  %v904_v1 = vld [vmem:[#allocation7 + $0xaa8] sm:$0xff] }
  0xfe   :  { %1093 = vmatpush.msrb.mxu0 %v851_v9  ;;  %1113 = vmatpush.msrb.mxu1 %v915_v10  ;;  %v951_v54 = vld [vmem:[#allocation7 + $0xc20] sm:$0xff]  ;;  %v1004_v3 = vld [vmem:[#allocation7 + $0xdc8] sm:$0xff] }
  0xff   :  { %1131 = vmatpush.msrb.mxu2 %v987_v11  ;;  %v1071_v57 = vld [vmem:[#allocation7 + $0xfe0] sm:$0xff]  ;;  %v1000_v5 = vld [vmem:[#allocation7 + $0xda8] sm:$0xff] }
 0x100   :  { %1094 = vmatpush.msrb.mxu0 %v847_v12  ;;  %1114 = vmatpush.msrb.mxu1 %v911_v13  ;;  %v947_v58 = vld [vmem:[#allocation7 + $0xc00] sm:$0xff]  ;;  %v836_v6 = vld [vmem:[#allocation7 + $0x888] sm:$0xff] }
 0x101   :  { %1132 = vmatpush.msrb.mxu2 %v983_v22  ;;  %1146 = vmatpush.msrb.mxu3 %v1071_v57  ;;  %v1067_v2 = vld [vmem:[#allocation7 + $0xfc0] sm:$0xff]  ;;  %v900_v7 = vld [vmem:[#allocation7 + $0xa88] sm:$0xff] }
 0x102   :  { %1095 = vmatpush.msrb.mxu0 %v843_v14  ;;  %1115 = vmatpush.msrb.mxu1 %v907_v15  ;;  %v1063_v4 = vld [vmem:[#allocation7 + $0xfa0] sm:$0xff]  ;;  %v996_v10 = vld [vmem:[#allocation7 + $0xd88] sm:$0xff] }
 0x103   :  { %1133 = vmatpush.msrb.mxu2 %v979_v25  ;;  %1147 = vmatpush.msrb.mxu3 %v1067_v2  ;;  %v3056_v8 = vld [vmem:[#allocation8] ss:$4 sm:$0xf]  ;;  %v869_v2 = vld [vmem:[#allocation7 + $0x990] sm:$0xff] }
 0x104   :  { %1096 = vmatpush.msrb.mxu0 %v839_v16  ;;  %1116 = vmatpush.msrb.mxu1 %v903_v17  ;;  %v1059_v9 = vld [vmem:[#allocation7 + $0xf80] sm:$0xff]  ;;  %v832_v11 = vld [vmem:[#allocation7 + $0x868] sm:$0xff]  ;;  %v486_v15 = vperm.slane %v3056_v8, 0 }
 0x105   :  { %1134 = vmatpush.msrb.mxu2 %v975_v26  ;;  %v896_v12 = vld [vmem:[#allocation7 + $0xa68] sm:$0xff]  ;;  %1148 = vmatpush.msrb.mxu3 %v1063_v4  ;;  %v1055_v13 = vld [vmem:[#allocation7 + $0xf60] sm:$0xff] }
 0x106   :  { %1097 = vmatpush.msrb.mxu0 %v835_v18  ;;  %1117 = vmatpush.msrb.mxu1 %v899_v19  ;;  %v992_v14 = vld [vmem:[#allocation7 + $0xd68] sm:$0xff]  ;;  %v1051_v18 = vld [vmem:[#allocation7 + $0xf40] sm:$0xff] }
 0x107   :  { %1135 = vmatpush.msrb.mxu2 %v971_v29  ;;  %v828_v16 = vld [vmem:[#allocation7 + $0x848] sm:$0xff]  ;;  %1149 = vmatpush.msrb.mxu3 %v1059_v9  ;;  %v1047_v26 = vld [vmem:[#allocation7 + $0xf20] sm:$0xff] }
 0x108   :  { %1098 = vmatpush.msrb.mxu0 %v831_v20  ;;  %1118 = vmatpush.msrb.mxu1 %v895_v21  ;;  %v892_v17 = vld [vmem:[#allocation7 + $0xa48] sm:$0xff]  ;;  %v1019_v57 = vld [vmem:[#allocation7 + $0xe40] sm:$0xff] }
 0x109   :  { %1136 = vmatpush.msrb.mxu2 %v967_v36  ;;  %v988_v19 = vld [vmem:[#allocation7 + $0xd48] sm:$0xff]  ;;  %1150 = vmatpush.msrb.mxu3 %v1055_v13 }
 0x10a   :  { %1099 = vmatpush.msrb.mxu0 %v827_v23  ;;  %1119 = vmatpush.msrb.mxu1 %v891_v24  ;;  %v824_v20 = vld [vmem:[#allocation7 + $0x828] sm:$0xff] }
 0x10b   :  { %1137 = vmatpush.msrb.mxu2 %v963_v41  ;;  %v888_v21 = vld [vmem:[#allocation7 + $0xa28] sm:$0xff]  ;;  %1151 = vmatpush.msrb.mxu3 %v1051_v18  ;;  %v487_v41 = vperm.slane %v3056_v8, 1  ;;  %v853_v18 = vld [vmem:[#allocation7 + $0x910] sm:$0xff] }
 0x10c   :  { %1100 = vmatpush.msrb.mxu0 %v823_v27  ;;  %1120 = vmatpush.msrb.mxu1 %v887_v28  ;;  %v820_v23 = vld [vmem:[#allocation7 + $0x808] sm:$0xff]  ;;  %v1043_v28 = vld [vmem:[#allocation7 + $0xf00] sm:$0xff] }
 0x10d   :  { %1138 = vmatpush.msrb.mxu2 %v959_v48  ;;  %v884_v25 = vld [vmem:[#allocation7 + $0xa08] sm:$0xff]  ;;  %1152 = vmatpush.msrb.mxu3 %v1047_v26  ;;  %v925_v26 = vld [vmem:[#allocation7 + $0xb50] sm:$0xff] }
 0x10e   :  { %1101 = vmatpush.msrb.mxu0 %v819_v30  ;;  %1121 = vmatpush.msrb.mxu1 %v883_v31  ;;  %v984_v27 = vld [vmem:[#allocation7 + $0xd28] sm:$0xff]  ;;  %v1039_v31 = vld [vmem:[#allocation7 + $0xee0] sm:$0xff] }
 0x10f   :  { %1139 = vmatpush.msrb.mxu2 %v955_v49  ;;  %v980_v29 = vld [vmem:[#allocation7 + $0xd08] sm:$0xff]  ;;  %1153 = vmatpush.msrb.mxu3 %v1043_v28 }
 0x110   :  { %1166 = vmatpush.msra.mxu0 %v880_v32  ;;  %1186 = vmatpush.msra.mxu1 %v944_v33  ;;  %v976_v32 = vld [vmem:[#allocation7 + $0xce8] sm:$0xff] }
 0x111   :  { %1140 = vmatpush.msrb.mxu2 %v951_v54  ;;  %1154 = vmatpush.msrb.mxu3 %v1039_v31  ;;  %v960_v54 = vld [vmem:[#allocation7 + $0xc68] sm:$0xff]  ;;  %v837_v31 = vld [vmem:[#allocation7 + $0x890] sm:$0xff] }
 0x112   :  { %1167 = vmatpush.msra.mxu0 %v876_v34  ;;  %1187 = vmatpush.msra.mxu1 %v940_v35  ;;  %v1035_v34 = vld [vmem:[#allocation7 + $0xec0] sm:$0xff]  ;;  %v972_v35 = vld [vmem:[#allocation7 + $0xcc8] sm:$0xff] }
 0x113   :  { %1141 = vmatpush.msrb.mxu2 %v947_v58  ;;  %1155 = vmatpush.msrb.mxu3 %v1035_v34  ;;  %v956_v58 = vld [vmem:[#allocation7 + $0xc48] sm:$0xff]  ;;  %v917_v34 = vld [vmem:[#allocation7 + $0xb10] sm:$0xff] }
 0x114   :  { %1168 = vmatpush.msra.mxu0 %v872_v37  ;;  %1188 = vmatpush.msra.mxu1 %v936_v40  ;;  %v1031_v37 = vld [vmem:[#allocation7 + $0xea0] sm:$0xff]  ;;  %v968_v40 = vld [vmem:[#allocation7 + $0xca8] sm:$0xff] }
 0x115   :  { %1206 = vmatpush.msra.mxu2 %v1008_v61  ;;  %1156 = vmatpush.msrb.mxu3 %v1031_v37  ;;  %v1015_v61 = vld [vmem:[#allocation7 + $0xe20] sm:$0xff]  ;;  %v1068_v9 = vld [vmem:[#allocation7 + $0xfc8] sm:$0xff] }
 0x116   :  { %1169 = vmatpush.msra.mxu0 %v868_v42  ;;  %1189 = vmatpush.msra.mxu1 %v932_v43  ;;  %v1064_v13 = vld [vmem:[#allocation7 + $0xfa8] sm:$0xff] }
 0x117   :  { %1207 = vmatpush.msra.mxu2 %v1004_v3  ;;  %v948_v3 = vld [vmem:[#allocation7 + $0xc08] sm:$0xff] }
 0x118   :  { %1170 = vmatpush.msra.mxu0 %v864_v44  ;;  %1190 = vmatpush.msra.mxu1 %v928_v45  ;;  %v1027_v45 = vld [vmem:[#allocation7 + $0xe80] sm:$0xff]  ;;  %v1044_v28 = vld [vmem:[#allocation7 + $0xf08] sm:$0xff] }
 0x119   :  { %1208 = vmatpush.msra.mxu2 %v1000_v5  ;;  %1157 = vmatpush.msrb.mxu3 %v1027_v45  ;;  %v1072_v5 = vld [vmem:[#allocation7 + $0xfe8] sm:$0xff] }
 0x11a   :  { %1171 = vmatpush.msra.mxu0 %v860_v46  ;;  %1191 = vmatpush.msra.mxu1 %v924_v47  ;;  %v964_v46 = vld [vmem:[#allocation7 + $0xc88] sm:$0xff] }
 0x11b   :  { %1209 = vmatpush.msra.mxu2 %v996_v10 }
 0x11c   :  { %1172 = vmatpush.msra.mxu0 %v856_v52  ;;  %1192 = vmatpush.msra.mxu1 %v920_v53  ;;  %v881_v52 = vld [vmem:[#allocation7 + $0x9f0] sm:$0xff]  ;;  %v1023_v53 = vld [vmem:[#allocation7 + $0xe60] sm:$0xff] }
 0x11d   :  { %1210 = vmatpush.msra.mxu2 %v992_v14  ;;  %1158 = vmatpush.msrb.mxu3 %v1023_v53  ;;  %v941_v14 = vld [vmem:[#allocation7 + $0xbd0] sm:$0xff] }
 0x11e   :  { %1173 = vmatpush.msra.mxu0 %v852_v55  ;;  %1193 = vmatpush.msra.mxu1 %v916_v56  ;;  %v877_v56 = vld [vmem:[#allocation7 + $0x9d0] sm:$0xff] }
 0x11f   :  { %1211 = vmatpush.msra.mxu2 %v988_v19  ;;  %1159 = vmatpush.msrb.mxu3 %v1019_v57  ;;  %v1056_v19 = vld [vmem:[#allocation7 + $0xf68] sm:$0xff]  ;;  %v882_v57 = vld [vmem:[#allocation7 + $0x9f8] sm:$0xff] }
 0x120   :  { %1174 = vmatpush.msra.mxu0 %v848_v59  ;;  %1194 = vmatpush.msra.mxu1 %v912_v60  ;;  %v873_v60 = vld [vmem:[#allocation7 + $0x9b0] sm:$0xff] }
 0x121   :  { %1212 = vmatpush.msra.mxu2 %v984_v27  ;;  %1160 = vmatpush.msrb.mxu3 %v1015_v61  ;;  %v841_v27 = vld [vmem:[#allocation7 + $0x8b0] sm:$0xff] }
 0x122   :  { %1175 = vmatpush.msra.mxu0 %v844_v62  ;;  %1195 = vmatpush.msra.mxu1 %v908_v63  ;;  %v952_v62 = vld [vmem:[#allocation7 + $0xc28] sm:$0xff]  ;;  %v897_v61 = vld [vmem:[#allocation7 + $0xa70] sm:$0xff] }
 0x123   :  { %1213 = vmatpush.msra.mxu2 %v980_v29  ;;  %v488_v29 = vperm.slane %v3056_v8, 2 }
 0x124   :  { %1176 = vmatpush.msra.mxu0 %v840_v0  ;;  %1196 = vmatpush.msra.mxu1 %v904_v1  ;;  %v511_v22 = vpop.f32.mrf.mxu0  ;;  %v531_v30 = vpop.f32.mrf.mxu1  ;;  %v1011_v0 = vld [vmem:[#allocation7 + $0xe00] sm:$0xff] }
 0x125   :  { %v512_v24 = vadd.f32 %v511_v22, %v486_v15  ;;  %1214 = vmatpush.msra.mxu2 %v976_v32  ;;  %1161 = vmatpush.msrb.mxu3 %v1011_v0  ;;  %v857_v15 = vld [vmem:[#allocation7 + $0x930] sm:$0xff]  ;;  %v1052_v22 = vld [vmem:[#allocation7 + $0xf48] sm:$0xff] }
 0x126   :  { %1177 = vmatpush.msra.mxu0 %v836_v6  ;;  %1197 = vmatpush.msra.mxu1 %v900_v7  ;;  %v865_v7 = vld [vmem:[#allocation7 + $0x970] sm:$0xff] }
 0x127   :  { %v532_v33 = vadd.f32 %v531_v30, %v512_v24  ;;  %1215 = vmatpush.msra.mxu2 %v972_v35  ;;  %1226 = vmatpush.msra.mxu3 %v1072_v5  ;;  %v845_v24 = vld [vmem:[#allocation7 + $0x8d0] sm:$0xff] }
 0x128   :  { %1178 = vmatpush.msra.mxu0 %v832_v11  ;;  %1198 = vmatpush.msra.mxu1 %v896_v12  ;;  %v945_v11 = vld [vmem:[#allocation7 + $0xbf0] sm:$0xff] }
 0x129   :  { %1216 = vmatpush.msra.mxu2 %v968_v40  ;;  %v861_v12 = vld [vmem:[#allocation7 + $0x950] sm:$0xff]  ;;  %1227 = vmatpush.msra.mxu3 %v1068_v9 }
 0x12a   :  { %1179 = vmatpush.msra.mxu0 %v828_v16  ;;  %1199 = vmatpush.msra.mxu1 %v892_v17  ;;  %v1060_v16 = vld [vmem:[#allocation7 + $0xf88] sm:$0xff]  ;;  %v937_v17 = vld [vmem:[#allocation7 + $0xbb0] sm:$0xff] }
 0x12b   :  { %1217 = vmatpush.msra.mxu2 %v964_v46  ;;  %1228 = vmatpush.msra.mxu3 %v1064_v13  ;;  %v921_v30 = vld [vmem:[#allocation7 + $0xb30] sm:$0xff]  ;;  %v1028_v46 = vld [vmem:[#allocation7 + $0xe88] sm:$0xff] }
 0x12c   :  { %1180 = vmatpush.msra.mxu0 %v824_v20  ;;  %1200 = vmatpush.msra.mxu1 %v888_v21  ;;  %v933_v20 = vld [vmem:[#allocation7 + $0xb90] sm:$0xff] }
 0x12d   :  { %1218 = vmatpush.msra.mxu2 %v960_v54  ;;  %v849_v21 = vld [vmem:[#allocation7 + $0x8f0] sm:$0xff]  ;;  %1229 = vmatpush.msra.mxu3 %v1060_v16  ;;  %v1024_v54 = vld [vmem:[#allocation7 + $0xe68] sm:$0xff] }
 0x12e   :  { %1181 = vmatpush.msra.mxu0 %v820_v23  ;;  %1201 = vmatpush.msra.mxu1 %v884_v25  ;;  %v591_v43 = vpop.f32.mrf.mxu0  ;;  %v929_v23 = vld [vmem:[#allocation7 + $0xb70] sm:$0xff]  ;;  %v1048_v25 = vld [vmem:[#allocation7 + $0xf28] sm:$0xff] }
 0x12f   :  { %v592_v48 = vadd.f32 %v591_v43, %v487_v41  ;;  %1219 = vmatpush.msra.mxu2 %v956_v58  ;;  %1230 = vmatpush.msra.mxu3 %v1056_v19  ;;  %v833_v35 = vld [vmem:[#allocation7 + $0x870] sm:$0xff] }
 0x130   :  { %v611_v55 = vpop.f32.mrf.mxu1  ;;  %v913_v40 = vld [vmem:[#allocation7 + $0xaf0] sm:$0xff] }
 0x131   :  { %v551_v36 = vpop.f32.mrf.mxu2  ;;  %v571_v44 = vpop.f32.mrf.mxu3  ;;  %v612_v59 = vadd.f32 %v611_v55, %v592_v48  ;;  %1220 = vmatpush.msra.mxu2 %v952_v62  ;;  %1231 = vmatpush.msra.mxu3 %v1052_v22  ;;  %v829_v41 = vld [vmem:[#allocation7 + $0x850] sm:$0xff]  ;;  %v878_v62 = vld [vmem:[#allocation7 + $0x9d8] sm:$0xff] }
 0x132   :  { %v552_v42 = vadd.f32 %v551_v36, %v532_v33  ;;  %v1040_v33 = vld [vmem:[#allocation7 + $0xee8] sm:$0xff]  ;;  %v909_v43 = vld [vmem:[#allocation7 + $0xad0] sm:$0xff] }
 0x133   :  { %1221 = vmatpush.msra.mxu2 %v948_v3  ;;  %1232 = vmatpush.msra.mxu3 %v1048_v25  ;;  %v1036_v36 = vld [vmem:[#allocation7 + $0xec8] sm:$0xff]  ;;  %v905_v48 = vld [vmem:[#allocation7 + $0xab0] sm:$0xff]  ;;  %v874_v3 = vld [vmem:[#allocation7 + $0x9b8] sm:$0xff] }
 0x134   :  { %v572_v47 = vadd.f32 %v571_v44, %v552_v42  ;;  %v1032_v42 = vld [vmem:[#allocation7 + $0xea8] sm:$0xff]  ;;  %v825_v44 = vld [vmem:[#allocation7 + $0x830] sm:$0xff] }
 0x135   :  { %1233 = vmatpush.msra.mxu3 %v1044_v28  ;;  %v1005_v5 = vld [vmem:[#allocation7 + $0xdd0] sm:$0xff] }
 0x136   :  { %v3060_v49 = vmax.f32 %v572_v47, 0.0  ;;  %v1001_v9 = vld [vmem:[#allocation7 + $0xdb0] sm:$0xff] }
 0x137   :  { %1234 = vmatpush.msra.mxu3 %v1040_v33  ;;  %v997_v13 = vld [vmem:[#allocation7 + $0xd90] sm:$0xff]  ;;  %v489_v33 = vperm.slane %v3056_v8, 3  ;;  %v910_v8 = vld [vmem:[#allocation7 + $0xad8] sm:$0xff] }
 0x138   :  { %1102 = vmatmul.f32.vlgmr.msrb.gmra.mxu0 %v3060_v49  ;;  %v993_v16 = vld [vmem:[#allocation7 + $0xd70] sm:$0xff] }
 0x139   :  { %1246 = vmatpush.msrb.mxu0 %v881_v52  ;;  %1235 = vmatpush.msra.mxu3 %v1036_v36  ;;  %v821_v52 = vld [vmem:[#allocation7 + $0x810] sm:$0xff] }
 0x13a   :  { %v989_v19 = vld [vmem:[#allocation7 + $0xd50] sm:$0xff] }
 0x13b   :  { %v631_v63 = vpop.f32.mrf.mxu2  ;;  %1247 = vmatpush.msrb.mxu0 %v877_v56  ;;  %v651_v4 = vpop.f32.mrf.mxu3  ;;  %1236 = vmatpush.msra.mxu3 %v1032_v42  ;;  %v901_v56 = vld [vmem:[#allocation7 + $0xa90] sm:$0xff]  ;;  %v914_v42 = vld [vmem:[#allocation7 + $0xaf8] sm:$0xff] }
 0x13c   :  { %v632_v1 = vadd.f32 %v631_v63, %v612_v59  ;;  %v1020_v59 = vld [vmem:[#allocation7 + $0xe48] sm:$0xff]  ;;  %v985_v22 = vld [vmem:[#allocation7 + $0xd30] sm:$0xff] }
 0x13d   :  { %1248 = vmatpush.msrb.mxu0 %v873_v60  ;;  %1237 = vmatpush.msra.mxu3 %v1028_v46  ;;  %v1016_v63 = vld [vmem:[#allocation7 + $0xe28] sm:$0xff]  ;;  %v981_v25 = vld [vmem:[#allocation7 + $0xd10] sm:$0xff]  ;;  %v826_v46 = vld [vmem:[#allocation7 + $0x838] sm:$0xff] }
 0x13e   :  { %v652_v6 = vadd.f32 %v651_v4, %v632_v1  ;;  %v1009_v1 = vld [vmem:[#allocation7 + $0xdf0] sm:$0xff]  ;;  %v1012_v4 = vld [vmem:[#allocation7 + $0xe08] sm:$0xff] }
 0x13f   :  { %1249 = vmatpush.msrb.mxu0 %v869_v2  ;;  %1238 = vmatpush.msra.mxu3 %v1024_v54  ;;  %v893_v2 = vld [vmem:[#allocation7 + $0xa50] sm:$0xff]  ;;  %v822_v54 = vld [vmem:[#allocation7 + $0x818] sm:$0xff] }
 0x140   :  { %v3063_v10 = vmax.f32 %v652_v6, 0.0  ;;  %1182 = vmatmul.f32.vlgmr.msra.gmra.mxu0 %v3060_v49  ;;  %v889_v6 = vld [vmem:[#allocation7 + $0xa30] sm:$0xff] }
 0x141   :  { %1250 = vmatpush.msrb.mxu0 %v865_v7  ;;  %1239 = vmatpush.msra.mxu3 %v1020_v59  ;;  %v870_v7 = vld [vmem:[#allocation7 + $0x998] sm:$0xff]  ;;  %v977_v28 = vld [vmem:[#allocation7 + $0xcf0] sm:$0xff] }
 0x142   :  { %1122 = vmatmul.f32.vlgmr.msrb.gmra.mxu1 %v3063_v10  ;;  %v969_v36 = vld [vmem:[#allocation7 + $0xcb0] sm:$0xff] }
 0x143   :  { %1266 = vmatpush.msrb.mxu1 %v945_v11  ;;  %1251 = vmatpush.msrb.mxu0 %v861_v12  ;;  %v885_v11 = vld [vmem:[#allocation7 + $0xa10] sm:$0xff]  ;;  %v866_v12 = vld [vmem:[#allocation7 + $0x978] sm:$0xff] }
 0x144   :  { %1240 = vmatpush.msra.mxu3 %v1016_v63  ;;  %v898_v63 = vld [vmem:[#allocation7 + $0xa78] sm:$0xff] }
 0x145   :  { %1267 = vmatpush.msrb.mxu1 %v941_v14  ;;  %1252 = vmatpush.msrb.mxu0 %v857_v15  ;;  %v946_v14 = vld [vmem:[#allocation7 + $0xbf8] sm:$0xff] }
 0x146   :  { %1241 = vmatpush.msra.mxu3 %v1012_v4  ;;  %v862_v15 = vld [vmem:[#allocation7 + $0x958] sm:$0xff]  ;;  %v1463_v4 = vld [vmem:[#allocation7 + $0x11c0] sm:$0xff] }
 0x147   :  { %1268 = vmatpush.msrb.mxu1 %v937_v17  ;;  %1253 = vmatpush.msrb.mxu0 %v853_v18  ;;  %v942_v17 = vld [vmem:[#allocation7 + $0xbd8] sm:$0xff] }
 0x148   :  { %v671_v32 = vpop.f32.mrf.mxu0  ;;  %v691_v45 = vpop.f32.mrf.mxu1  ;;  %v858_v18 = vld [vmem:[#allocation7 + $0x938] sm:$0xff] }
 0x149   :  { %1269 = vmatpush.msrb.mxu1 %v933_v20  ;;  %1254 = vmatpush.msrb.mxu0 %v849_v21  ;;  %v672_v37 = vadd.f32 %v671_v32, %v488_v29  ;;  %v938_v20 = vld [vmem:[#allocation7 + $0xbb8] sm:$0xff] }
 0x14a   :  { %1202 = vmatmul.f32.vlgmr.msra.gmra.mxu1 %v3063_v10  ;;  %v854_v21 = vld [vmem:[#allocation7 + $0x918] sm:$0xff] }
 0x14b   :  { %1270 = vmatpush.msrb.mxu1 %v929_v23  ;;  %1255 = vmatpush.msrb.mxu0 %v845_v24  ;;  %v692_v47 = vadd.f32 %v691_v45, %v672_v37  ;;  %v934_v23 = vld [vmem:[#allocation7 + $0xb98] sm:$0xff]  ;;  %v961_v45 = vld [vmem:[#allocation7 + $0xc70] sm:$0xff] }
 0x14c   :  { %v850_v24 = vld [vmem:[#allocation7 + $0x8f8] sm:$0xff] }
 0x14d   :  { %1271 = vmatpush.msrb.mxu1 %v925_v26  ;;  %1256 = vmatpush.msrb.mxu0 %v841_v27  ;;  %v930_v26 = vld [vmem:[#allocation7 + $0xb78] sm:$0xff] }
 0x14e   :  { %v846_v27 = vld [vmem:[#allocation7 + $0x8d8] sm:$0xff] }
 0x14f   :  { %1272 = vmatpush.msrb.mxu1 %v921_v30  ;;  %1257 = vmatpush.msrb.mxu0 %v837_v31  ;;  %v926_v29 = vld [vmem:[#allocation7 + $0xb58] sm:$0xff]  ;;  %v973_v31 = vld [vmem:[#allocation7 + $0xcd0] sm:$0xff] }
 0x150   :  { %v842_v30 = vld [vmem:[#allocation7 + $0x8b8] sm:$0xff] }
 0x151   :  { %1273 = vmatpush.msrb.mxu1 %v917_v34  ;;  %1258 = vmatpush.msrb.mxu0 %v833_v35  ;;  %v922_v32 = vld [vmem:[#allocation7 + $0xb38] sm:$0xff] }
 0x152   :  { %v838_v34 = vld [vmem:[#allocation7 + $0x898] sm:$0xff] }
 0x153   :  { %1274 = vmatpush.msrb.mxu1 %v913_v40  ;;  %1259 = vmatpush.msrb.mxu0 %v829_v41  ;;  %v918_v37 = vld [vmem:[#allocation7 + $0xb18] sm:$0xff]  ;;  %v965_v41 = vld [vmem:[#allocation7 + $0xc90] sm:$0xff] }
 0x154   :  { %v834_v40 = vld [vmem:[#allocation7 + $0x878] sm:$0xff] }
 0x155   :  { %v711_v53 = vpop.f32.mrf.mxu2  ;;  %1275 = vmatpush.msrb.mxu1 %v909_v43  ;;  %1260 = vmatpush.msrb.mxu0 %v825_v44  ;;  %v731_v58 = vpop.f32.mrf.mxu3  ;;  %v830_v44 = vld [vmem:[#allocation7 + $0x858] sm:$0xff] }
 0x156   :  { %v712_v55 = vadd.f32 %v711_v53, %v692_v47 }
 0x157   :  { %1276 = vmatpush.msrb.mxu1 %v905_v48  ;;  %1261 = vmatpush.msrb.mxu0 %v821_v52  ;;  %v957_v48 = vld [vmem:[#allocation7 + $0xc50] sm:$0xff]  ;;  %v906_v52 = vld [vmem:[#allocation7 + $0xab8] sm:$0xff] }
 0x158   :  { %v732_v60 = vadd.f32 %v731_v58, %v712_v55  ;;  %1262 = vmatmul.f32.vlgmr.msrb.gmra.mxu0 %v3060_v49 }
 0x159   :  { %1277 = vmatpush.msrb.mxu1 %v901_v56  ;;  %1326 = vmatpush.msra.mxu0 %v882_v57  ;;  %v953_v56 = vld [vmem:[#allocation7 + $0xc30] sm:$0xff]  ;;  %v902_v57 = vld [vmem:[#allocation7 + $0xa98] sm:$0xff] }
 0x15a   :  { %v3070_v0 = vmax.f32 %v732_v60, 0.0  ;;  %v949_v60 = vld [vmem:[#allocation7 + $0xc10] sm:$0xff] }
 0x15b   :  { %1278 = vmatpush.msrb.mxu1 %v897_v61  ;;  %1327 = vmatpush.msra.mxu0 %v878_v62  ;;  %v1467_v61 = vld [vmem:[#allocation7 + $0x11e0] sm:$0xff] }
 0x15c   :  { %1142 = vmatmul.f32.vlgmr.msrb.gmra.mxu2 %v3070_v0 }
 0x15d   :  { %1286 = vmatpush.msrb.mxu2 %v1009_v1  ;;  %1279 = vmatpush.msrb.mxu1 %v893_v2  ;;  %v1010_v1 = vld [vmem:[#allocation7 + $0xdf8] sm:$0xff] }
 0x15e   :  { %1328 = vmatpush.msra.mxu0 %v874_v3  ;;  %v1073_v3 = vld [vmem:[#allocation7 + $0xff0] sm:$0xff] }
 0x15f   :  { %1287 = vmatpush.msrb.mxu2 %v1005_v5  ;;  %1280 = vmatpush.msrb.mxu1 %v889_v6  ;;  %v1006_v5 = vld [vmem:[#allocation7 + $0xdd8] sm:$0xff] }
 0x160   :  { %1329 = vmatpush.msra.mxu0 %v870_v7  ;;  %v894_v6 = vld [vmem:[#allocation7 + $0xa58] sm:$0xff]  ;;  %v1069_v7 = vld [vmem:[#allocation7 + $0xfd0] sm:$0xff] }
 0x161   :  { %1288 = vmatpush.msrb.mxu2 %v1001_v9  ;;  %1281 = vmatpush.msrb.mxu1 %v885_v11  ;;  %v1459_v9 = vld [vmem:[#allocation7 + $0x11a0] sm:$0xff]  ;;  %v890_v11 = vld [vmem:[#allocation7 + $0xa38] sm:$0xff] }
 0x162   :  { %1282 = vmatmul.f32.vlgmr.msrb.gmra.mxu1 %v3063_v10  ;;  %1330 = vmatpush.msra.mxu0 %v866_v12  ;;  %v1065_v12 = vld [vmem:[#allocation7 + $0xfb0] sm:$0xff] }
 0x163   :  { %1289 = vmatpush.msrb.mxu2 %v997_v13  ;;  %1346 = vmatpush.msra.mxu1 %v946_v14  ;;  %v1455_v13 = vld [vmem:[#allocation7 + $0x1180] sm:$0xff]  ;;  %v998_v14 = vld [vmem:[#allocation7 + $0xd98] sm:$0xff] }
 0x164   :  { %1222 = vmatmul.f32.vlgmr.msra.gmra.mxu2 %v3070_v0  ;;  %1331 = vmatpush.msra.mxu0 %v862_v15  ;;  %v886_v15 = vld [vmem:[#allocation7 + $0xa18] sm:$0xff] }
 0x165   :  { %1290 = vmatpush.msrb.mxu2 %v993_v16  ;;  %1347 = vmatpush.msra.mxu1 %v942_v17  ;;  %v1061_v16 = vld [vmem:[#allocation7 + $0xf90] sm:$0xff]  ;;  %v994_v17 = vld [vmem:[#allocation7 + $0xd78] sm:$0xff] }
 0x166   :  { %1332 = vmatpush.msra.mxu0 %v858_v18  ;;  %v1057_v18 = vld [vmem:[#allocation7 + $0xf70] sm:$0xff] }
 0x167   :  { %1291 = vmatpush.msrb.mxu2 %v989_v19  ;;  %1348 = vmatpush.msra.mxu1 %v938_v20  ;;  %v1451_v19 = vld [vmem:[#allocation7 + $0x1160] sm:$0xff] }
 0x168   :  { %1333 = vmatpush.msra.mxu0 %v854_v21  ;;  %v1531_v20 = vld [vmem:[#allocation7 + $0x13e0] sm:$0xff]  ;;  %v990_v21 = vld [vmem:[#allocation7 + $0xd58] sm:$0xff] }
 0x169   :  { %1292 = vmatpush.msrb.mxu2 %v985_v22  ;;  %1349 = vmatpush.msra.mxu1 %v934_v23  ;;  %v1053_v22 = vld [vmem:[#allocation7 + $0xf50] sm:$0xff]  ;;  %v1447_v23 = vld [vmem:[#allocation7 + $0x1140] sm:$0xff] }
 0x16a   :  { %1334 = vmatpush.msra.mxu0 %v850_v24  ;;  %v751_v35 = vpop.f32.mrf.mxu0  ;;  %v771_v47 = vpop.f32.mrf.mxu1  ;;  %v1527_v24 = vld [vmem:[#allocation7 + $0x13c0] sm:$0xff] }
 0x16b   :  { %1293 = vmatpush.msrb.mxu2 %v981_v25  ;;  %1350 = vmatpush.msra.mxu1 %v930_v26  ;;  %v752_v43 = vadd.f32 %v751_v35, %v489_v33  ;;  %v986_v25 = vld [vmem:[#allocation7 + $0xd38] sm:$0xff]  ;;  %v1049_v26 = vld [vmem:[#allocation7 + $0xf30] sm:$0xff]  ;;  %v1515_v35 = vld [vmem:[#allocation7 + $0x1360] sm:$0xff] }
 0x16c   :  { %1335 = vmatpush.msra.mxu0 %v846_v27  ;;  %v1443_v27 = vld [vmem:[#allocation7 + $0x1120] sm:$0xff]  ;;  %v1041_v33 = vld [vmem:[#allocation7 + $0xef0] sm:$0xff] }
 0x16d   :  { %1294 = vmatpush.msrb.mxu2 %v977_v28  ;;  %1351 = vmatpush.msra.mxu1 %v926_v29  ;;  %v772_v53 = vadd.f32 %v771_v47, %v752_v43  ;;  %v1523_v28 = vld [vmem:[#allocation7 + $0x13a0] sm:$0xff]  ;;  %v982_v29 = vld [vmem:[#allocation7 + $0xd18] sm:$0xff]  ;;  %v1033_v43 = vld [vmem:[#allocation7 + $0xeb0] sm:$0xff] }
 0x16e   :  { %1336 = vmatpush.msra.mxu0 %v842_v30  ;;  %v1439_v30 = vld [vmem:[#allocation7 + $0x1100] sm:$0xff] }
 0x16f   :  { %1295 = vmatpush.msrb.mxu2 %v973_v31  ;;  %1352 = vmatpush.msra.mxu1 %v922_v32  ;;  %v1519_v31 = vld [vmem:[#allocation7 + $0x1380] sm:$0xff]  ;;  %v978_v32 = vld [vmem:[#allocation7 + $0xcf8] sm:$0xff] }
 0x170   :  { %1337 = vmatpush.msra.mxu0 %v838_v34  ;;  %v1435_v34 = vld [vmem:[#allocation7 + $0x10e0] sm:$0xff] }
 0x171   :  { %1296 = vmatpush.msrb.mxu2 %v969_v36  ;;  %1353 = vmatpush.msra.mxu1 %v918_v37  ;;  %v974_v36 = vld [vmem:[#allocation7 + $0xcd8] sm:$0xff]  ;;  %v1037_v37 = vld [vmem:[#allocation7 + $0xed0] sm:$0xff]  ;;  %v1423_v47 = vld [vmem:[#allocation7 + $0x1080] sm:$0xff] }
 0x172   :  { %1338 = vmatpush.msra.mxu0 %v834_v40  ;;  %v1431_v40 = vld [vmem:[#allocation7 + $0x10c0] sm:$0xff] }
 0x173   :  { %1297 = vmatpush.msrb.mxu2 %v965_v41  ;;  %1354 = vmatpush.msra.mxu1 %v914_v42  ;;  %v1511_v41 = vld [vmem:[#allocation7 + $0x1340] sm:$0xff]  ;;  %v970_v42 = vld [vmem:[#allocation7 + $0xcb8] sm:$0xff] }
 0x174   :  { %1339 = vmatpush.msra.mxu0 %v830_v44  ;;  %v1427_v44 = vld [vmem:[#allocation7 + $0x10a0] sm:$0xff] }
 0x175   :  { %1298 = vmatpush.msrb.mxu2 %v961_v45  ;;  %1355 = vmatpush.msra.mxu1 %v910_v8  ;;  %v1507_v45 = vld [vmem:[#allocation7 + $0x1320] sm:$0xff]  ;;  %v966_v8 = vld [vmem:[#allocation7 + $0xc98] sm:$0xff] }
 0x176   :  { %v791_v55 = vpop.f32.mrf.mxu2  ;;  %1340 = vmatpush.msra.mxu0 %v826_v46  ;;  %v811_v59 = vpop.f32.mrf.mxu3  ;;  %v1029_v46 = vld [vmem:[#allocation7 + $0xe90] sm:$0xff] }
 0x177   :  { %v792_v58 = vadd.f32 %v791_v55, %v772_v53  ;;  %1299 = vmatpush.msrb.mxu2 %v957_v48  ;;  %1356 = vmatpush.msra.mxu1 %v906_v52  ;;  %v1503_v48 = vld [vmem:[#allocation7 + $0x1300] sm:$0xff]  ;;  %v962_v52 = vld [vmem:[#allocation7 + $0xc78] sm:$0xff]  ;;  %v1025_v53 = vld [vmem:[#allocation7 + $0xe70] sm:$0xff] }
 0x178   :  { %1341 = vmatpush.msra.mxu0 %v822_v54  ;;  %v1419_v54 = vld [vmem:[#allocation7 + $0x1060] sm:$0xff] }
 0x179   :  { %v812_v62 = vadd.f32 %v811_v59, %v792_v58  ;;  %1300 = vmatpush.msrb.mxu2 %v953_v56  ;;  %1357 = vmatpush.msra.mxu1 %v902_v57  ;;  %v1499_v55 = vld [vmem:[#allocation7 + $0x12e0] sm:$0xff]  ;;  %v958_v56 = vld [vmem:[#allocation7 + $0xc58] sm:$0xff]  ;;  %v1021_v57 = vld [vmem:[#allocation7 + $0xe50] sm:$0xff] }
 0x17a   :  { %1342 = vmatmul.f32.vlgmr.msra.gmra.mxu0 %v3060_v49  ;;  %v1002_v49 = vld [vmem:[#allocation7 + $0xdb8] sm:$0xff]  ;;  %v1415_v58 = vld [vmem:[#allocation7 + $0x1040] sm:$0xff] }
 0x17b   :  { %v3077_v2 = vmax.f32 %v812_v62, 0.0  ;;  %1301 = vmatpush.msrb.mxu2 %v949_v60  ;;  %1674 = vmatpush.msrb.mxu0 %v1467_v61  ;;  %v1495_v59 = vld [vmem:[#allocation7 + $0x12c0] sm:$0xff]  ;;  %v954_v60 = vld [vmem:[#allocation7 + $0xc38] sm:$0xff]  ;;  %v1017_v61 = vld [vmem:[#allocation7 + $0xe30] sm:$0xff] }
 0x17c   :  { %1302 = vmatmul.f32.vlgmr.msrb.gmra.mxu2 %v3070_v0  ;;  %1358 = vmatpush.msra.mxu1 %v898_v63  ;;  %v1411_v62 = vld [vmem:[#allocation7 + $0x1020] sm:$0xff] }
 0x17d   :  { %1162 = vmatmul.f32.vlgmr.msrb.gmra.mxu3 %v3077_v2  ;;  %1366 = vmatpush.msra.mxu2 %v1010_v1  ;;  %v1491_v63 = vld [vmem:[#allocation7 + $0x12a0] sm:$0xff]  ;;  %v950_v1 = vld [vmem:[#allocation7 + $0xc18] sm:$0xff] }
 0x17e   :  { %1306 = vmatpush.msrb.mxu3 %v1073_v3  ;;  %1675 = vmatpush.msrb.mxu0 %v1463_v4  ;;  %v1013_v3 = vld [vmem:[#allocation7 + $0xe10] sm:$0xff]  ;;  %v1407_v4 = vld [vmem:[#allocation7 + $0x1000] sm:$0xff] }
 0x17f   :  { %1367 = vmatpush.msra.mxu2 %v1006_v5  ;;  %1359 = vmatpush.msra.mxu1 %v894_v6  ;;  %v1487_v5 = vld [vmem:[#allocation7 + $0x1280] sm:$0xff]  ;;  %v1074_v6 = vld [vmem:[#allocation7 + $0xff8] sm:$0xff] }
 0x180   :  { %1307 = vmatpush.msrb.mxu3 %v1069_v7  ;;  %1676 = vmatpush.msrb.mxu0 %v1459_v9  ;;  %v1595_v7 = vld [vmem:[#allocation7 + $0x15e0] sm:$0xff]  ;;  %v1468_v9 = vld [vmem:[#allocation7 + $0x11e8] sm:$0xff] }
 0x181   :  { %1368 = vmatpush.msra.mxu2 %v1002_v49  ;;  %1360 = vmatpush.msra.mxu1 %v890_v11  ;;  %v1483_v49 = vld [vmem:[#allocation7 + $0x1260] sm:$0xff]  ;;  %v1070_v11 = vld [vmem:[#allocation7 + $0xfd8] sm:$0xff] }
 0x182   :  { %1308 = vmatpush.msrb.mxu3 %v1065_v12  ;;  %1677 = vmatpush.msrb.mxu0 %v1455_v13  ;;  %v1591_v12 = vld [vmem:[#allocation7 + $0x15c0] sm:$0xff]  ;;  %v1464_v13 = vld [vmem:[#allocation7 + $0x11c8] sm:$0xff] }
 0x183   :  { %1369 = vmatpush.msra.mxu2 %v998_v14  ;;  %1361 = vmatpush.msra.mxu1 %v886_v15  ;;  %v1479_v14 = vld [vmem:[#allocation7 + $0x1240] sm:$0xff]  ;;  %v1066_v15 = vld [vmem:[#allocation7 + $0xfb8] sm:$0xff] }
 0x184   :  { %1309 = vmatpush.msrb.mxu3 %v1061_v16  ;;  %1362 = vmatmul.f32.vlgmr.msra.gmra.mxu1 %v3063_v10  ;;  %v1045_v10 = vld [vmem:[#allocation7 + $0xf10] sm:$0xff]  ;;  %v1587_v16 = vld [vmem:[#allocation7 + $0x15a0] sm:$0xff] }
 0x185   :  { %1242 = vmatmul.f32.vlgmr.msra.gmra.mxu3 %v3077_v2  ;;  %1370 = vmatpush.msra.mxu2 %v994_v17  ;;  %v1460_v17 = vld [vmem:[#allocation7 + $0x11a8] sm:$0xff] }
 0x186   :  { %1310 = vmatpush.msrb.mxu3 %v1057_v18  ;;  %1678 = vmatpush.msrb.mxu0 %v1451_v19  ;;  %v1475_v18 = vld [vmem:[#allocation7 + $0x1220] sm:$0xff]  ;;  %v1062_v19 = vld [vmem:[#allocation7 + $0xf98] sm:$0xff] }
 0x187   :  { %1694 = vmatpush.msrb.mxu1 %v1531_v20  ;;  %1371 = vmatpush.msra.mxu2 %v990_v21  ;;  %v1456_v20 = vld [vmem:[#allocation7 + $0x1188] sm:$0xff]  ;;  %v1471_v21 = vld [vmem:[#allocation7 + $0x1200] sm:$0xff] }
 0x188   :  { %1311 = vmatpush.msrb.mxu3 %v1053_v22  ;;  %1679 = vmatpush.msrb.mxu0 %v1447_v23  ;;  %v1058_v22 = vld [vmem:[#allocation7 + $0xf78] sm:$0xff]  ;;  %v1579_v23 = vld [vmem:[#allocation7 + $0x1560] sm:$0xff] }
 0x189   :  { %1695 = vmatpush.msrb.mxu1 %v1527_v24  ;;  %1372 = vmatpush.msra.mxu2 %v986_v25  ;;  %v1452_v24 = vld [vmem:[#allocation7 + $0x1168] sm:$0xff] }
 0x18a   :  { %1312 = vmatpush.msrb.mxu3 %v1049_v26  ;;  %1680 = vmatpush.msrb.mxu0 %v1443_v27  ;;  %v1532_v25 = vld [vmem:[#allocation7 + $0x13e8] sm:$0xff]  ;;  %v1054_v26 = vld [vmem:[#allocation7 + $0xf58] sm:$0xff]  ;;  %v1575_v27 = vld [vmem:[#allocation7 + $0x1540] sm:$0xff] }
 0x18b   :  { %1696 = vmatpush.msrb.mxu1 %v1523_v28  ;;  %1373 = vmatpush.msra.mxu2 %v982_v29  ;;  %v1448_v28 = vld [vmem:[#allocation7 + $0x1148] sm:$0xff] }
 0x18c   :  { %1313 = vmatpush.msrb.mxu3 %v1045_v10  ;;  %1681 = vmatpush.msrb.mxu0 %v1439_v30  ;;  %v1528_v29 = vld [vmem:[#allocation7 + $0x13c8] sm:$0xff]  ;;  %v1050_v10 = vld [vmem:[#allocation7 + $0xf38] sm:$0xff]  ;;  %v1571_v30 = vld [vmem:[#allocation7 + $0x1520] sm:$0xff] }
 0x18d   :  { %1697 = vmatpush.msrb.mxu1 %v1519_v31  ;;  %1374 = vmatpush.msra.mxu2 %v978_v32  ;;  %v1444_v31 = vld [vmem:[#allocation7 + $0x1128] sm:$0xff] }
 0x18e   :  { %1314 = vmatpush.msrb.mxu3 %v1041_v33  ;;  %1682 = vmatpush.msrb.mxu0 %v1435_v34  ;;  %v1524_v32 = vld [vmem:[#allocation7 + $0x13a8] sm:$0xff]  ;;  %v1046_v33 = vld [vmem:[#allocation7 + $0xf18] sm:$0xff]  ;;  %v1567_v34 = vld [vmem:[#allocation7 + $0x1500] sm:$0xff] }
 0x18f   :  { %1698 = vmatpush.msrb.mxu1 %v1515_v35  ;;  %1375 = vmatpush.msra.mxu2 %v974_v36  ;;  %v1440_v35 = vld [vmem:[#allocation7 + $0x1108] sm:$0xff] }
 0x190   :  { %1315 = vmatpush.msrb.mxu3 %v1037_v37  ;;  %1683 = vmatpush.msrb.mxu0 %v1431_v40  ;;  %v1520_v36 = vld [vmem:[#allocation7 + $0x1388] sm:$0xff]  ;;  %v1042_v37 = vld [vmem:[#allocation7 + $0xef8] sm:$0xff]  ;;  %v1563_v40 = vld [vmem:[#allocation7 + $0x14e0] sm:$0xff] }
 0x191   :  { %1699 = vmatpush.msrb.mxu1 %v1511_v41  ;;  %1376 = vmatpush.msra.mxu2 %v970_v42  ;;  %v1436_v41 = vld [vmem:[#allocation7 + $0x10e8] sm:$0xff] }
 0x192   :  { %1316 = vmatpush.msrb.mxu3 %v1033_v43  ;;  %1684 = vmatpush.msrb.mxu0 %v1427_v44  ;;  %v1516_v42 = vld [vmem:[#allocation7 + $0x1368] sm:$0xff]  ;;  %v1038_v43 = vld [vmem:[#allocation7 + $0xed8] sm:$0xff]  ;;  %v1559_v44 = vld [vmem:[#allocation7 + $0x14c0] sm:$0xff] }
 0x193   :  { %1700 = vmatpush.msrb.mxu1 %v1507_v45  ;;  %1377 = vmatpush.msra.mxu2 %v966_v8  ;;  %v1432_v45 = vld [vmem:[#allocation7 + $0x10c8] sm:$0xff] }
 0x194   :  { %1317 = vmatpush.msrb.mxu3 %v1029_v46  ;;  %1685 = vmatpush.msrb.mxu0 %v1423_v47  ;;  %v1512_v8 = vld [vmem:[#allocation7 + $0x1348] sm:$0xff]  ;;  %v1034_v46 = vld [vmem:[#allocation7 + $0xeb8] sm:$0xff]  ;;  %v1555_v47 = vld [vmem:[#allocation7 + $0x14a0] sm:$0xff] }
 0x195   :  { %1701 = vmatpush.msrb.mxu1 %v1503_v48  ;;  %1378 = vmatpush.msra.mxu2 %v962_v52  ;;  %v1428_v48 = vld [vmem:[#allocation7 + $0x10a8] sm:$0xff] }
 0x196   :  { %1318 = vmatpush.msrb.mxu3 %v1025_v53  ;;  %1686 = vmatpush.msrb.mxu0 %v1419_v54  ;;  %v1508_v52 = vld [vmem:[#allocation7 + $0x1328] sm:$0xff]  ;;  %v1030_v53 = vld [vmem:[#allocation7 + $0xe98] sm:$0xff]  ;;  %v1551_v54 = vld [vmem:[#allocation7 + $0x1480] sm:$0xff] }
 0x197   :  { %1702 = vmatpush.msrb.mxu1 %v1499_v55  ;;  %1379 = vmatpush.msra.mxu2 %v958_v56  ;;  %v1424_v55 = vld [vmem:[#allocation7 + $0x1088] sm:$0xff] }
 0x198   :  { %1319 = vmatpush.msrb.mxu3 %v1021_v57  ;;  %1687 = vmatpush.msrb.mxu0 %v1415_v58  ;;  %v1504_v56 = vld [vmem:[#allocation7 + $0x1308] sm:$0xff]  ;;  %v1026_v57 = vld [vmem:[#allocation7 + $0xe78] sm:$0xff]  ;;  %v1547_v58 = vld [vmem:[#allocation7 + $0x1460] sm:$0xff] }
 0x199   :  { %1703 = vmatpush.msrb.mxu1 %v1495_v59  ;;  %1380 = vmatpush.msra.mxu2 %v954_v60  ;;  %v1420_v59 = vld [vmem:[#allocation7 + $0x1068] sm:$0xff] }
 0x19a   :  { %1320 = vmatpush.msrb.mxu3 %v1017_v61  ;;  %1688 = vmatpush.msrb.mxu0 %v1411_v62  ;;  %v1500_v60 = vld [vmem:[#allocation7 + $0x12e8] sm:$0xff]  ;;  %v1022_v61 = vld [vmem:[#allocation7 + $0xe58] sm:$0xff]  ;;  %v1543_v62 = vld [vmem:[#allocation7 + $0x1440] sm:$0xff] }
 0x19b   :  { %1704 = vmatpush.msrb.mxu1 %v1491_v63  ;;  %1381 = vmatpush.msra.mxu2 %v950_v1  ;;  %v1416_v63 = vld [vmem:[#allocation7 + $0x1048] sm:$0xff] }
 0x19c   :  { %1321 = vmatpush.msrb.mxu3 %v1013_v3  ;;  %1689 = vmatpush.msrb.mxu0 %v1407_v4  ;;  %v1496_v1 = vld [vmem:[#allocation7 + $0x12c8] sm:$0xff]  ;;  %v1018_v3 = vld [vmem:[#allocation7 + $0xe38] sm:$0xff]  ;;  %v1539_v4 = vld [vmem:[#allocation7 + $0x1420] sm:$0xff] }
 0x19d   :  { %1705 = vmatpush.msrb.mxu1 %v1487_v5  ;;  %1322 = vmatmul.f32.vlgmr.msrb.gmra.mxu3 %v3077_v2  ;;  %v1412_v5 = vld [vmem:[#allocation7 + $0x1028] sm:$0xff] }
 0x19e   :  { %1382 = vmatmul.f32.vlgmr.msra.gmra.mxu2 %v3070_v0  ;;  %1386 = vmatpush.msra.mxu3 %v1074_v6  ;;  %v1583_v0 = vld [vmem:[#allocation7 + $0x1580] sm:$0xff]  ;;  %v1492_v6 = vld [vmem:[#allocation7 + $0x12a8] sm:$0xff] }
 0x19f   :  { %1690 = vmatmul.f32.vlgmr.msrb.gmra.mxu0 %v3032_v38  ;;  %1714 = vmatpush.msrb.mxu2 %v1595_v7  ;;  %v1014_v7 = vld [vmem:[#allocation7 + $0xe18] sm:$0xff] }
 0x1a0   :  { %1754 = vmatpush.msra.mxu0 %v1468_v9  ;;  %1706 = vmatpush.msrb.mxu1 %v1483_v49  ;;  %v1535_v9 = vld [vmem:[#allocation7 + $0x1400] sm:$0xff]  ;;  %v1408_v49 = vld [vmem:[#allocation7 + $0x1008] sm:$0xff] }
 0x1a1   :  { %1387 = vmatpush.msra.mxu3 %v1070_v11  ;;  %1715 = vmatpush.msrb.mxu2 %v1591_v12  ;;  %v1488_v11 = vld [vmem:[#allocation7 + $0x1288] sm:$0xff]  ;;  %v1659_v12 = vld [vmem:[#allocation7 + $0x17e0] sm:$0xff] }
 0x1a2   :  { %1755 = vmatpush.msra.mxu0 %v1464_v13  ;;  %1707 = vmatpush.msrb.mxu1 %v1479_v14  ;;  %v1596_v13 = vld [vmem:[#allocation7 + $0x15e8] sm:$0xff]  ;;  %v1469_v14 = vld [vmem:[#allocation7 + $0x11f0] sm:$0xff] }
 0x1a3   :  { %1388 = vmatpush.msra.mxu3 %v1066_v15  ;;  %1716 = vmatpush.msrb.mxu2 %v1587_v16  ;;  %v1484_v15 = vld [vmem:[#allocation7 + $0x1268] sm:$0xff]  ;;  %v1655_v16 = vld [vmem:[#allocation7 + $0x17c0] sm:$0xff] }
 0x1a4   :  { %1756 = vmatpush.msra.mxu0 %v1460_v17  ;;  %1708 = vmatpush.msrb.mxu1 %v1475_v18  ;;  %v1592_v17 = vld [vmem:[#allocation7 + $0x15c8] sm:$0xff]  ;;  %v1465_v18 = vld [vmem:[#allocation7 + $0x11d0] sm:$0xff] }
 0x1a5   :  { %1389 = vmatpush.msra.mxu3 %v1062_v19  ;;  %1717 = vmatpush.msrb.mxu2 %v1583_v0  ;;  %v1480_v19 = vld [vmem:[#allocation7 + $0x1248] sm:$0xff]  ;;  %v1651_v0 = vld [vmem:[#allocation7 + $0x17a0] sm:$0xff] }
 0x1a6   :  { %1757 = vmatpush.msra.mxu0 %v1456_v20  ;;  %1709 = vmatpush.msrb.mxu1 %v1471_v21  ;;  %v1588_v20 = vld [vmem:[#allocation7 + $0x15a8] sm:$0xff]  ;;  %v1461_v21 = vld [vmem:[#allocation7 + $0x11b0] sm:$0xff] }
 0x1a7   :  { %1390 = vmatpush.msra.mxu3 %v1058_v22  ;;  %1710 = vmatmul.f32.vlgmr.msrb.gmra.mxu1 %v3034_v39  ;;  %v1647_v22 = vld [vmem:[#allocation7 + $0x1780] sm:$0xff] }
 0x1a8   :  { %1718 = vmatpush.msrb.mxu2 %v1579_v23  ;;  %1758 = vmatpush.msra.mxu0 %v1452_v24  ;;  %v1584_v23 = vld [vmem:[#allocation7 + $0x1588] sm:$0xff]  ;;  %v1457_v24 = vld [vmem:[#allocation7 + $0x1190] sm:$0xff] }
 0x1a9   :  { %1774 = vmatpush.msra.mxu1 %v1532_v25  ;;  %1391 = vmatpush.msra.mxu3 %v1054_v26  ;;  %v1472_v25 = vld [vmem:[#allocation7 + $0x1208] sm:$0xff]  ;;  %v1643_v26 = vld [vmem:[#allocation7 + $0x1760] sm:$0xff] }
 0x1aa   :  { %1719 = vmatpush.msrb.mxu2 %v1575_v27  ;;  %1759 = vmatpush.msra.mxu0 %v1448_v28  ;;  %v1580_v27 = vld [vmem:[#allocation7 + $0x1568] sm:$0xff]  ;;  %v1453_v28 = vld [vmem:[#allocation7 + $0x1170] sm:$0xff] }
 0x1ab   :  { %1775 = vmatpush.msra.mxu1 %v1528_v29  ;;  %1392 = vmatpush.msra.mxu3 %v1050_v10  ;;  %v1533_v29 = vld [vmem:[#allocation7 + $0x13f0] sm:$0xff]  ;;  %v1639_v10 = vld [vmem:[#allocation7 + $0x1740] sm:$0xff] }
 0x1ac   :  { %1720 = vmatpush.msrb.mxu2 %v1571_v30  ;;  %1760 = vmatpush.msra.mxu0 %v1444_v31  ;;  %v1576_v31 = vld [vmem:[#allocation7 + $0x1548] sm:$0xff] }
 0x1ad   :  { %1776 = vmatpush.msra.mxu1 %v1524_v32  ;;  %1393 = vmatpush.msra.mxu3 %v1046_v33  ;;  %v1449_v32 = vld [vmem:[#allocation7 + $0x1150] sm:$0xff] }
 0x1ae   :  { %1721 = vmatpush.msrb.mxu2 %v1567_v34  ;;  %1761 = vmatpush.msra.mxu0 %v1440_v35  ;;  %v1529_v33 = vld [vmem:[#allocation7 + $0x13d0] sm:$0xff]  ;;  %v1635_v34 = vld [vmem:[#allocation7 + $0x1720] sm:$0xff]  ;;  %v1572_v35 = vld [vmem:[#allocation7 + $0x1528] sm:$0xff] }
 0x1af   :  { %1777 = vmatpush.msra.mxu1 %v1520_v36  ;;  %1394 = vmatpush.msra.mxu3 %v1042_v37  ;;  %v1445_v36 = vld [vmem:[#allocation7 + $0x1130] sm:$0xff] }
 0x1b0   :  { %1722 = vmatpush.msrb.mxu2 %v1563_v40  ;;  %1762 = vmatpush.msra.mxu0 %v1436_v41  ;;  %v1525_v37 = vld [vmem:[#allocation7 + $0x13b0] sm:$0xff]  ;;  %v1631_v40 = vld [vmem:[#allocation7 + $0x1700] sm:$0xff] }
 0x1b1   :  { %1778 = vmatpush.msra.mxu1 %v1516_v42  ;;  %1395 = vmatpush.msra.mxu3 %v1038_v43  ;;  %v1568_v42 = vld [vmem:[#allocation7 + $0x1508] sm:$0xff]  ;;  %v1441_v43 = vld [vmem:[#allocation7 + $0x1110] sm:$0xff] }
 0x1b2   :  { %1723 = vmatpush.msrb.mxu2 %v1559_v44  ;;  %1763 = vmatpush.msra.mxu0 %v1432_v45  ;;  %v1521_v44 = vld [vmem:[#allocation7 + $0x1390] sm:$0xff]  ;;  %v1627_v45 = vld [vmem:[#allocation7 + $0x16e0] sm:$0xff] }
 0x1b3   :  { %1779 = vmatpush.msra.mxu1 %v1512_v8  ;;  %1396 = vmatpush.msra.mxu3 %v1034_v46  ;;  %v1564_v8 = vld [vmem:[#allocation7 + $0x14e8] sm:$0xff]  ;;  %v1437_v46 = vld [vmem:[#allocation7 + $0x10f0] sm:$0xff] }
 0x1b4   :  { %1724 = vmatpush.msrb.mxu2 %v1555_v47  ;;  %1764 = vmatpush.msra.mxu0 %v1428_v48  ;;  %v1517_v47 = vld [vmem:[#allocation7 + $0x1370] sm:$0xff]  ;;  %v1623_v48 = vld [vmem:[#allocation7 + $0x16c0] sm:$0xff] }
 0x1b5   :  { %1780 = vmatpush.msra.mxu1 %v1508_v52  ;;  %1397 = vmatpush.msra.mxu3 %v1030_v53  ;;  %v3090_v30 = vpop.f32.mrf.mxu0  ;;  %v1560_v52 = vld [vmem:[#allocation7 + $0x14c8] sm:$0xff]  ;;  %v1433_v53 = vld [vmem:[#allocation7 + $0x10d0] sm:$0xff] }
 0x1b6   :  { %1725 = vmatpush.msrb.mxu2 %v1551_v54  ;;  %1765 = vmatpush.msra.mxu0 %v1424_v55  ;;  %v1513_v54 = vld [vmem:[#allocation7 + $0x1350] sm:$0xff]  ;;  %v1619_v55 = vld [vmem:[#allocation7 + $0x16a0] sm:$0xff] }
 0x1b7   :  { %1781 = vmatpush.msra.mxu1 %v1504_v56  ;;  %1398 = vmatpush.msra.mxu3 %v1026_v57  ;;  %v1556_v57 = vld [vmem:[#allocation7 + $0x14a8] sm:$0xff] }
 0x1b8   :  { %1726 = vmatpush.msrb.mxu2 %v1547_v58  ;;  %1766 = vmatpush.msra.mxu0 %v1420_v59  ;;  %v1429_v58 = vld [vmem:[#allocation7 + $0x10b0] sm:$0xff] }
 0x1b9   :  { %1782 = vmatpush.msra.mxu1 %v1500_v60  ;;  %1399 = vmatpush.msra.mxu3 %v1022_v61  ;;  %v1509_v59 = vld [vmem:[#allocation7 + $0x1330] sm:$0xff]  ;;  %v1615_v60 = vld [vmem:[#allocation7 + $0x1680] sm:$0xff]  ;;  %v1552_v61 = vld [vmem:[#allocation7 + $0x1488] sm:$0xff] }
 0x1ba   :  { %1727 = vmatpush.msrb.mxu2 %v1543_v62  ;;  %1767 = vmatpush.msra.mxu0 %v1416_v63  ;;  %v1425_v62 = vld [vmem:[#allocation7 + $0x1090] sm:$0xff] }
 0x1bb   :  { %1783 = vmatpush.msra.mxu1 %v1496_v1  ;;  %1400 = vmatpush.msra.mxu3 %v1018_v3  ;;  %v1505_v63 = vld [vmem:[#allocation7 + $0x1310] sm:$0xff]  ;;  %v1611_v1 = vld [vmem:[#allocation7 + $0x1660] sm:$0xff] }
 0x1bc   :  { %1728 = vmatpush.msrb.mxu2 %v1539_v4  ;;  %1768 = vmatpush.msra.mxu0 %v1412_v5  ;;  %v1548_v4 = vld [vmem:[#allocation7 + $0x1468] sm:$0xff]  ;;  %v1421_v5 = vld [vmem:[#allocation7 + $0x1070] sm:$0xff] }
 0x1bd   :  { %1784 = vmatpush.msra.mxu1 %v1492_v6  ;;  %1401 = vmatpush.msra.mxu3 %v1014_v7  ;;  %v3095_v56 = vpop.f32.mrf.mxu0  ;;  %v1501_v6 = vld [vmem:[#allocation7 + $0x12f0] sm:$0xff]  ;;  %v1607_v7 = vld [vmem:[#allocation7 + $0x1640] sm:$0xff] }
 0x1be   :  { %1729 = vmatpush.msrb.mxu2 %v1535_v9  ;;  %1769 = vmatpush.msra.mxu0 %v1408_v49  ;;  %v3099_v9 = vld [vmem:[#allocation8 + $0x1] ss:$4 sm:$0xf] }
 0x1bf   :  { %1785 = vmatpush.msra.mxu1 %v1488_v11  ;;  %1402 = vmatmul.f32.vlgmr.msra.gmra.mxu3 %v3077_v2  ;;  %v1476_v2 = vld [vmem:[#allocation7 + $0x1228] sm:$0xff]  ;;  %v3093_v41 = vpop.f32.mrf.mxu1  ;;  %v1417_v11 = vld [vmem:[#allocation7 + $0x1050] sm:$0xff] }
 0x1c0   :  { %1730 = vmatmul.f32.vlgmr.msrb.gmra.mxu2 %v3038_v50  ;;  %1734 = vmatpush.msrb.mxu3 %v1659_v12  ;;  %v1544_v49 = vld [vmem:[#allocation7 + $0x1448] sm:$0xff]  ;;  %v1497_v12 = vld [vmem:[#allocation7 + $0x12d0] sm:$0xff] }
 0x1c1   :  { %1770 = vmatmul.f32.vlgmr.msra.gmra.mxu0 %v3032_v38  ;;  %1794 = vmatpush.msra.mxu2 %v1596_v13  ;;  %v1603_v13 = vld [vmem:[#allocation7 + $0x1620] sm:$0xff] }
 0x1c2   :  { %1834 = vmatpush.msrb.mxu0 %v1469_v14  ;;  %1786 = vmatpush.msra.mxu1 %v1484_v15  ;;  %v1080_v14 = vperm.slane %v3099_v9, 2  ;;  %v1540_v15 = vld [vmem:[#allocation7 + $0x1428] sm:$0xff] }
 0x1c3   :  { %1735 = vmatpush.msrb.mxu3 %v1655_v16  ;;  %1795 = vmatpush.msra.mxu2 %v1592_v17  ;;  %v1413_v16 = vld [vmem:[#allocation7 + $0x1030] sm:$0xff] }
 0x1c4   :  { %1835 = vmatpush.msrb.mxu0 %v1465_v18  ;;  %1787 = vmatpush.msra.mxu1 %v1480_v19  ;;  %v1493_v18 = vld [vmem:[#allocation7 + $0x12b0] sm:$0xff]  ;;  %v1599_v19 = vld [vmem:[#allocation7 + $0x1600] sm:$0xff] }
 0x1c5   :  { %1736 = vmatpush.msrb.mxu3 %v1651_v0  ;;  %1796 = vmatpush.msra.mxu2 %v1588_v20  ;;  %v1536_v0 = vld [vmem:[#allocation7 + $0x1408] sm:$0xff]  ;;  %v1409_v20 = vld [vmem:[#allocation7 + $0x1010] sm:$0xff] }
 0x1c6   :  { %1836 = vmatpush.msrb.mxu0 %v1461_v21  ;;  %1788 = vmatpush.msra.mxu1 %v1476_v2  ;;  %v1489_v21 = vld [vmem:[#allocation7 + $0x1290] sm:$0xff] }
 0x1c7   :  { %1737 = vmatpush.msrb.mxu3 %v1647_v22  ;;  %1797 = vmatpush.msra.mxu2 %v1584_v23  ;;  %v3097_v3 = vpop.f32.mrf.mxu1  ;;  %v1660_v22 = vld [vmem:[#allocation7 + $0x17e8] sm:$0xff] }
 0x1c8   :  { %1837 = vmatpush.msrb.mxu0 %v1457_v24  ;;  %1789 = vmatpush.msra.mxu1 %v1472_v25  ;;  %v1597_v24 = vld [vmem:[#allocation7 + $0x15f0] sm:$0xff] }
 0x1c9   :  { %1738 = vmatpush.msrb.mxu3 %v1643_v26  ;;  %1790 = vmatmul.f32.vlgmr.msra.gmra.mxu1 %v3034_v39  ;;  %v1470_v26 = vld [vmem:[#allocation7 + $0x11f8] sm:$0xff] }
 0x1ca   :  { %1798 = vmatpush.msra.mxu2 %v1580_v27  ;;  %1838 = vmatpush.msrb.mxu0 %v1453_v28  ;;  %v1485_v27 = vld [vmem:[#allocation7 + $0x1270] sm:$0xff]  ;;  %v1656_v28 = vld [vmem:[#allocation7 + $0x17c8] sm:$0xff] }
 0x1cb   :  { %1854 = vmatpush.msrb.mxu1 %v1533_v29  ;;  %1739 = vmatpush.msrb.mxu3 %v1639_v10  ;;  %v1593_v29 = vld [vmem:[#allocation7 + $0x15d0] sm:$0xff]  ;;  %v1466_v10 = vld [vmem:[#allocation7 + $0x11d8] sm:$0xff] }
 0x1cc   :  { %1799 = vmatpush.msra.mxu2 %v1576_v31  ;;  %1839 = vmatpush.msrb.mxu0 %v1449_v32  ;;  %v1481_v31 = vld [vmem:[#allocation7 + $0x1250] sm:$0xff]  ;;  %v1652_v32 = vld [vmem:[#allocation7 + $0x17a8] sm:$0xff] }
 0x1cd   :  { %1855 = vmatpush.msrb.mxu1 %v1529_v33  ;;  %1740 = vmatpush.msrb.mxu3 %v1635_v34  ;;  %v1589_v33 = vld [vmem:[#allocation7 + $0x15b0] sm:$0xff]  ;;  %v1462_v34 = vld [vmem:[#allocation7 + $0x11b8] sm:$0xff] }
 0x1ce   :  { %1800 = vmatpush.msra.mxu2 %v1572_v35  ;;  %1840 = vmatpush.msrb.mxu0 %v1445_v36  ;;  %v1477_v35 = vld [vmem:[#allocation7 + $0x1230] sm:$0xff]  ;;  %v1648_v36 = vld [vmem:[#allocation7 + $0x1788] sm:$0xff] }
 0x1cf   :  { %1856 = vmatpush.msrb.mxu1 %v1525_v37  ;;  %1741 = vmatpush.msrb.mxu3 %v1631_v40  ;;  %v1585_v37 = vld [vmem:[#allocation7 + $0x1590] sm:$0xff]  ;;  %v1458_v40 = vld [vmem:[#allocation7 + $0x1198] sm:$0xff] }
 0x1d0   :  { %1801 = vmatpush.msra.mxu2 %v1568_v42  ;;  %1841 = vmatpush.msrb.mxu0 %v1441_v43  ;;  %v1473_v42 = vld [vmem:[#allocation7 + $0x1210] sm:$0xff]  ;;  %v1644_v43 = vld [vmem:[#allocation7 + $0x1768] sm:$0xff] }
 0x1d1   :  { %1857 = vmatpush.msrb.mxu1 %v1521_v44  ;;  %1742 = vmatpush.msrb.mxu3 %v1627_v45  ;;  %v1581_v44 = vld [vmem:[#allocation7 + $0x1570] sm:$0xff]  ;;  %v1454_v45 = vld [vmem:[#allocation7 + $0x1178] sm:$0xff] }
 0x1d2   :  { %1802 = vmatpush.msra.mxu2 %v1564_v8  ;;  %1842 = vmatpush.msrb.mxu0 %v1437_v46  ;;  %v1534_v8 = vld [vmem:[#allocation7 + $0x13f8] sm:$0xff]  ;;  %v1640_v46 = vld [vmem:[#allocation7 + $0x1748] sm:$0xff] }
 0x1d3   :  { %1858 = vmatpush.msrb.mxu1 %v1517_v47  ;;  %1743 = vmatpush.msrb.mxu3 %v1623_v48  ;;  %v1577_v47 = vld [vmem:[#allocation7 + $0x1550] sm:$0xff]  ;;  %v1450_v48 = vld [vmem:[#allocation7 + $0x1158] sm:$0xff] }
 0x1d4   :  { %1803 = vmatpush.msra.mxu2 %v1560_v52  ;;  %1843 = vmatpush.msrb.mxu0 %v1433_v53  ;;  %v1530_v52 = vld [vmem:[#allocation7 + $0x13d8] sm:$0xff]  ;;  %v1636_v53 = vld [vmem:[#allocation7 + $0x1728] sm:$0xff] }
 0x1d5   :  { %1859 = vmatpush.msrb.mxu1 %v1513_v54  ;;  %1744 = vmatpush.msrb.mxu3 %v1619_v55  ;;  %v1263_v17 = vpop.f32.mrf.mxu0  ;;  %v1573_v55 = vld [vmem:[#allocation7 + $0x1530] sm:$0xff] }
 0x1d6   :  { %1804 = vmatpush.msra.mxu2 %v1556_v57  ;;  %1844 = vmatpush.msrb.mxu0 %v1429_v58  ;;  %v1264_v2 = vadd.f32 %v1263_v17, %v1080_v14  ;;  %v1446_v57 = vld [vmem:[#allocation7 + $0x1138] sm:$0xff] }
 0x1d7   :  { %1860 = vmatpush.msrb.mxu1 %v1509_v59  ;;  %1745 = vmatpush.msrb.mxu3 %v1615_v60  ;;  %v1526_v58 = vld [vmem:[#allocation7 + $0x13b8] sm:$0xff]  ;;  %v1632_v59 = vld [vmem:[#allocation7 + $0x1708] sm:$0xff]  ;;  %v1569_v60 = vld [vmem:[#allocation7 + $0x1510] sm:$0xff] }
 0x1d8   :  { %1805 = vmatpush.msra.mxu2 %v1552_v61  ;;  %1845 = vmatpush.msrb.mxu0 %v1425_v62  ;;  %v1442_v61 = vld [vmem:[#allocation7 + $0x1118] sm:$0xff] }
 0x1d9   :  { %1861 = vmatpush.msrb.mxu1 %v1505_v63  ;;  %1746 = vmatpush.msrb.mxu3 %v1611_v1  ;;  %v1522_v62 = vld [vmem:[#allocation7 + $0x1398] sm:$0xff]  ;;  %v1628_v63 = vld [vmem:[#allocation7 + $0x16e8] sm:$0xff]  ;;  %v1565_v1 = vld [vmem:[#allocation7 + $0x14f0] sm:$0xff] }
 0x1da   :  { %1806 = vmatpush.msra.mxu2 %v1548_v4  ;;  %1846 = vmatpush.msrb.mxu0 %v1421_v5  ;;  %v1438_v4 = vld [vmem:[#allocation7 + $0x10f8] sm:$0xff] }
 0x1db   :  { %1862 = vmatpush.msrb.mxu1 %v1501_v6  ;;  %1747 = vmatpush.msrb.mxu3 %v1607_v7  ;;  %v1518_v5 = vld [vmem:[#allocation7 + $0x1378] sm:$0xff]  ;;  %v1624_v6 = vld [vmem:[#allocation7 + $0x16c8] sm:$0xff]  ;;  %v1561_v7 = vld [vmem:[#allocation7 + $0x14d0] sm:$0xff] }
 0x1dc   :  { %1807 = vmatpush.msra.mxu2 %v1544_v49  ;;  %1847 = vmatpush.msrb.mxu0 %v1417_v11  ;;  %v1434_v49 = vld [vmem:[#allocation7 + $0x10d8] sm:$0xff] }
 0x1dd   :  { %1863 = vmatpush.msrb.mxu1 %v1497_v12  ;;  %1748 = vmatpush.msrb.mxu3 %v1603_v13  ;;  %v1514_v11 = vld [vmem:[#allocation7 + $0x1358] sm:$0xff]  ;;  %v1620_v12 = vld [vmem:[#allocation7 + $0x16a8] sm:$0xff]  ;;  %v1557_v13 = vld [vmem:[#allocation7 + $0x14b0] sm:$0xff] }
 0x1de   :  { %1808 = vmatpush.msra.mxu2 %v1540_v15  ;;  %1848 = vmatpush.msrb.mxu0 %v1413_v16  ;;  %v1430_v14 = vld [vmem:[#allocation7 + $0x10b8] sm:$0xff]  ;;  %v1616_v16 = vld [vmem:[#allocation7 + $0x1688] sm:$0xff] }
 0x1df   :  { %1864 = vmatpush.msrb.mxu1 %v1493_v18  ;;  %1749 = vmatpush.msrb.mxu3 %v1599_v19  ;;  %v1283_v23 = vpop.f32.mrf.mxu1  ;;  %v3108_v54 = vpop.f32.mrf.mxu2  ;;  %v1510_v15 = vld [vmem:[#allocation7 + $0x1338] sm:$0xff]  ;;  %v1553_v18 = vld [vmem:[#allocation7 + $0x1490] sm:$0xff] }
 0x1e0   :  { %1809 = vmatpush.msra.mxu2 %v1536_v0  ;;  %1849 = vmatpush.msrb.mxu0 %v1409_v20  ;;  %v3102_v25 = vadd.f32 %v1283_v23, %v1264_v2  ;;  %v1426_v19 = vld [vmem:[#allocation7 + $0x1098] sm:$0xff]  ;;  %v1612_v20 = vld [vmem:[#allocation7 + $0x1668] sm:$0xff] }
 0x1e1   :  { %1865 = vmatpush.msrb.mxu1 %v1489_v21  ;;  %1750 = vmatmul.f32.vlgmr.msrb.gmra.mxu3 %v3040_v51  ;;  %v1506_v0 = vld [vmem:[#allocation7 + $0x1318] sm:$0xff]  ;;  %v1549_v21 = vld [vmem:[#allocation7 + $0x1470] sm:$0xff]  ;;  %v1608_v23 = vld [vmem:[#allocation7 + $0x1648] sm:$0xff] }
 0x1e2   :  { %1810 = vmatmul.f32.vlgmr.msra.gmra.mxu2 %v3038_v50  ;;  %1814 = vmatpush.msra.mxu3 %v1660_v22  ;;  %v1422_v2 = vld [vmem:[#allocation7 + $0x1078] sm:$0xff] }
 0x1e3   :  { %1850 = vmatmul.f32.vlgmr.msrb.gmra.mxu0 %v3032_v38  ;;  %1874 = vmatpush.msrb.mxu2 %v1597_v24  ;;  %v1502_v22 = vld [vmem:[#allocation7 + $0x12f8] sm:$0xff]  ;;  %v1545_v24 = vld [vmem:[#allocation7 + $0x1450] sm:$0xff] }
 0x1e4   :  { %1914 = vmatpush.msra.mxu0 %v1470_v26  ;;  %1866 = vmatpush.msrb.mxu1 %v1485_v27  ;;  %v1418_v26 = vld [vmem:[#allocation7 + $0x1058] sm:$0xff] }
 0x1e5   :  { %1815 = vmatpush.msra.mxu3 %v1656_v28  ;;  %1875 = vmatpush.msrb.mxu2 %v1593_v29  ;;  %v1498_v27 = vld [vmem:[#allocation7 + $0x12d8] sm:$0xff]  ;;  %v1604_v28 = vld [vmem:[#allocation7 + $0x1628] sm:$0xff]  ;;  %v1081_v29 = vperm.slane %v3099_v9, 3 }
 0x1e6   :  { %1915 = vmatpush.msra.mxu0 %v1466_v10  ;;  %1867 = vmatpush.msrb.mxu1 %v1481_v31  ;;  %v1541_v10 = vld [vmem:[#allocation7 + $0x1430] sm:$0xff]  ;;  %v1414_v31 = vld [vmem:[#allocation7 + $0x1038] sm:$0xff] }
 0x1e7   :  { %1816 = vmatpush.msra.mxu3 %v1652_v32  ;;  %1876 = vmatpush.msrb.mxu2 %v1589_v33  ;;  %v3110_v17 = vpop.f32.mrf.mxu2  ;;  %v1494_v33 = vld [vmem:[#allocation7 + $0x12b8] sm:$0xff] }
 0x1e8   :  { %1916 = vmatpush.msra.mxu0 %v1462_v34  ;;  %1868 = vmatpush.msrb.mxu1 %v1477_v35  ;;  %v1600_v34 = vld [vmem:[#allocation7 + $0x1608] sm:$0xff]  ;;  %v1537_v35 = vld [vmem:[#allocation7 + $0x1410] sm:$0xff] }
 0x1e9   :  { %1817 = vmatpush.msra.mxu3 %v1648_v36  ;;  %1877 = vmatpush.msrb.mxu2 %v1585_v37  ;;  %v1410_v36 = vld [vmem:[#allocation7 + $0x1018] sm:$0xff] }
 0x1ea   :  { %1917 = vmatpush.msra.mxu0 %v1458_v40  ;;  %1869 = vmatpush.msrb.mxu1 %v1473_v42  ;;  %v1490_v40 = vld [vmem:[#allocation7 + $0x1298] sm:$0xff] }
 0x1eb   :  { %1818 = vmatpush.msra.mxu3 %v1644_v43  ;;  %1870 = vmatmul.f32.vlgmr.msrb.gmra.mxu1 %v3034_v39 }
 0x1ec   :  { %1878 = vmatpush.msrb.mxu2 %v1581_v44  ;;  %1918 = vmatpush.msra.mxu0 %v1454_v45  ;;  %v1661_v44 = vld [vmem:[#allocation7 + $0x17f0] sm:$0xff] }
 0x1ed   :  { %1934 = vmatpush.msra.mxu1 %v1534_v8  ;;  %1819 = vmatpush.msra.mxu3 %v1640_v46  ;;  %v1598_v8 = vld [vmem:[#allocation7 + $0x15f8] sm:$0xff] }
 0x1ee   :  { %1879 = vmatpush.msrb.mxu2 %v1577_v47  ;;  %1919 = vmatpush.msra.mxu0 %v1450_v48  ;;  %v1486_v47 = vld [vmem:[#allocation7 + $0x1278] sm:$0xff]  ;;  %v1657_v48 = vld [vmem:[#allocation7 + $0x17d0] sm:$0xff] }
 0x1ef   :  { %1935 = vmatpush.msra.mxu1 %v1530_v52  ;;  %1820 = vmatpush.msra.mxu3 %v1636_v53  ;;  %v1594_v52 = vld [vmem:[#allocation7 + $0x15d8] sm:$0xff]  ;;  %v1653_v53 = vld [vmem:[#allocation7 + $0x17b0] sm:$0xff] }
 0x1f0   :  { %1880 = vmatpush.msrb.mxu2 %v1573_v55  ;;  %1920 = vmatpush.msra.mxu0 %v1446_v57  ;;  %v1590_v55 = vld [vmem:[#allocation7 + $0x15b8] sm:$0xff] }
 0x1f1   :  { %1936 = vmatpush.msra.mxu1 %v1526_v58  ;;  %1821 = vmatpush.msra.mxu3 %v1632_v59  ;;  %v1478_v57 = vld [vmem:[#allocation7 + $0x1238] sm:$0xff]  ;;  %v1649_v58 = vld [vmem:[#allocation7 + $0x1790] sm:$0xff] }
 0x1f2   :  { %1881 = vmatpush.msrb.mxu2 %v1569_v60  ;;  %1921 = vmatpush.msra.mxu0 %v1442_v61  ;;  %v1586_v59 = vld [vmem:[#allocation7 + $0x1598] sm:$0xff]  ;;  %v1645_v61 = vld [vmem:[#allocation7 + $0x1770] sm:$0xff] }
 0x1f3   :  { %1937 = vmatpush.msra.mxu1 %v1522_v62  ;;  %1822 = vmatpush.msra.mxu3 %v1628_v63  ;;  %v1474_v60 = vld [vmem:[#allocation7 + $0x1218] sm:$0xff] }
 0x1f4   :  { %1882 = vmatpush.msrb.mxu2 %v1565_v1  ;;  %1922 = vmatpush.msra.mxu0 %v1438_v4  ;;  %v1582_v62 = vld [vmem:[#allocation7 + $0x1578] sm:$0xff]  ;;  %v1637_v1 = vld [vmem:[#allocation7 + $0x1730] sm:$0xff] }
 0x1f5   :  { %1938 = vmatpush.msra.mxu1 %v1518_v5  ;;  %1823 = vmatpush.msra.mxu3 %v1624_v6  ;;  %v1578_v63 = vld [vmem:[#allocation7 + $0x1558] sm:$0xff]  ;;  %v1633_v6 = vld [vmem:[#allocation7 + $0x1710] sm:$0xff] }
 0x1f6   :  { %1883 = vmatpush.msrb.mxu2 %v1561_v7  ;;  %1923 = vmatpush.msra.mxu0 %v1434_v49  ;;  %v1574_v5 = vld [vmem:[#allocation7 + $0x1538] sm:$0xff]  ;;  %v1629_v49 = vld [vmem:[#allocation7 + $0x16f0] sm:$0xff] }
 0x1f7   :  { %1939 = vmatpush.msra.mxu1 %v1514_v11  ;;  %1824 = vmatpush.msra.mxu3 %v1620_v12  ;;  %v1343_v32 = vpop.f32.mrf.mxu0  ;;  %v1570_v7 = vld [vmem:[#allocation7 + $0x1518] sm:$0xff]  ;;  %v2063_v11 = vld [vmem:[#allocation7 + $0x19e0] sm:$0xff] }
 0x1f8   :  { %1884 = vmatpush.msrb.mxu2 %v1557_v13  ;;  %1924 = vmatpush.msra.mxu0 %v1430_v14  ;;  %v1344_v42 = vadd.f32 %v1343_v32, %v1081_v29  ;;  %v1566_v12 = vld [vmem:[#allocation7 + $0x14f8] sm:$0xff]  ;;  %v1625_v13 = vld [vmem:[#allocation7 + $0x16d0] sm:$0xff]  ;;  %v2059_v14 = vld [vmem:[#allocation7 + $0x19c0] sm:$0xff] }
 0x1f9   :  { %1940 = vmatpush.msra.mxu1 %v1510_v15  ;;  %1825 = vmatpush.msra.mxu3 %v1616_v16  ;;  %v1621_v15 = vld [vmem:[#allocation7 + $0x16b0] sm:$0xff]  ;;  %v2055_v16 = vld [vmem:[#allocation7 + $0x19a0] sm:$0xff] }
 0x1fa   :  { %1885 = vmatpush.msrb.mxu2 %v1553_v18  ;;  %1925 = vmatpush.msra.mxu0 %v1426_v19  ;;  %v1558_v18 = vld [vmem:[#allocation7 + $0x14b8] sm:$0xff]  ;;  %v1617_v19 = vld [vmem:[#allocation7 + $0x1690] sm:$0xff]  ;;  %v2039_v29 = vld [vmem:[#allocation7 + $0x1920] sm:$0xff] }
 0x1fb   :  { %1941 = vmatpush.msra.mxu1 %v1506_v0  ;;  %1826 = vmatpush.msra.mxu3 %v1612_v20  ;;  %v2051_v0 = vld [vmem:[#allocation7 + $0x1980] sm:$0xff] }
 0x1fc   :  { %1886 = vmatpush.msrb.mxu2 %v1549_v21  ;;  %1926 = vmatpush.msra.mxu0 %v1422_v2  ;;  %v1554_v21 = vld [vmem:[#allocation7 + $0x1498] sm:$0xff]  ;;  %v1613_v2 = vld [vmem:[#allocation7 + $0x1670] sm:$0xff]  ;;  %v2035_v32 = vld [vmem:[#allocation7 + $0x1900] sm:$0xff] }
 0x1fd   :  { %1942 = vmatpush.msra.mxu1 %v1502_v22  ;;  %1827 = vmatpush.msra.mxu3 %v1608_v23  ;;  %v2047_v22 = vld [vmem:[#allocation7 + $0x1960] sm:$0xff]  ;;  %v1550_v23 = vld [vmem:[#allocation7 + $0x1478] sm:$0xff] }
 0x1fe   :  { %1887 = vmatpush.msrb.mxu2 %v1545_v24  ;;  %1927 = vmatpush.msra.mxu0 %v1418_v26  ;;  %v1609_v24 = vld [vmem:[#allocation7 + $0x1650] sm:$0xff]  ;;  %v2043_v26 = vld [vmem:[#allocation7 + $0x1940] sm:$0xff] }
 0x1ff   :  { %1943 = vmatpush.msra.mxu1 %v1498_v27  ;;  %1828 = vmatpush.msra.mxu3 %v1604_v28  ;;  %v1303_v37 = vpop.f32.mrf.mxu2  ;;  %v1546_v27 = vld [vmem:[#allocation7 + $0x1458] sm:$0xff]  ;;  %v1605_v28 = vld [vmem:[#allocation7 + $0x1630] sm:$0xff] }
 0x200   :  { %1888 = vmatpush.msrb.mxu2 %v1541_v10  ;;  %1928 = vmatpush.msra.mxu0 %v1414_v31  ;;  %v3114_v43 = vadd.f32 %v1303_v37, %v3102_v25  ;;  %v1482_v25 = vld [vmem:[#allocation7 + $0x1258] sm:$0xff]  ;;  %v3122_v4 = vpop.f32.mrf.mxu3  ;;  %v1601_v31 = vld [vmem:[#allocation7 + $0x1610] sm:$0xff] }
 0x201   :  { %1944 = vmatpush.msra.mxu1 %v1494_v33  ;;  %1829 = vmatpush.msra.mxu3 %v1600_v34  ;;  %v1363_v45 = vpop.f32.mrf.mxu1  ;;  %v1542_v10 = vld [vmem:[#allocation7 + $0x1438] sm:$0xff] }
 0x202   :  { %1889 = vmatpush.msrb.mxu2 %v1537_v35  ;;  %1929 = vmatpush.msra.mxu0 %v1410_v36  ;;  %v3116_v46 = vadd.f32 %v1363_v45, %v1344_v42  ;;  %v1538_v33 = vld [vmem:[#allocation7 + $0x1418] sm:$0xff]  ;;  %v2027_v45 = vld [vmem:[#allocation7 + $0x18c0] sm:$0xff] }
 0x203   :  { %1945 = vmatpush.msra.mxu1 %v1490_v40  ;;  %1830 = vmatmul.f32.vlgmr.msra.gmra.mxu3 %v3040_v51  ;;  %v1662_v35 = vld [vmem:[#allocation7 + $0x17f8] sm:$0xff]  ;;  %v2031_v40 = vld [vmem:[#allocation7 + $0x18e0] sm:$0xff] }
 0x204   :  { %1890 = vmatmul.f32.vlgmr.msrb.gmra.mxu2 %v3038_v50  ;;  %1894 = vmatpush.msrb.mxu3 %v1661_v44  ;;  %v1658_v44 = vld [vmem:[#allocation7 + $0x17d8] sm:$0xff] }
 0x205   :  { %1930 = vmatmul.f32.vlgmr.msra.gmra.mxu0 %v3032_v38  ;;  %1954 = vmatpush.msra.mxu2 %v1598_v8  ;;  %v1641_v38 = vld [vmem:[#allocation7 + $0x1750] sm:$0xff]  ;;  %v2023_v8 = vld [vmem:[#allocation7 + $0x18a0] sm:$0xff] }
 0x206   :  { %1946 = vmatpush.msra.mxu1 %v1486_v47  ;;  %1895 = vmatpush.msrb.mxu3 %v1657_v48  ;;  %v1654_v47 = vld [vmem:[#allocation7 + $0x17b8] sm:$0xff] }
 0x207   :  { %1955 = vmatpush.msra.mxu2 %v1594_v52  ;;  %2270 = vmatpush.msrb.mxu0 %v2063_v11  ;;  %v1650_v48 = vld [vmem:[#allocation7 + $0x1798] sm:$0xff]  ;;  %v2015_v52 = vld [vmem:[#allocation7 + $0x1860] sm:$0xff]  ;;  %v2056_v11 = vld [vmem:[#allocation7 + $0x19a8] sm:$0xff] }
 0x208   :  { %1947 = vmatpush.msra.mxu1 %v1482_v25  ;;  %1896 = vmatpush.msrb.mxu3 %v1653_v53  ;;  %v3124_v20 = vpop.f32.mrf.mxu3  ;;  %v2123_v25 = vld [vmem:[#allocation7 + $0x1bc0] sm:$0xff]  ;;  %v1646_v53 = vld [vmem:[#allocation7 + $0x1778] sm:$0xff] }
 0x209   :  { %1956 = vmatpush.msra.mxu2 %v1590_v55  ;;  %2271 = vmatpush.msrb.mxu0 %v2059_v14  ;;  %v2011_v55 = vld [vmem:[#allocation7 + $0x1840] sm:$0xff]  ;;  %v2052_v14 = vld [vmem:[#allocation7 + $0x1988] sm:$0xff] }
 0x20a   :  { %1948 = vmatpush.msra.mxu1 %v1478_v57  ;;  %1897 = vmatpush.msrb.mxu3 %v1649_v58  ;;  %v2119_v57 = vld [vmem:[#allocation7 + $0x1ba0] sm:$0xff]  ;;  %v1642_v58 = vld [vmem:[#allocation7 + $0x1758] sm:$0xff] }
 0x20b   :  { %1957 = vmatpush.msra.mxu2 %v1586_v59  ;;  %2272 = vmatpush.msrb.mxu0 %v2055_v16  ;;  %v2115_v59 = vld [vmem:[#allocation7 + $0x1b80] sm:$0xff]  ;;  %v2048_v16 = vld [vmem:[#allocation7 + $0x1968] sm:$0xff] }
 0x20c   :  { %1949 = vmatpush.msra.mxu1 %v1474_v60  ;;  %1898 = vmatpush.msrb.mxu3 %v1645_v61  ;;  %v1638_v60 = vld [vmem:[#allocation7 + $0x1738] sm:$0xff]  ;;  %v2003_v61 = vld [vmem:[#allocation7 + $0x1800] sm:$0xff] }
 0x20d   :  { %1950 = vmatmul.f32.vlgmr.msra.gmra.mxu1 %v3034_v39  ;;  %1958 = vmatpush.msra.mxu2 %v1582_v62  ;;  %v1562_v39 = vld [vmem:[#allocation7 + $0x14d8] sm:$0xff]  ;;  %v2111_v62 = vld [vmem:[#allocation7 + $0x1b60] sm:$0xff] }
 0x20e   :  { %1899 = vmatpush.msrb.mxu3 %v1641_v38  ;;  %2273 = vmatpush.msrb.mxu0 %v2051_v0  ;;  %v1634_v38 = vld [vmem:[#allocation7 + $0x1718] sm:$0xff] }
 0x20f   :  { %1959 = vmatpush.msra.mxu2 %v1578_v63  ;;  %v2064_v63 = vld [vmem:[#allocation7 + $0x19e8] sm:$0xff]  ;;  %v1610_v0 = vld [vmem:[#allocation7 + $0x1658] sm:$0xff] }
 0x210   :  { %1900 = vmatpush.msrb.mxu3 %v1637_v1  ;;  %2274 = vmatpush.msrb.mxu0 %v2047_v22  ;;  %v2107_v1 = vld [vmem:[#allocation7 + $0x1b40] sm:$0xff]  ;;  %v2036_v22 = vld [vmem:[#allocation7 + $0x1908] sm:$0xff] }
 0x211   :  { %1960 = vmatpush.msra.mxu2 %v1574_v5  ;;  %v1630_v5 = vld [vmem:[#allocation7 + $0x16f8] sm:$0xff] }
 0x212   :  { %1901 = vmatpush.msrb.mxu3 %v1633_v6  ;;  %2275 = vmatpush.msrb.mxu0 %v2043_v26  ;;  %v2060_v6 = vld [vmem:[#allocation7 + $0x19c8] sm:$0xff]  ;;  %v2091_v26 = vld [vmem:[#allocation7 + $0x1ac0] sm:$0xff] }
 0x213   :  { %1961 = vmatpush.msra.mxu2 %v1570_v7  ;;  %v2103_v7 = vld [vmem:[#allocation7 + $0x1b20] sm:$0xff] }
 0x214   :  { %1902 = vmatpush.msrb.mxu3 %v1629_v49  ;;  %2276 = vmatpush.msrb.mxu0 %v2039_v29  ;;  %v1626_v49 = vld [vmem:[#allocation7 + $0x16d8] sm:$0xff]  ;;  %v2087_v29 = vld [vmem:[#allocation7 + $0x1aa0] sm:$0xff] }
 0x215   :  { %1962 = vmatpush.msra.mxu2 %v1566_v12  ;;  %v2099_v12 = vld [vmem:[#allocation7 + $0x1b00] sm:$0xff] }
 0x216   :  { %1903 = vmatpush.msrb.mxu3 %v1625_v13  ;;  %2277 = vmatpush.msrb.mxu0 %v2035_v32  ;;  %v1622_v13 = vld [vmem:[#allocation7 + $0x16b8] sm:$0xff]  ;;  %v2083_v32 = vld [vmem:[#allocation7 + $0x1a80] sm:$0xff] }
 0x217   :  { %1963 = vmatpush.msra.mxu2 %v1562_v39  ;;  %v2095_v39 = vld [vmem:[#allocation7 + $0x1ae0] sm:$0xff] }
 0x218   :  { %1904 = vmatpush.msrb.mxu3 %v1621_v15  ;;  %2278 = vmatpush.msrb.mxu0 %v2031_v40  ;;  %v1618_v15 = vld [vmem:[#allocation7 + $0x1698] sm:$0xff]  ;;  %v2012_v40 = vld [vmem:[#allocation7 + $0x1848] sm:$0xff] }
 0x219   :  { %1964 = vmatpush.msra.mxu2 %v1558_v18  ;;  %v1614_v18 = vld [vmem:[#allocation7 + $0x1678] sm:$0xff] }
 0x21a   :  { %1905 = vmatpush.msrb.mxu3 %v1617_v19  ;;  %2279 = vmatpush.msrb.mxu0 %v2027_v45  ;;  %v2044_v19 = vld [vmem:[#allocation7 + $0x1948] sm:$0xff]  ;;  %v2067_v45 = vld [vmem:[#allocation7 + $0x1a00] sm:$0xff] }
 0x21b   :  { %1965 = vmatpush.msra.mxu2 %v1554_v21  ;;  %v2040_v21 = vld [vmem:[#allocation7 + $0x1928] sm:$0xff] }
 0x21c   :  { %1906 = vmatpush.msrb.mxu3 %v1613_v2  ;;  %2280 = vmatpush.msrb.mxu0 %v2023_v8  ;;  %v1606_v2 = vld [vmem:[#allocation7 + $0x1638] sm:$0xff]  ;;  %v2187_v8 = vld [vmem:[#allocation7 + $0x1dc0] sm:$0xff] }
 0x21d   :  { %1966 = vmatpush.msra.mxu2 %v1550_v23  ;;  %v1602_v23 = vld [vmem:[#allocation7 + $0x1618] sm:$0xff] }
 0x21e   :  { %1907 = vmatpush.msrb.mxu3 %v1609_v24  ;;  %v2032_v24 = vld [vmem:[#allocation7 + $0x18e8] sm:$0xff] }
 0x21f   :  { %1967 = vmatpush.msra.mxu2 %v1546_v27  ;;  %v2028_v27 = vld [vmem:[#allocation7 + $0x18c8] sm:$0xff] }
 0x220   :  { %1908 = vmatpush.msrb.mxu3 %v1605_v28  ;;  %v1323_v34 = vpop.f32.mrf.mxu3 }
 0x221   :  { %1968 = vmatpush.msra.mxu2 %v1542_v10  ;;  %v3127_v36 = vadd.f32 %v1323_v34, %v3114_v43  ;;  %v1383_v37 = vpop.f32.mrf.mxu2  ;;  %v2019_v43 = vld [vmem:[#allocation7 + $0x1880] sm:$0xff] }
 0x222   :  { %1909 = vmatpush.msrb.mxu3 %v1601_v31  ;;  %v3130_v42 = vadd.f32 %v1383_v37, %v3116_v46  ;;  %v2127_v46 = vld [vmem:[#allocation7 + $0x1be0] sm:$0xff]  ;;  %2281 = vmatpush.msrb.mxu0 %v2019_v43  ;;  %v2024_v31 = vld [vmem:[#allocation7 + $0x18a8] sm:$0xff] }
 0x223   :  { %1969 = vmatpush.msra.mxu2 %v1538_v33  ;;  %1910 = vmatmul.f32.vlgmr.msrb.gmra.mxu3 %v3040_v51  ;;  %v2020_v33 = vld [vmem:[#allocation7 + $0x1888] sm:$0xff]  ;;  %v2079_v34 = vld [vmem:[#allocation7 + $0x1a60] sm:$0xff] }
 0x224   :  { %1970 = vmatmul.f32.vlgmr.msra.gmra.mxu2 %v3038_v50  ;;  %1974 = vmatpush.msra.mxu3 %v1662_v35  ;;  %v2007_v50 = vld [vmem:[#allocation7 + $0x1820] sm:$0xff]  ;;  %v2016_v35 = vld [vmem:[#allocation7 + $0x1868] sm:$0xff] }
 0x225   :  { %2290 = vmatpush.msrb.mxu1 %v2127_v46  ;;  %2282 = vmatpush.msrb.mxu0 %v2015_v52  ;;  %v2075_v37 = vld [vmem:[#allocation7 + $0x1a40] sm:$0xff]  ;;  %v2128_v43 = vld [vmem:[#allocation7 + $0x1be8] sm:$0xff] }
 0x226   :  { %1975 = vmatpush.msra.mxu3 %v1658_v44  ;;  %v2071_v44 = vld [vmem:[#allocation7 + $0x1a20] sm:$0xff]  ;;  %v2124_v52 = vld [vmem:[#allocation7 + $0x1bc8] sm:$0xff] }
 0x227   :  { %2291 = vmatpush.msrb.mxu1 %v2123_v25  ;;  %2283 = vmatpush.msrb.mxu0 %v2011_v55  ;;  %v2179_v46 = vld [vmem:[#allocation7 + $0x1d80] sm:$0xff]  ;;  %v2120_v25 = vld [vmem:[#allocation7 + $0x1ba8] sm:$0xff] }
 0x228   :  { %1976 = vmatpush.msra.mxu3 %v1654_v47  ;;  %v2004_v47 = vld [vmem:[#allocation7 + $0x1808] sm:$0xff] }
 0x229   :  { %2292 = vmatpush.msrb.mxu1 %v2119_v57  ;;  %2284 = vmatpush.msrb.mxu0 %v2007_v50  ;;  %v2116_v55 = vld [vmem:[#allocation7 + $0x1b88] sm:$0xff]  ;;  %v2171_v57 = vld [vmem:[#allocation7 + $0x1d40] sm:$0xff] }
 0x22a   :  { %1977 = vmatpush.msra.mxu3 %v1650_v48  ;;  %v2183_v48 = vld [vmem:[#allocation7 + $0x1da0] sm:$0xff] }
 0x22b   :  { %2293 = vmatpush.msrb.mxu1 %v2115_v59  ;;  %2285 = vmatpush.msrb.mxu0 %v2003_v61  ;;  %v2167_v50 = vld [vmem:[#allocation7 + $0x1d20] sm:$0xff]  ;;  %v2108_v59 = vld [vmem:[#allocation7 + $0x1b48] sm:$0xff] }
 0x22c   :  { %1978 = vmatpush.msra.mxu3 %v1646_v53  ;;  %v2175_v53 = vld [vmem:[#allocation7 + $0x1d60] sm:$0xff] }
 0x22d   :  { %2294 = vmatpush.msrb.mxu1 %v2111_v62  ;;  %2350 = vmatpush.msra.mxu0 %v2064_v63  ;;  %v2163_v61 = vld [vmem:[#allocation7 + $0x1d00] sm:$0xff]  ;;  %v2104_v62 = vld [vmem:[#allocation7 + $0x1b28] sm:$0xff]  ;;  %v1078_v63 = vperm.slane %v3099_v9, 0 }
 0x22e   :  { %1979 = vmatpush.msra.mxu3 %v1642_v58  ;;  %v2112_v58 = vld [vmem:[#allocation7 + $0x1b68] sm:$0xff] }
 0x22f   :  { %2295 = vmatpush.msrb.mxu1 %v2107_v1  ;;  %2351 = vmatpush.msra.mxu0 %v2060_v6  ;;  %v1691_v6 = vpop.f32.mrf.mxu0  ;;  %v2092_v9 = vld [vmem:[#allocation7 + $0x1ac8] sm:$0xff] }
 0x230   :  { %1980 = vmatpush.msra.mxu3 %v1638_v60  ;;  %v3138_v60 = vld [vmem:[#allocation8 + $0x2] ss:$4 sm:$0xf] }
 0x231   :  { %2296 = vmatpush.msrb.mxu1 %v2103_v7  ;;  %2352 = vmatpush.msra.mxu0 %v2056_v11  ;;  %v1666_v1 = vperm.slane %v3138_v60, 0  ;;  %v2096_v7 = vld [vmem:[#allocation7 + $0x1ae8] sm:$0xff]  ;;  %v1104_v11 = vadd.f32 %v3090_v30, %v1078_v63 }
 0x232   :  { %1981 = vmatpush.msra.mxu3 %v1634_v38  ;;  %v2159_v38 = vld [vmem:[#allocation7 + $0x1ce0] sm:$0xff]  ;;  %v2084_v30 = vld [vmem:[#allocation7 + $0x1a88] sm:$0xff] }
 0x233   :  { %2297 = vmatpush.msrb.mxu1 %v2099_v12  ;;  %2353 = vmatpush.msra.mxu0 %v2052_v14  ;;  %v1692_v12 = vadd.f32 %v1691_v6, %v1666_v1  ;;  %v1124_v14 = vadd.f32 %v3093_v41, %v1104_v11  ;;  %v2164_v63 = vld [vmem:[#allocation7 + $0x1d08] sm:$0xff]  ;;  %v2223_v1 = vld [vmem:[#allocation7 + $0x1ee0] sm:$0xff] }
 0x234   :  { %1982 = vmatpush.msra.mxu3 %v1630_v5  ;;  %v2100_v5 = vld [vmem:[#allocation7 + $0x1b08] sm:$0xff] }
 0x235   :  { %2298 = vmatpush.msrb.mxu1 %v2095_v39  ;;  %2354 = vmatpush.msra.mxu0 %v2048_v16  ;;  %v1144_v16 = vadd.f32 %v3108_v54, %v1124_v14  ;;  %v2065_v54 = vld [vmem:[#allocation7 + $0x19f0] sm:$0xff]  ;;  %v2160_v11 = vld [vmem:[#allocation7 + $0x1ce8] sm:$0xff] }
 0x236   :  { %1983 = vmatpush.msra.mxu3 %v1626_v49  ;;  %v1711_v49 = vpop.f32.mrf.mxu1  ;;  %v2021_v14 = vld [vmem:[#allocation7 + $0x1890] sm:$0xff] }
 0x237   :  { %2355 = vmatpush.msra.mxu0 %v2044_v19  ;;  %2299 = vmatpush.msrb.mxu1 %v2091_v26  ;;  %v1712_v39 = vadd.f32 %v1711_v49, %v1692_v12  ;;  %v2151_v19 = vld [vmem:[#allocation7 + $0x1ca0] sm:$0xff]  ;;  %v2080_v26 = vld [vmem:[#allocation7 + $0x1a68] sm:$0xff]  ;;  %v2025_v49 = vld [vmem:[#allocation7 + $0x18b0] sm:$0xff] }
 0x238   :  { %1984 = vmatpush.msra.mxu3 %v1622_v13 }
 0x239   :  { %2356 = vmatpush.msra.mxu0 %v2040_v21  ;;  %2300 = vmatpush.msrb.mxu1 %v2087_v29  ;;  %v2076_v29 = vld [vmem:[#allocation7 + $0x1a48] sm:$0xff] }
 0x23a   :  { %1985 = vmatpush.msra.mxu3 %v1618_v15  ;;  %v2155_v15 = vld [vmem:[#allocation7 + $0x1cc0] sm:$0xff] }
 0x23b   :  { %2357 = vmatpush.msra.mxu0 %v2036_v22  ;;  %2301 = vmatpush.msrb.mxu1 %v2083_v32  ;;  %v1164_v22 = vadd.f32 %v3122_v4, %v1144_v16  ;;  %v2135_v32 = vld [vmem:[#allocation7 + $0x1c20] sm:$0xff]  ;;  %v2072_v4 = vld [vmem:[#allocation7 + $0x1a28] sm:$0xff] }
 0x23c   :  { %1986 = vmatpush.msra.mxu3 %v1614_v18 }
 0x23d   :  { %2358 = vmatpush.msra.mxu0 %v2032_v24  ;;  %2302 = vmatpush.msrb.mxu1 %v2079_v34  ;;  %v2143_v24 = vld [vmem:[#allocation7 + $0x1c60] sm:$0xff]  ;;  %v2068_v34 = vld [vmem:[#allocation7 + $0x1a08] sm:$0xff] }
 0x23e   :  { %1987 = vmatpush.msra.mxu3 %v1610_v0  ;;  %v2088_v0 = vld [vmem:[#allocation7 + $0x1aa8] sm:$0xff]  ;;  %v1771_v12 = vpop.f32.mrf.mxu0 }
 0x23f   :  { %2359 = vmatpush.msra.mxu0 %v2028_v27  ;;  %2303 = vmatpush.msrb.mxu1 %v2075_v37  ;;  %v2255_v37 = vld [vmem:[#allocation7 + $0x1fe0] sm:$0xff] }
 0x240   :  { %1988 = vmatpush.msra.mxu3 %v1606_v2  ;;  %v2147_v2 = vld [vmem:[#allocation7 + $0x1c80] sm:$0xff] }
 0x241   :  { %2360 = vmatpush.msra.mxu0 %v2024_v31  ;;  %2304 = vmatpush.msrb.mxu1 %v2071_v44  ;;  %v2061_v31 = vld [vmem:[#allocation7 + $0x19d0] sm:$0xff]  ;;  %v2251_v44 = vld [vmem:[#allocation7 + $0x1fc0] sm:$0xff] }
 0x242   :  { %1989 = vmatpush.msra.mxu3 %v1602_v23  ;;  %v1403_v28 = vpop.f32.mrf.mxu3 }
 0x243   :  { %1990 = vmatmul.f32.vlgmr.msra.gmra.mxu3 %v3040_v51  ;;  %v3136_v10 = vadd.f32 %v1403_v28, %v3130_v42  ;;  %2361 = vmatpush.msra.mxu0 %v2020_v33  ;;  %v2008_v51 = vld [vmem:[#allocation7 + $0x1828] sm:$0xff]  ;;  %v2191_v42 = vld [vmem:[#allocation7 + $0x1de0] sm:$0xff]  ;;  %v1731_v13 = vpop.f32.mrf.mxu2 }
 0x244   :  { %2310 = vmatpush.msrb.mxu2 %v2191_v42  ;;  %2305 = vmatpush.msrb.mxu1 %v2067_v45  ;;  %v1732_v18 = vadd.f32 %v1731_v13, %v1712_v39  ;;  %v2139_v28 = vld [vmem:[#allocation7 + $0x1c40] sm:$0xff]  ;;  %v2188_v42 = vld [vmem:[#allocation7 + $0x1dc8] sm:$0xff] }
 0x245   :  { %2362 = vmatpush.msra.mxu0 %v2016_v35  ;;  %v2131_v33 = vld [vmem:[#allocation7 + $0x1c00] sm:$0xff]  ;;  %v2057_v35 = vld [vmem:[#allocation7 + $0x19b0] sm:$0xff]  ;;  %2330 = vmatpush.msrb.mxu3 %v2255_v37  ;;  %v2156_v39 = vld [vmem:[#allocation7 + $0x1cc8] sm:$0xff] }
 0x246   :  { %2311 = vmatpush.msrb.mxu2 %v2187_v8  ;;  %2370 = vmatpush.msra.mxu1 %v2128_v43  ;;  %v2247_v45 = vld [vmem:[#allocation7 + $0x1fa0] sm:$0xff]  ;;  %v2049_v8 = vld [vmem:[#allocation7 + $0x1970] sm:$0xff]  ;;  %v2136_v37 = vld [vmem:[#allocation7 + $0x1c28] sm:$0xff] }
 0x247   :  { %2363 = vmatpush.msra.mxu0 %v2012_v40  ;;  %v2192_v40 = vld [vmem:[#allocation7 + $0x1de8] sm:$0xff]  ;;  %2331 = vmatpush.msrb.mxu3 %v2251_v44  ;;  %v2243_v43 = vld [vmem:[#allocation7 + $0x1f80] sm:$0xff]  ;;  %v2129_v44 = vld [vmem:[#allocation7 + $0x1bf0] sm:$0xff] }
 0x248   :  { %2312 = vmatpush.msrb.mxu2 %v2183_v48  ;;  %2371 = vmatpush.msra.mxu1 %v2124_v52  ;;  %v2045_v48 = vld [vmem:[#allocation7 + $0x1950] sm:$0xff]  ;;  %v2180_v52 = vld [vmem:[#allocation7 + $0x1d88] sm:$0xff]  ;;  %v2219_v13 = vld [vmem:[#allocation7 + $0x1ec0] sm:$0xff] }
 0x249   :  { %2364 = vmatpush.msra.mxu0 %v2008_v51  ;;  %v2053_v51 = vld [vmem:[#allocation7 + $0x1990] sm:$0xff]  ;;  %2332 = vmatpush.msrb.mxu3 %v2247_v45 }
 0x24a   :  { %2313 = vmatpush.msrb.mxu2 %v2179_v46  ;;  %2372 = vmatpush.msra.mxu1 %v2120_v25  ;;  %v2239_v46 = vld [vmem:[#allocation7 + $0x1f60] sm:$0xff]  ;;  %v2041_v25 = vld [vmem:[#allocation7 + $0x1930] sm:$0xff] }
 0x24b   :  { %2365 = vmatpush.msra.mxu0 %v2004_v47  ;;  %v2184_v47 = vld [vmem:[#allocation7 + $0x1da8] sm:$0xff]  ;;  %2333 = vmatpush.msrb.mxu3 %v2243_v43  ;;  %v2125_v45 = vld [vmem:[#allocation7 + $0x1bd0] sm:$0xff] }
 0x24c   :  { %2314 = vmatpush.msrb.mxu2 %v2175_v53  ;;  %2373 = vmatpush.msra.mxu1 %v2116_v55  ;;  %v2176_v53 = vld [vmem:[#allocation7 + $0x1d68] sm:$0xff]  ;;  %v2235_v55 = vld [vmem:[#allocation7 + $0x1f40] sm:$0xff] }
 0x24d   :  { %2334 = vmatpush.msrb.mxu3 %v2239_v46  ;;  %v2252_v43 = vld [vmem:[#allocation7 + $0x1fc8] sm:$0xff] }
 0x24e   :  { %2315 = vmatpush.msrb.mxu2 %v2171_v57  ;;  %2374 = vmatpush.msra.mxu1 %v2112_v58  ;;  %v2037_v57 = vld [vmem:[#allocation7 + $0x1910] sm:$0xff]  ;;  %v2172_v58 = vld [vmem:[#allocation7 + $0x1d48] sm:$0xff] }
 0x24f   :  { %2335 = vmatpush.msrb.mxu3 %v2235_v55  ;;  %v2248_v46 = vld [vmem:[#allocation7 + $0x1fa8] sm:$0xff] }
 0x250   :  { %2316 = vmatpush.msrb.mxu2 %v2167_v50  ;;  %2375 = vmatpush.msra.mxu1 %v2108_v59  ;;  %v2231_v50 = vld [vmem:[#allocation7 + $0x1f20] sm:$0xff]  ;;  %v2033_v59 = vld [vmem:[#allocation7 + $0x18f0] sm:$0xff]  ;;  %v2244_v55 = vld [vmem:[#allocation7 + $0x1f88] sm:$0xff] }
 0x251   :  { %2336 = vmatpush.msrb.mxu3 %v2231_v50  ;;  %v2109_v50 = vld [vmem:[#allocation7 + $0x1b50] sm:$0xff] }
 0x252   :  { %2317 = vmatpush.msrb.mxu2 %v2163_v61  ;;  %2376 = vmatpush.msra.mxu1 %v2104_v62  ;;  %v2168_v61 = vld [vmem:[#allocation7 + $0x1d28] sm:$0xff]  ;;  %v2227_v62 = vld [vmem:[#allocation7 + $0x1f00] sm:$0xff] }
 0x253   :  { %2337 = vmatpush.msrb.mxu3 %v2227_v62  ;;  %v2236_v62 = vld [vmem:[#allocation7 + $0x1f48] sm:$0xff] }
 0x254   :  { %2318 = vmatpush.msrb.mxu2 %v2159_v38  ;;  %2377 = vmatpush.msra.mxu1 %v2100_v5  ;;  %v2029_v38 = vld [vmem:[#allocation7 + $0x18d0] sm:$0xff]  ;;  %v2807_v5 = vld [vmem:[#allocation8 + $0x1] ss:$4 sm:$0xf] }
 0x255   :  { %v1079_v6 = vperm.slane %v2807_v5, 1  ;;  %2338 = vmatpush.msrb.mxu3 %v2223_v1  ;;  %v2232_v1 = vld [vmem:[#allocation7 + $0x1f28] sm:$0xff]  ;;  %v2101_v5 = vld [vmem:[#allocation7 + $0x1b10] sm:$0xff] }
 0x256   :  { %2378 = vmatpush.msra.mxu1 %v2096_v7  ;;  %2319 = vmatpush.msrb.mxu2 %v2155_v15  ;;  %v1667_v7 = vperm.slane %v3138_v60, 1  ;;  %v1791_v15 = vpop.f32.mrf.mxu1 }
 0x257   :  { %v1184_v16 = vadd.f32 %v3095_v56, %v1079_v6  ;;  %2339 = vmatpush.msrb.mxu3 %v2219_v13  ;;  %v2009_v56 = vld [vmem:[#allocation7 + $0x1830] sm:$0xff]  ;;  %v2034_v6 = vld [vmem:[#allocation7 + $0x18f8] sm:$0xff]  ;;  %v1668_v13 = vperm.slane %v3138_v60, 2 }
 0x258   :  { %2379 = vmatpush.msra.mxu1 %v2092_v9  ;;  %2320 = vmatpush.msrb.mxu2 %v2151_v19  ;;  %v2215_v9 = vld [vmem:[#allocation7 + $0x1ea0] sm:$0xff]  ;;  %v2017_v19 = vld [vmem:[#allocation7 + $0x1870] sm:$0xff] }
 0x259   :  { %2340 = vmatpush.msrb.mxu3 %v2215_v9  ;;  %v2220_v9 = vld [vmem:[#allocation7 + $0x1ec8] sm:$0xff] }
 0x25a   :  { %2380 = vmatpush.msra.mxu1 %v2088_v0  ;;  %2321 = vmatpush.msrb.mxu2 %v2147_v2  ;;  %v2152_v0 = vld [vmem:[#allocation7 + $0x1ca8] sm:$0xff]  ;;  %v2211_v2 = vld [vmem:[#allocation7 + $0x1e80] sm:$0xff] }
 0x25b   :  { %2341 = vmatpush.msrb.mxu3 %v2211_v2  ;;  %v2085_v2 = vld [vmem:[#allocation7 + $0x1a90] sm:$0xff] }
 0x25c   :  { %2381 = vmatpush.msra.mxu1 %v2084_v30  ;;  %2322 = vmatpush.msrb.mxu2 %v2143_v24  ;;  %v1204_v30 = vadd.f32 %v3097_v3, %v1184_v16  ;;  %v2005_v3 = vld [vmem:[#allocation7 + $0x1810] sm:$0xff] }
 0x25d   :  { %v2089_v16 = vld [vmem:[#allocation7 + $0x1ab0] sm:$0xff] }
 0x25e   :  { %2382 = vmatpush.msra.mxu1 %v2080_v26  ;;  %2323 = vmatpush.msrb.mxu2 %v2139_v28  ;;  %v1224_v24 = vadd.f32 %v3110_v17, %v1204_v30  ;;  %v2207_v28 = vld [vmem:[#allocation7 + $0x1e60] sm:$0xff]  ;;  %v2018_v30 = vld [vmem:[#allocation7 + $0x1878] sm:$0xff] }
 0x25f   :  { %2342 = vmatpush.msrb.mxu3 %v2207_v28  ;;  %v2199_v17 = vld [vmem:[#allocation7 + $0x1e20] sm:$0xff]  ;;  %v2010_v28 = vld [vmem:[#allocation7 + $0x1838] sm:$0xff] }
 0x260   :  { %2383 = vmatpush.msra.mxu1 %v2076_v29  ;;  %2324 = vmatpush.msrb.mxu2 %v2135_v32  ;;  %v2144_v29 = vld [vmem:[#allocation7 + $0x1c68] sm:$0xff] }
 0x262   :  { %2384 = vmatpush.msra.mxu1 %v2072_v4  ;;  %2325 = vmatpush.msrb.mxu2 %v2131_v33  ;;  %v2203_v4 = vld [vmem:[#allocation7 + $0x1e40] sm:$0xff]  ;;  %v2140_v33 = vld [vmem:[#allocation7 + $0x1c48] sm:$0xff] }
 0x263   :  { %2343 = vmatpush.msrb.mxu3 %v2203_v4  ;;  %v2006_v4 = vld [vmem:[#allocation7 + $0x1818] sm:$0xff] }
 0x264   :  { %v1751_v21 = vpop.f32.mrf.mxu3  ;;  %2385 = vmatpush.msra.mxu1 %v2068_v34  ;;  %2390 = vmatpush.msra.mxu2 %v2192_v40 }
 0x265   :  { %v1752_v23 = vadd.f32 %v1751_v21, %v1732_v18  ;;  %v1772_v18 = vadd.f32 %v1771_v12, %v1667_v7  ;;  %v1811_v21 = vpop.f32.mrf.mxu2  ;;  %2344 = vmatpush.msrb.mxu3 %v2199_v17  ;;  %v2228_v7 = vld [vmem:[#allocation7 + $0x1f08] sm:$0xff] }
 0x266   :  { %2391 = vmatpush.msra.mxu2 %v2188_v42  ;;  %v2132_v42 = vld [vmem:[#allocation7 + $0x1c08] sm:$0xff] }
 0x267   :  { %v1994_v41 = vadd.f32 %v1752_v23, %v1164_v22  ;;  %v1792_v22 = vadd.f32 %v1791_v15, %v1772_v18  ;;  %v2013_v23 = vld [vmem:[#allocation7 + $0x1850] sm:$0xff]  ;;  %v2224_v12 = vld [vmem:[#allocation7 + $0x1ee8] sm:$0xff]  ;;  %v1851_v15 = vpop.f32.mrf.mxu0  ;;  %v2022_v18 = vld [vmem:[#allocation7 + $0x1898] sm:$0xff] }
 0x268   :  { %2392 = vmatpush.msra.mxu2 %v2184_v47  ;;  %v2256_v47 = vld [vmem:[#allocation7 + $0x1fe8] sm:$0xff] }
 0x269   :  { %v3146_v27 = vmax.f32 %v1994_v41, 0.0  ;;  %v2148_v41 = vld [vmem:[#allocation7 + $0x1c88] sm:$0xff]  ;;  %v1812_v26 = vadd.f32 %v1811_v21, %v1792_v22  ;;  %v1852_v21 = vadd.f32 %v1851_v15, %v1668_v13  ;;  %v2145_v13 = vld [vmem:[#allocation7 + $0x1c70] sm:$0xff]  ;;  %v2078_v15 = vld [vmem:[#allocation7 + $0x1a58] sm:$0xff] }
 0x26a   :  { %2393 = vmatpush.msra.mxu2 %v2180_v52  ;;  %v2054_v52 = vld [vmem:[#allocation7 + $0x1998] sm:$0xff]  ;;  %v2200_v17 = vld [vmem:[#allocation7 + $0x1e28] sm:$0xff] }
 0x26b   :  { %2286 = vmatmul.f32.vlgmr.msrb.gmra.mxu0 %v3146_v27 }
 0x26c   :  { %2430 = vmatpush.msrb.mxu0 %v2065_v54  ;;  %2394 = vmatpush.msra.mxu2 %v2176_v53  ;;  %v2050_v53 = vld [vmem:[#allocation7 + $0x1978] sm:$0xff] }
 0x26e   :  { %2431 = vmatpush.msrb.mxu0 %v2061_v31  ;;  %2395 = vmatpush.msra.mxu2 %v2172_v58  ;;  %v1244_v31 = vadd.f32 %v3124_v20, %v1224_v24  ;;  %v2062_v20 = vld [vmem:[#allocation7 + $0x19d8] sm:$0xff]  ;;  %v2081_v24 = vld [vmem:[#allocation7 + $0x1a70] sm:$0xff] }
 0x26f   :  { %v2046_v58 = vld [vmem:[#allocation7 + $0x1958] sm:$0xff] }
 0x270   :  { %2432 = vmatpush.msrb.mxu0 %v2057_v35  ;;  %2396 = vmatpush.msra.mxu2 %v2168_v61  ;;  %v2066_v35 = vld [vmem:[#allocation7 + $0x19f8] sm:$0xff]  ;;  %v2240_v61 = vld [vmem:[#allocation7 + $0x1f68] sm:$0xff] }
 0x272   :  { %2433 = vmatpush.msrb.mxu0 %v2053_v51  ;;  %2397 = vmatpush.msra.mxu2 %v2164_v63  ;;  %v2195_v51 = vld [vmem:[#allocation7 + $0x1e00] sm:$0xff]  ;;  %v2038_v63 = vld [vmem:[#allocation7 + $0x1918] sm:$0xff] }
 0x273   :  { %2366 = vmatmul.f32.vlgmr.msra.gmra.mxu0 %v3146_v27  ;;  %2345 = vmatpush.msrb.mxu3 %v2195_v51  ;;  %v2196_v51 = vld [vmem:[#allocation7 + $0x1e08] sm:$0xff] }
 0x274   :  { %2434 = vmatpush.msrb.mxu0 %v2049_v8  ;;  %2398 = vmatpush.msra.mxu2 %v2160_v11  ;;  %v2058_v8 = vld [vmem:[#allocation7 + $0x19b8] sm:$0xff] }
 0x275   :  { %2410 = vmatpush.msra.mxu3 %v2256_v47  ;;  %v2030_v11 = vld [vmem:[#allocation7 + $0x18d8] sm:$0xff]  ;;  %v2181_v47 = vld [vmem:[#allocation7 + $0x1d90] sm:$0xff] }
 0x276   :  { %2435 = vmatpush.msrb.mxu0 %v2045_v48  ;;  %2399 = vmatpush.msra.mxu2 %v2156_v39  ;;  %v2121_v48 = vld [vmem:[#allocation7 + $0x1bb0] sm:$0xff]  ;;  %v2026_v39 = vld [vmem:[#allocation7 + $0x18b8] sm:$0xff] }
 0x277   :  { %2411 = vmatpush.msra.mxu3 %v2252_v43  ;;  %v2118_v43 = vld [vmem:[#allocation7 + $0x1b98] sm:$0xff] }
 0x278   :  { %2436 = vmatpush.msrb.mxu0 %v2041_v25  ;;  %2400 = vmatpush.msra.mxu2 %v2152_v0  ;;  %v2117_v25 = vld [vmem:[#allocation7 + $0x1b90] sm:$0xff]  ;;  %v2216_v0 = vld [vmem:[#allocation7 + $0x1ea8] sm:$0xff] }
 0x279   :  { %2412 = vmatpush.msra.mxu3 %v2248_v46  ;;  %v2110_v46 = vld [vmem:[#allocation7 + $0x1b58] sm:$0xff] }
 0x27a   :  { %2437 = vmatpush.msrb.mxu0 %v2037_v57  ;;  %2401 = vmatpush.msra.mxu2 %v2148_v41  ;;  %v2113_v57 = vld [vmem:[#allocation7 + $0x1b70] sm:$0xff] }
 0x27b   :  { %2413 = vmatpush.msra.mxu3 %v2244_v55  ;;  %v2165_v55 = vld [vmem:[#allocation7 + $0x1d10] sm:$0xff] }
 0x27c   :  { %2438 = vmatpush.msrb.mxu0 %v2033_v59  ;;  %2402 = vmatpush.msra.mxu2 %v2144_v29  ;;  %v2042_v59 = vld [vmem:[#allocation7 + $0x1938] sm:$0xff]  ;;  %v2208_v29 = vld [vmem:[#allocation7 + $0x1e68] sm:$0xff] }
 0x27d   :  { %2414 = vmatpush.msra.mxu3 %v2240_v61  ;;  %v2157_v61 = vld [vmem:[#allocation7 + $0x1cd0] sm:$0xff] }
 0x27e   :  { %2439 = vmatpush.msrb.mxu0 %v2029_v38  ;;  %2403 = vmatpush.msra.mxu2 %v2140_v33  ;;  %v2105_v38 = vld [vmem:[#allocation7 + $0x1b30] sm:$0xff]  ;;  %v2204_v33 = vld [vmem:[#allocation7 + $0x1e48] sm:$0xff] }
 0x27f   :  { %2415 = vmatpush.msra.mxu3 %v2236_v62  ;;  %v2094_v62 = vld [vmem:[#allocation7 + $0x1ad8] sm:$0xff] }
 0x280   :  { %2440 = vmatpush.msrb.mxu0 %v2025_v49  ;;  %2404 = vmatpush.msra.mxu2 %v2136_v37  ;;  %v2097_v49 = vld [vmem:[#allocation7 + $0x1af0] sm:$0xff] }
 0x281   :  { %2416 = vmatpush.msra.mxu3 %v2232_v1  ;;  %v2090_v1 = vld [vmem:[#allocation7 + $0x1ab8] sm:$0xff] }
 0x282   :  { %2441 = vmatpush.msrb.mxu0 %v2021_v14  ;;  %2405 = vmatpush.msra.mxu2 %v2132_v42  ;;  %v2093_v14 = vld [vmem:[#allocation7 + $0x1ad0] sm:$0xff] }
 0x283   :  { %2417 = vmatpush.msra.mxu3 %v2228_v7  ;;  %v2189_v42 = vld [vmem:[#allocation7 + $0x1dd0] sm:$0xff] }
 0x284   :  { %2442 = vmatpush.msrb.mxu0 %v2017_v19  ;;  %v1871_v19 = vpop.f32.mrf.mxu1  ;;  %v2149_v7 = vld [vmem:[#allocation7 + $0x1c90] sm:$0xff] }
 0x285   :  { %2418 = vmatpush.msra.mxu3 %v2224_v12  ;;  %v1872_v41 = vadd.f32 %v1871_v19, %v1852_v21  ;;  %v2074_v19 = vld [vmem:[#allocation7 + $0x1a38] sm:$0xff]  ;;  %v2133_v21 = vld [vmem:[#allocation7 + $0x1c10] sm:$0xff] }
 0x286   :  { %v1831_v54 = vpop.f32.mrf.mxu3  ;;  %2443 = vmatpush.msrb.mxu0 %v2013_v23  ;;  %v2212_v23 = vld [vmem:[#allocation7 + $0x1e88] sm:$0xff] }
 0x287   :  { %v1832_v32 = vadd.f32 %v1831_v54, %v1812_v26  ;;  %2419 = vmatpush.msra.mxu3 %v2220_v9  ;;  %v1891_v22 = vpop.f32.mrf.mxu2  ;;  %v2014_v26 = vld [vmem:[#allocation7 + $0x1858] sm:$0xff]  ;;  %v2077_v54 = vld [vmem:[#allocation7 + $0x1a50] sm:$0xff] }
 0x288   :  { %2444 = vmatpush.msrb.mxu0 %v2009_v56  ;;  %v1892_v56 = vadd.f32 %v1891_v22, %v1872_v41  ;;  %v2257_v22 = vld [vmem:[#allocation7 + $0x1ff0] sm:$0xff] }
 0x289   :  { %v1995_v34 = vadd.f32 %v1832_v32, %v1244_v31  ;;  %2420 = vmatpush.msra.mxu3 %v2216_v0  ;;  %v2253_v41 = vld [vmem:[#allocation7 + $0x1fd0] sm:$0xff] }
 0x28a   :  { %2445 = vmatpush.msrb.mxu0 %v2005_v3  ;;  %v2073_v3 = vld [vmem:[#allocation7 + $0x1a30] sm:$0xff] }
 0x28b   :  { %v3155_v40 = vmax.f32 %v1995_v34, 0.0  ;;  %2446 = vmatmul.f32.vlgmr.msrb.gmra.mxu0 %v3146_v27  ;;  %2421 = vmatpush.msra.mxu3 %v2212_v23  ;;  %v2194_v23 = vld [vmem:[#allocation7 + $0x1df8] sm:$0xff] }
 0x28c   :  { %2510 = vmatpush.msra.mxu0 %v2066_v35  ;;  %v2069_v35 = vld [vmem:[#allocation7 + $0x1a10] sm:$0xff] }
 0x28d   :  { %2306 = vmatmul.f32.vlgmr.msrb.gmra.mxu1 %v3155_v40  ;;  %2422 = vmatpush.msra.mxu3 %v2208_v29  ;;  %v2178_v29 = vld [vmem:[#allocation7 + $0x1d78] sm:$0xff] }
 0x28e   :  { %2450 = vmatpush.msrb.mxu1 %v2129_v44  ;;  %2511 = vmatpush.msra.mxu0 %v2062_v20  ;;  %v2193_v44 = vld [vmem:[#allocation7 + $0x1df0] sm:$0xff]  ;;  %v2130_v20 = vld [vmem:[#allocation7 + $0x1bf8] sm:$0xff] }
 0x28f   :  { %2423 = vmatpush.msra.mxu3 %v2204_v33  ;;  %v2166_v33 = vld [vmem:[#allocation7 + $0x1d18] sm:$0xff] }
 0x290   :  { %2451 = vmatpush.msrb.mxu1 %v2125_v45  ;;  %2512 = vmatpush.msra.mxu0 %v2058_v8  ;;  %v2185_v45 = vld [vmem:[#allocation7 + $0x1db0] sm:$0xff]  ;;  %v2122_v8 = vld [vmem:[#allocation7 + $0x1bb8] sm:$0xff] }
 0x291   :  { %2424 = vmatpush.msra.mxu3 %v2200_v17  ;;  %v2221_v17 = vld [vmem:[#allocation7 + $0x1ed0] sm:$0xff] }
 0x292   :  { %2452 = vmatpush.msrb.mxu1 %v2121_v48  ;;  %2513 = vmatpush.msra.mxu0 %v2054_v52  ;;  %v2114_v48 = vld [vmem:[#allocation7 + $0x1b78] sm:$0xff]  ;;  %v2173_v52 = vld [vmem:[#allocation7 + $0x1d50] sm:$0xff] }
 0x293   :  { %2425 = vmatpush.msra.mxu3 %v2196_v51  ;;  %v2154_v51 = vld [vmem:[#allocation7 + $0x1cb8] sm:$0xff] }
 0x294   :  { %2453 = vmatpush.msrb.mxu1 %v2117_v25  ;;  %2514 = vmatpush.msra.mxu0 %v2050_v53  ;;  %v2169_v25 = vld [vmem:[#allocation7 + $0x1d30] sm:$0xff]  ;;  %v2106_v53 = vld [vmem:[#allocation7 + $0x1b38] sm:$0xff] }
 0x295   :  { %2386 = vmatmul.f32.vlgmr.msra.gmra.mxu1 %v3155_v40 }
 0x296   :  { %2454 = vmatpush.msrb.mxu1 %v2113_v57  ;;  %2515 = vmatpush.msra.mxu0 %v2046_v58  ;;  %v2102_v57 = vld [vmem:[#allocation7 + $0x1b18] sm:$0xff]  ;;  %v2161_v58 = vld [vmem:[#allocation7 + $0x1cf0] sm:$0xff] }
 0x298   :  { %2455 = vmatpush.msrb.mxu1 %v2109_v50  ;;  %2516 = vmatpush.msra.mxu0 %v2042_v59  ;;  %v2098_v50 = vld [vmem:[#allocation7 + $0x1af8] sm:$0xff]  ;;  %v1669_v59 = vperm.slane %v3138_v60, 3 }
 0x29a   :  { %2456 = vmatpush.msrb.mxu1 %v2105_v38  ;;  %2517 = vmatpush.msra.mxu0 %v2038_v63  ;;  %v1931_v38 = vpop.f32.mrf.mxu0  ;;  %v2153_v63 = vld [vmem:[#allocation7 + $0x1cb0] sm:$0xff] }
 0x29c   :  { %2457 = vmatpush.msrb.mxu1 %v2101_v5  ;;  %2518 = vmatpush.msra.mxu0 %v2034_v6  ;;  %v1951_v5 = vpop.f32.mrf.mxu1  ;;  %v1932_v6 = vadd.f32 %v1931_v38, %v1669_v59  ;;  %v2234_v59 = vld [vmem:[#allocation7 + $0x1f38] sm:$0xff] }
 0x29d   :  { %v2222_v38 = vld [vmem:[#allocation7 + $0x1ed8] sm:$0xff] }
 0x29e   :  { %2458 = vmatpush.msrb.mxu1 %v2097_v49  ;;  %2519 = vmatpush.msra.mxu0 %v2030_v11  ;;  %v2086_v49 = vld [vmem:[#allocation7 + $0x1a98] sm:$0xff]  ;;  %v1952_v12 = vadd.f32 %v1951_v5, %v1932_v6 }
 0x29f   :  { %v2206_v5 = vld [vmem:[#allocation7 + $0x1e58] sm:$0xff] }
 0x2a0   :  { %2459 = vmatpush.msrb.mxu1 %v2093_v14  ;;  %2520 = vmatpush.msra.mxu0 %v2026_v39  ;;  %v2082_v14 = vld [vmem:[#allocation7 + $0x1a78] sm:$0xff]  ;;  %v2141_v39 = vld [vmem:[#allocation7 + $0x1c50] sm:$0xff] }
 0x2a1   :  { %v2202_v6 = vld [vmem:[#allocation7 + $0x1e38] sm:$0xff] }
 0x2a2   :  { %2460 = vmatpush.msrb.mxu1 %v2089_v16  ;;  %2521 = vmatpush.msra.mxu0 %v2022_v18  ;;  %v2137_v18 = vld [vmem:[#allocation7 + $0x1c30] sm:$0xff] }
 0x2a4   :  { %2461 = vmatpush.msrb.mxu1 %v2085_v2  ;;  %2522 = vmatpush.msra.mxu0 %v2018_v30  ;;  %v2070_v2 = vld [vmem:[#allocation7 + $0x1a18] sm:$0xff] }
 0x2a6   :  { %v1911_v31 = vpop.f32.mrf.mxu3  ;;  %2462 = vmatpush.msrb.mxu1 %v2081_v24  ;;  %2523 = vmatpush.msra.mxu0 %v2014_v26  ;;  %v2190_v24 = vld [vmem:[#allocation7 + $0x1dd8] sm:$0xff] }
 0x2a7   :  { %v1912_v32 = vadd.f32 %v1911_v31, %v1892_v56  ;;  %v1971_v11 = vpop.f32.mrf.mxu2  ;;  %v2186_v26 = vld [vmem:[#allocation7 + $0x1db8] sm:$0xff]  ;;  %v2245_v56 = vld [vmem:[#allocation7 + $0x1f90] sm:$0xff] }
 0x2a8   :  { %2463 = vmatpush.msrb.mxu1 %v2077_v54  ;;  %2524 = vmatpush.msra.mxu0 %v2010_v28  ;;  %v1972_v60 = vadd.f32 %v1971_v11, %v1952_v12  ;;  %v2182_v54 = vld [vmem:[#allocation7 + $0x1d98] sm:$0xff]  ;;  %v2241_v28 = vld [vmem:[#allocation7 + $0x1f70] sm:$0xff]  ;;  %v2607_v12 = vld [vmem:[%s3391_s5 + $0x68] sm:$0xff] }
 0x2a9   :  { %v1996_v34 = vadd.f32 %v1912_v32, %v3127_v36  ;;  %v2126_v36 = vld [vmem:[#allocation7 + $0x1bd8] sm:$0xff]  ;;  %v2237_v31 = vld [vmem:[#allocation7 + $0x1f50] sm:$0xff] }
 0x2aa   :  { %2464 = vmatpush.msrb.mxu1 %v2073_v3  ;;  %2525 = vmatpush.msra.mxu0 %v2006_v4  ;;  %v2174_v32 = vld [vmem:[#allocation7 + $0x1d58] sm:$0xff]  ;;  %v2229_v4 = vld [vmem:[#allocation7 + $0x1f10] sm:$0xff] }
 0x2ab   :  { %v3162_v37 = vmax.f32 %v1996_v34, 0.0  ;;  %2526 = vmatmul.f32.vlgmr.msra.gmra.mxu0 %v3146_v27  ;;  %v2177_v27 = vld [vmem:[#allocation7 + $0x1d70] sm:$0xff]  ;;  %v2170_v3 = vld [vmem:[#allocation7 + $0x1d38] sm:$0xff] }
 0x2ac   :  { %2465 = vmatpush.msrb.mxu1 %v2069_v35  ;;  %v2225_v34 = vld [vmem:[#allocation7 + $0x1ef0] sm:$0xff]  ;;  %v2162_v35 = vld [vmem:[#allocation7 + $0x1cf8] sm:$0xff] }
 0x2ad   :  { %2326 = vmatmul.f32.vlgmr.msrb.gmra.mxu2 %v3162_v37  ;;  %2466 = vmatmul.f32.vlgmr.msrb.gmra.mxu1 %v3155_v40  ;;  %v2608_v11 = vld [vmem:[%s3391_s5 + $0x70] sm:$0xff] }
 0x2ae   :  { %2470 = vmatpush.msrb.mxu2 %v2193_v44  ;;  %2530 = vmatpush.msra.mxu1 %v2130_v20  ;;  %v2158_v44 = vld [vmem:[#allocation7 + $0x1cd8] sm:$0xff]  ;;  %v2217_v20 = vld [vmem:[#allocation7 + $0x1eb0] sm:$0xff] }
 0x2b0   :  { %2471 = vmatpush.msrb.mxu2 %v2189_v42  ;;  %2531 = vmatpush.msra.mxu1 %v2126_v36  ;;  %v2213_v42 = vld [vmem:[#allocation7 + $0x1e90] sm:$0xff]  ;;  %v2150_v36 = vld [vmem:[#allocation7 + $0x1c98] sm:$0xff] }
 0x2b2   :  { %2472 = vmatpush.msrb.mxu2 %v2185_v45  ;;  %2532 = vmatpush.msra.mxu1 %v2122_v8  ;;  %v2209_v45 = vld [vmem:[#allocation7 + $0x1e70] sm:$0xff]  ;;  %v2146_v8 = vld [vmem:[#allocation7 + $0x1c78] sm:$0xff] }
 0x2b4   :  { %2473 = vmatpush.msrb.mxu2 %v2181_v47  ;;  %2533 = vmatpush.msra.mxu1 %v2118_v43  ;;  %v2205_v47 = vld [vmem:[#allocation7 + $0x1e50] sm:$0xff]  ;;  %v2142_v43 = vld [vmem:[#allocation7 + $0x1c58] sm:$0xff] }
 0x2b5   :  { %2406 = vmatmul.f32.vlgmr.msra.gmra.mxu2 %v3162_v37 }
 0x2b6   :  { %2474 = vmatpush.msrb.mxu2 %v2177_v27  ;;  %2534 = vmatpush.msra.mxu1 %v2114_v48  ;;  %v2201_v27 = vld [vmem:[#allocation7 + $0x1e30] sm:$0xff]  ;;  %v2138_v48 = vld [vmem:[#allocation7 + $0x1c38] sm:$0xff] }
 0x2b8   :  { %2475 = vmatpush.msrb.mxu2 %v2173_v52  ;;  %2535 = vmatpush.msra.mxu1 %v2110_v46  ;;  %v2197_v52 = vld [vmem:[#allocation7 + $0x1e10] sm:$0xff]  ;;  %v2134_v46 = vld [vmem:[#allocation7 + $0x1c18] sm:$0xff] }
 0x2ba   :  { %2476 = vmatpush.msrb.mxu2 %v2169_v25  ;;  %2536 = vmatpush.msra.mxu1 %v2106_v53  ;;  %v2258_v25 = vld [vmem:[#allocation7 + $0x1ff8] sm:$0xff] }
 0x2bb   :  { %v2254_v53 = vld [vmem:[#allocation7 + $0x1fd8] sm:$0xff] }
 0x2bc   :  { %2477 = vmatpush.msrb.mxu2 %v2165_v55  ;;  %2537 = vmatpush.msra.mxu1 %v2102_v57  ;;  %v2250_v55 = vld [vmem:[#allocation7 + $0x1fb8] sm:$0xff] }
 0x2bd   :  { %v2246_v57 = vld [vmem:[#allocation7 + $0x1f98] sm:$0xff] }
 0x2be   :  { %2478 = vmatpush.msrb.mxu2 %v2161_v58  ;;  %2538 = vmatpush.msra.mxu1 %v2098_v50  ;;  %v2242_v58 = vld [vmem:[#allocation7 + $0x1f78] sm:$0xff] }
 0x2bf   :  { %v2238_v50 = vld [vmem:[#allocation7 + $0x1f58] sm:$0xff] }
 0x2c0   :  { %2479 = vmatpush.msrb.mxu2 %v2157_v61  ;;  %2539 = vmatpush.msra.mxu1 %v2094_v62  ;;  %v2230_v61 = vld [vmem:[#allocation7 + $0x1f18] sm:$0xff] }
 0x2c1   :  { %v2226_v62 = vld [vmem:[#allocation7 + $0x1ef8] sm:$0xff] }
 0x2c2   :  { %2480 = vmatpush.msrb.mxu2 %v2153_v63  ;;  %2540 = vmatpush.msra.mxu1 %v2090_v1  ;;  %v2218_v63 = vld [vmem:[#allocation7 + $0x1eb8] sm:$0xff] }
 0x2c3   :  { %v2210_v1 = vld [vmem:[#allocation7 + $0x1e78] sm:$0xff] }
 0x2c4   :  { %2481 = vmatpush.msrb.mxu2 %v2149_v7  ;;  %2541 = vmatpush.msra.mxu1 %v2086_v49  ;;  %v2198_v7 = vld [vmem:[#allocation7 + $0x1e18] sm:$0xff] }
 0x2c5   :  { %v2609_v49 = vld [vmem:[%s3391_s5 + $0x78] sm:$0xff] }
 0x2c6   :  { %v1991_v9 = vpop.f32.mrf.mxu3  ;;  %2482 = vmatpush.msrb.mxu2 %v2145_v13  ;;  %2542 = vmatpush.msra.mxu1 %v2082_v14  ;;  %v2606_v13 = vld [vmem:[%s3391_s5 + $0x60] sm:$0xff]  ;;  %v2625_v14 = vld [vmem:[%s3391_s5 + $0xf8] sm:$0xff] }
 0x2c7   :  { %v1992_v16 = vadd.f32 %v1991_v9, %v1972_v60  ;;  %2662 = vmatpush.msrb.mxu0 %v2609_v49  ;;  %v2624_v60 = vld [vmem:[%s3391_s5 + $0xf0] sm:$0xff] }
 0x2c8   :  { %2483 = vmatpush.msrb.mxu2 %v2141_v39  ;;  %2543 = vmatpush.msra.mxu1 %v2078_v15  ;;  %v2605_v39 = vld [vmem:[%s3391_s5 + $0x58] sm:$0xff]  ;;  %v2623_v15 = vld [vmem:[%s3391_s5 + $0xe8] sm:$0xff]  ;;  %v2604_v9 = vld [vmem:[%s3391_s5 + $0x50] sm:$0xff] }
 0x2c9   :  { %v1997_v0 = vadd.f32 %v1992_v16, %v3136_v10  ;;  %v2249_v10 = vld [vmem:[#allocation7 + $0x1fb0] sm:$0xff]  ;;  %2663 = vmatpush.msrb.mxu0 %v2608_v11  ;;  %v2622_v16 = vld [vmem:[%s3391_s5 + $0xe0] sm:$0xff] }
 0x2ca   :  { %2484 = vmatpush.msrb.mxu2 %v2137_v18  ;;  %2544 = vmatpush.msra.mxu1 %v2074_v19  ;;  %v2603_v18 = vld [vmem:[%s3391_s5 + $0x48] sm:$0xff]  ;;  %v2621_v19 = vld [vmem:[%s3391_s5 + $0xd8] sm:$0xff] }
 0x2cb   :  { %v3170_v30 = vmax.f32 %v1997_v0, 0.0  ;;  %2664 = vmatpush.msrb.mxu0 %v2607_v12  ;;  %v2602_v0 = vld [vmem:[%s3391_s5 + $0x40] sm:$0xff]  ;;  %v2657_v11 = vld [vmem:[%s3391_s5 + $0x1f8] sm:$0xff]  ;;  %v2656_v12 = vld [vmem:[%s3391_s5 + $0x1f0] sm:$0xff] }
 0x2cc   :  { %2485 = vmatpush.msrb.mxu2 %v2133_v21  ;;  %2545 = vmatpush.msra.mxu1 %v2070_v2  ;;  %v2620_v21 = vld [vmem:[%s3391_s5 + $0xd0] sm:$0xff]  ;;  %v2601_v2 = vld [vmem:[%s3391_s5 + $0x38] sm:$0xff] }
 0x2cd   :  { %2346 = vmatmul.f32.vlgmr.msrb.gmra.mxu3 %v3170_v30  ;;  %2486 = vmatmul.f32.vlgmr.msrb.gmra.mxu2 %v3162_v37 }
 0x2ce   :  { %2490 = vmatpush.msrb.mxu3 %v2257_v22  ;;  %2546 = vmatmul.f32.vlgmr.msra.gmra.mxu1 %v3155_v40  ;;  %v2233_v40 = vld [vmem:[#allocation7 + $0x1f30] sm:$0xff]  ;;  %v2599_v22 = vld [vmem:[%s3391_s5 + $0x28] sm:$0xff] }
 0x2cf   :  { %2550 = vmatpush.msra.mxu2 %v2194_v23  ;;  %2682 = vmatpush.msrb.mxu1 %v2625_v14  ;;  %v2619_v23 = vld [vmem:[%s3391_s5 + $0xc8] sm:$0xff] }
 0x2d0   :  { %2491 = vmatpush.msrb.mxu3 %v2253_v41  ;;  %2665 = vmatpush.msrb.mxu0 %v2606_v13  ;;  %v2598_v41 = vld [vmem:[%s3391_s5 + $0x20] sm:$0xff]  ;;  %v2655_v14 = vld [vmem:[%s3391_s5 + $0x1e8] sm:$0xff] }
 0x2d1   :  { %2551 = vmatpush.msra.mxu2 %v2190_v24  ;;  %2683 = vmatpush.msrb.mxu1 %v2624_v60  ;;  %v2618_v24 = vld [vmem:[%s3391_s5 + $0xc0] sm:$0xff] }
 0x2d2   :  { %2492 = vmatpush.msrb.mxu3 %v2249_v10  ;;  %2666 = vmatpush.msrb.mxu0 %v2605_v39  ;;  %v2597_v10 = vld [vmem:[%s3391_s5 + $0x18] sm:$0xff] }
 0x2d3   :  { %2552 = vmatpush.msra.mxu2 %v2186_v26  ;;  %2684 = vmatpush.msrb.mxu1 %v2623_v15  ;;  %v2617_v26 = vld [vmem:[%s3391_s5 + $0xb8] sm:$0xff]  ;;  %v2654_v15 = vld [vmem:[%s3391_s5 + $0x1e0] sm:$0xff] }
 0x2d4   :  { %2493 = vmatpush.msrb.mxu3 %v2245_v56  ;;  %2667 = vmatpush.msrb.mxu0 %v2604_v9  ;;  %v2596_v56 = vld [vmem:[%s3391_s5 + $0x10] sm:$0xff] }
 0x2d5   :  { %2553 = vmatpush.msra.mxu2 %v2182_v54  ;;  %2426 = vmatmul.f32.vlgmr.msra.gmra.mxu3 %v3170_v30  ;;  %v2616_v54 = vld [vmem:[%s3391_s5 + $0xb0] sm:$0xff] }
 0x2d6   :  { %2494 = vmatpush.msrb.mxu3 %v2241_v28  ;;  %2685 = vmatpush.msrb.mxu1 %v2622_v16  ;;  %v2595_v28 = vld [vmem:[%s3391_s5 + $0x8] sm:$0xff]  ;;  %v2653_v16 = vld [vmem:[%s3391_s5 + $0x1d8] sm:$0xff] }
 0x2d7   :  { %2554 = vmatpush.msra.mxu2 %v2178_v29  ;;  %2668 = vmatpush.msrb.mxu0 %v2603_v18  ;;  %v2615_v29 = vld [vmem:[%s3391_s5 + $0xa8] sm:$0xff]  ;;  %v2652_v18 = vld [vmem:[%s3391_s5 + $0x1d0] sm:$0xff] }
 0x2d8   :  { %2495 = vmatpush.msrb.mxu3 %v2237_v31  ;;  %2686 = vmatpush.msrb.mxu1 %v2621_v19  ;;  %v2594_v31 = vld [vmem:[%s3391_s5] sm:$0xff]  ;;  %v2651_v19 = vld [vmem:[%s3391_s5 + $0x1c8] sm:$0xff] }
 0x2d9   :  { %2555 = vmatpush.msra.mxu2 %v2174_v32  ;;  %2669 = vmatpush.msrb.mxu0 %v2602_v0  ;;  %v2614_v32 = vld [vmem:[%s3391_s5 + $0xa0] sm:$0xff] }
 0x2da   :  { %2496 = vmatpush.msrb.mxu3 %v2233_v40  ;;  %2687 = vmatpush.msrb.mxu1 %v2620_v21  ;;  %v2641_v40 = vld [vmem:[%s3391_s5 + $0x178] sm:$0xff]  ;;  %v2650_v0 = vld [vmem:[%s3391_s5 + $0x1c0] sm:$0xff] }
 0x2db   :  { %2556 = vmatpush.msra.mxu2 %v2170_v3  ;;  %2670 = vmatpush.msrb.mxu0 %v2601_v2  ;;  %v2613_v3 = vld [vmem:[%s3391_s5 + $0x98] sm:$0xff]  ;;  %v2648_v2 = vld [vmem:[%s3391_s5 + $0x1b0] sm:$0xff] }
 0x2dc   :  { %2497 = vmatpush.msrb.mxu3 %v2229_v4  ;;  %2688 = vmatpush.msrb.mxu1 %v2619_v23  ;;  %v2640_v4 = vld [vmem:[%s3391_s5 + $0x170] sm:$0xff]  ;;  %v2649_v21 = vld [vmem:[%s3391_s5 + $0x1b8] sm:$0xff] }
 0x2dd   :  { %2557 = vmatpush.msra.mxu2 %v2166_v33  ;;  %v2612_v33 = vld [vmem:[%s3391_s5 + $0x90] sm:$0xff] }
 0x2de   :  { %2498 = vmatpush.msrb.mxu3 %v2225_v34  ;;  %2689 = vmatpush.msrb.mxu1 %v2618_v24  ;;  %v2639_v34 = vld [vmem:[%s3391_s5 + $0x168] sm:$0xff] }
 0x2df   :  { %2558 = vmatpush.msra.mxu2 %v2162_v35  ;;  %v2611_v35 = vld [vmem:[%s3391_s5 + $0x88] sm:$0xff] }
 0x2e0   :  { %2499 = vmatpush.msrb.mxu3 %v2221_v17  ;;  %2690 = vmatpush.msrb.mxu1 %v2617_v26  ;;  %v2638_v17 = vld [vmem:[%s3391_s5 + $0x160] sm:$0xff]  ;;  %v2645_v26 = vld [vmem:[%s3391_s5 + $0x198] sm:$0xff] }
 0x2e1   :  { %2559 = vmatpush.msra.mxu2 %v2158_v44  ;;  %v2610_v44 = vld [vmem:[%s3391_s5 + $0x80] sm:$0xff] }
 0x2e2   :  { %2500 = vmatpush.msrb.mxu3 %v2217_v20  ;;  %2691 = vmatpush.msrb.mxu1 %v2616_v54  ;;  %v2637_v20 = vld [vmem:[%s3391_s5 + $0x158] sm:$0xff] }
 0x2e3   :  { %2560 = vmatpush.msra.mxu2 %v2154_v51  ;;  %v2636_v51 = vld [vmem:[%s3391_s5 + $0x150] sm:$0xff] }
 0x2e4   :  { %2501 = vmatpush.msrb.mxu3 %v2213_v42  ;;  %2692 = vmatpush.msrb.mxu1 %v2615_v29  ;;  %v2635_v42 = vld [vmem:[%s3391_s5 + $0x148] sm:$0xff]  ;;  %v2644_v29 = vld [vmem:[%s3391_s5 + $0x190] sm:$0xff] }
 0x2e5   :  { %2561 = vmatpush.msra.mxu2 %v2150_v36  ;;  %v2634_v36 = vld [vmem:[%s3391_s5 + $0x140] sm:$0xff] }
 0x2e6   :  { %2502 = vmatpush.msrb.mxu3 %v2209_v45  ;;  %2693 = vmatpush.msrb.mxu1 %v2614_v32  ;;  %v3299_v45 = vld [vmem:[#allocation8 + $0x3] ss:$4 sm:$0xf] }
 0x2e7   :  { %2562 = vmatpush.msra.mxu2 %v2146_v8  ;;  %v2633_v8 = vld [vmem:[%s3391_s5 + $0x138] sm:$0xff] }
 0x2e8   :  { %2503 = vmatpush.msrb.mxu3 %v2205_v47  ;;  %2694 = vmatpush.msrb.mxu1 %v2613_v3  ;;  %v2287_v47 = vpop.f32.mrf.mxu0 }
 0x2e9   :  { %2563 = vmatpush.msra.mxu2 %v2142_v43  ;;  %v2632_v43 = vld [vmem:[%s3391_s5 + $0x130] sm:$0xff] }
 0x2ea   :  { %2504 = vmatpush.msrb.mxu3 %v2201_v27  ;;  %2695 = vmatpush.msrb.mxu1 %v2612_v33  ;;  %v2262_v27 = vperm.slane %v3299_v45, 0  ;;  %v2265_v33 = vperm.slane %v3299_v45, 3 }
 0x2eb   :  { %2564 = vmatpush.msra.mxu2 %v2138_v48 }
 0x2ec   :  { %2505 = vmatpush.msrb.mxu3 %v2197_v52  ;;  %2696 = vmatpush.msrb.mxu1 %v2611_v35  ;;  %v2631_v52 = vld [vmem:[%s3391_s5 + $0x128] sm:$0xff] }
 0x2ed   :  { %2565 = vmatpush.msra.mxu2 %v2134_v46  ;;  %2506 = vmatmul.f32.vlgmr.msrb.gmra.mxu3 %v3170_v30 }
 0x2ee   :  { %2566 = vmatmul.f32.vlgmr.msra.gmra.mxu2 %v3162_v37  ;;  %2570 = vmatpush.msra.mxu3 %v2258_v25  ;;  %v2214_v37 = vld [vmem:[#allocation7 + $0x1e98] sm:$0xff] }
 0x2ef   :  { %2702 = vmatpush.msrb.mxu2 %v2641_v40  ;;  %2697 = vmatpush.msrb.mxu1 %v2610_v44  ;;  %v2630_v25 = vld [vmem:[%s3391_s5 + $0x120] sm:$0xff]  ;;  %v2643_v40 = vld [vmem:[%s3391_s5 + $0x188] sm:$0xff] }
 0x2f0   :  { %2571 = vmatpush.msra.mxu3 %v2254_v53  ;;  %v2288_v53 = vadd.f32 %v2287_v47, %v2262_v27  ;;  %v2800_v47 = vld [vmem:[#allocation10] ss:$0 sm:$0xff] }
 0x2f1   :  { %2703 = vmatpush.msrb.mxu2 %v2640_v4  ;;  %v2642_v4 = vld [vmem:[%s3391_s5 + $0x180] sm:$0xff] }
 0x2f2   :  { %2572 = vmatpush.msra.mxu3 %v2250_v55  ;;  %v2629_v55 = vld [vmem:[%s3391_s5 + $0x118] sm:$0xff] }
 0x2f3   :  { %2704 = vmatpush.msrb.mxu2 %v2639_v34 }
 0x2f4   :  { %2573 = vmatpush.msra.mxu3 %v2246_v57 }
 0x2f5   :  { %2705 = vmatpush.msrb.mxu2 %v2638_v17 }
 0x2f6   :  { %2574 = vmatpush.msra.mxu3 %v2242_v58  ;;  %v2263_v58 = vperm.slane %v3299_v45, 1 }
 0x2f7   :  { %2706 = vmatpush.msrb.mxu2 %v2637_v20 }
 0x2f8   :  { %2575 = vmatpush.msra.mxu3 %v2238_v50 }
 0x2f9   :  { %2707 = vmatpush.msrb.mxu2 %v2636_v51 }
 0x2fa   :  { %2576 = vmatpush.msra.mxu3 %v2234_v59  ;;  %v2367_v59 = vpop.f32.mrf.mxu0 }
 0x2fb   :  { %2708 = vmatpush.msrb.mxu2 %v2635_v42 }
 0x2fc   :  { %2577 = vmatpush.msra.mxu3 %v2230_v61 }
 0x2fd   :  { %2709 = vmatpush.msrb.mxu2 %v2634_v36 }
 0x2fe   :  { %2578 = vmatpush.msra.mxu3 %v2226_v62  ;;  %v2628_v62 = vld [vmem:[%s3391_s5 + $0x110] sm:$0xff] }
 0x2ff   :  { %2710 = vmatpush.msrb.mxu2 %v2633_v8 }
 0x300   :  { %2579 = vmatpush.msra.mxu3 %v2222_v38 }
 0x301   :  { %2711 = vmatpush.msrb.mxu2 %v2632_v43 }
 0x302   :  { %2580 = vmatpush.msra.mxu3 %v2218_v63 }
 0x303   :  { %2712 = vmatpush.msrb.mxu2 %v2631_v52 }
 0x304   :  { %2581 = vmatpush.msra.mxu3 %v2214_v37  ;;  %v2627_v37 = vld [vmem:[%s3391_s5 + $0x108] sm:$0xff] }
 0x305   :  { %2713 = vmatpush.msrb.mxu2 %v2630_v25 }
 0x306   :  { %2582 = vmatpush.msra.mxu3 %v2210_v1  ;;  %v2368_v1 = vadd.f32 %v2367_v59, %v2263_v58 }
 0x307   :  { %2714 = vmatpush.msrb.mxu2 %v2629_v55 }
 0x308   :  { %2583 = vmatpush.msra.mxu3 %v2206_v5  ;;  %v2447_v23 = vpop.f32.mrf.mxu0 }
 0x309   :  { %2715 = vmatpush.msrb.mxu2 %v2628_v62 }
 0x30a   :  { %2584 = vmatpush.msra.mxu3 %v2202_v6  ;;  %v2307_v48 = vpop.f32.mrf.mxu1  ;;  %v2626_v6 = vld [vmem:[%s3391_s5 + $0x100] sm:$0xff] }
 0x30b   :  { %v2308_v57 = vadd.f32 %v2307_v48, %v2288_v53  ;;  %2716 = vmatpush.msrb.mxu2 %v2627_v37 }
 0x30c   :  { %2585 = vmatpush.msra.mxu3 %v2198_v7 }
 0x30d   :  { %2586 = vmatmul.f32.vlgmr.msra.gmra.mxu3 %v3170_v30  ;;  %v2600_v30 = vld [vmem:[%s3391_s5 + $0x30] sm:$0xff]  ;;  %2717 = vmatpush.msrb.mxu2 %v2626_v6 }
 0x30e   :  { %2671 = vmatpush.msrb.mxu0 %v2600_v30  ;;  %2722 = vmatpush.msrb.mxu3 %v2657_v11  ;;  %v2264_v30 = vperm.slane %v3299_v45, 2 }
 0x310   :  { %2672 = vmatpush.msrb.mxu0 %v2599_v22  ;;  %2723 = vmatpush.msrb.mxu3 %v2656_v12  ;;  %v2647_v22 = vld [vmem:[%s3391_s5 + $0x1a8] sm:$0xff] }
 0x312   :  { %2673 = vmatpush.msrb.mxu0 %v2598_v41  ;;  %v2387_v63 = vpop.f32.mrf.mxu1  ;;  %2724 = vmatpush.msrb.mxu3 %v2655_v14  ;;  %v2646_v41 = vld [vmem:[%s3391_s5 + $0x1a0] sm:$0xff]  ;;  %s2967_s5 = smov 112  }
 0x313   :  { %v2388_v49 = vadd.f32 %v2387_v63, %v2368_v1 }
 0x314   :  { %2674 = vmatpush.msrb.mxu0 %v2597_v10  ;;  %2725 = vmatpush.msrb.mxu3 %v2654_v15  ;;  %v2448_v10 = vadd.f32 %v2447_v23, %v2264_v30 }
 0x316   :  { %2675 = vmatpush.msrb.mxu0 %v2596_v56  ;;  %2726 = vmatpush.msrb.mxu3 %v2653_v16 }
 0x318   :  { %2676 = vmatpush.msrb.mxu0 %v2595_v28  ;;  %2727 = vmatpush.msrb.mxu3 %v2652_v18 }
 0x31a   :  { %2677 = vmatpush.msrb.mxu0 %v2594_v31  ;;  %2728 = vmatpush.msrb.mxu3 %v2651_v19 }
 0x31c   :  { %2729 = vmatpush.msrb.mxu3 %v2650_v0 }
 0x31e   :  { %2730 = vmatpush.msrb.mxu3 %v2649_v21 }
 0x320   :  { %2731 = vmatpush.msrb.mxu3 %v2648_v2 }
 0x322   :  { %2732 = vmatpush.msrb.mxu3 %v2647_v22 }
 0x324   :  { %2733 = vmatpush.msrb.mxu3 %v2646_v41 }
 0x326   :  { %2734 = vmatpush.msrb.mxu3 %v2645_v26 }
 0x328   :  { %2735 = vmatpush.msrb.mxu3 %v2644_v29  ;;  %v2527_v34 = vpop.f32.mrf.mxu0 }
 0x329   :  { %v2528_v17 = vadd.f32 %v2527_v34, %v2265_v33 }
 0x32a   :  { %v2467_v24 = vpop.f32.mrf.mxu1  ;;  %2736 = vmatpush.msrb.mxu3 %v2643_v40 }
 0x32b   :  { %v2468_v54 = vadd.f32 %v2467_v24, %v2448_v10 }
 0x32c   :  { %2737 = vmatpush.msrb.mxu3 %v2642_v4 }
 0x330   :  { %v2327_v46 = vpop.f32.mrf.mxu2 }
 0x331   :  { %v2328_v50 = vadd.f32 %v2327_v46, %v2308_v57 }
 0x338   :  { %v2407_v7 = vpop.f32.mrf.mxu2 }
 0x339   :  { %v2408_v13 = vadd.f32 %v2407_v7, %v2388_v49 }
 0x34b   :  { %v2547_v35 = vpop.f32.mrf.mxu1 }
 0x34c   :  { %v2548_v20 = vadd.f32 %v2547_v35, %v2528_v17 }
 0x350   :  { %v2347_v61 = vpop.f32.mrf.mxu3  ;;  %v2487_v56 = vpop.f32.mrf.mxu2 }
 0x351   :  { %v2348_v38 = vadd.f32 %v2347_v61, %v2328_v50  ;;  %v2488_v28 = vadd.f32 %v2487_v56, %v2468_v54 }
 0x353   :  { %v2590_v5 = vmax.f32 %v2348_v38, 0.0 }
 0x355   :  { %2678 = vmatmul.f32.vlgmr.msrb.gmra.mxu0 %v2590_v5 }
 0x358   :  { %v2427_v60 = vpop.f32.mrf.mxu3 }
 0x359   :  { %v2428_v39 = vadd.f32 %v2427_v60, %v2408_v13 }
 0x35b   :  { %v2591_v9 = vmax.f32 %v2428_v39, 0.0 }
 0x35d   :  { %2698 = vmatmul.f32.vlgmr.msrb.gmra.mxu1 %v2591_v9 }
 0x370   :  { %v2507_v31 = vpop.f32.mrf.mxu3 }
 0x371   :  { %v2508_v32 = vadd.f32 %v2507_v31, %v2488_v28  ;;  %v2567_v44 = vpop.f32.mrf.mxu2 }
 0x372   :  { %v2568_v51 = vadd.f32 %v2567_v44, %v2548_v20 }
 0x373   :  { %v2592_v3 = vmax.f32 %v2508_v32, 0.0 }
 0x375   :  { %2718 = vmatmul.f32.vlgmr.msrb.gmra.mxu2 %v2592_v3 }
 0x390   :  { %v2587_v42 = vpop.f32.mrf.mxu3 }
 0x391   :  { %v2588_v36 = vadd.f32 %v2587_v42, %v2568_v51 }
 0x393   :  { %v2593_v8 = vmax.f32 %v2588_v36, 0.0 }
 0x395   :  { %2738 = vmatmul.f32.vlgmr.msrb.gmra.mxu3 %v2593_v8 }
 0x3d2   :  { %v2679_v43 = vpop.f32.mrf.mxu0 }
 0x3d3   :  { %v2680_v48 = vadd.f32 %v2800_v47, %v2679_v43 }
 0x3da   :  { %v2699_v27 = vpop.f32.mrf.mxu1 }
 0x3db   :  { %v2700_v46 = vadd.f32 %v2699_v27, %v2680_v48 }
 0x3f8   :  { %v2719_v52 = vpop.f32.mrf.mxu2 }
 0x3f9   :  { %v2720_v25 = vadd.f32 %v2719_v52, %v2700_v46 }
 0x418   :  { %v2739_v53 = vpop.f32.mrf.mxu3 }
 0x419   :  { %v2740_v45 = vadd.f32 %v2739_v53, %v2720_v25 }
 0x41b   :  { %v2743_v55 = vsel %vm2742_vm1, %v2740_v45, -inf  ;;  %2801 = vtanh.f32 %v2740_v45 }
 0x41c   :  { %2744 = vmax.xlane.f32.xlu0 %v2743_v55 }
 0x421   :  { %v2802_v57 = vpop.eup %2801 }
 0x422   :  { %2759 = vrot.lane.b32.xlu1 %v2802_v57, %s2967_s5 }
 0x48f   :  { %v2745_v58 = vpop.xlane.xlu0 %2744 }
 0x490   :  { %v2746_v50 = vsub.f32 %v2740_v45, %v2745_v58 }
 0x492   :  { %v2747_v59 = vmul.f32 1.442695, %v2746_v50 }
 0x494   :  { %2803 = vpow2.f32 %v2747_v59  ;;  %v2760_v61 = vpop.permute.xlu1 %2759 }
 0x495   :  { %2763 = vst.msk [vmem:[%s3394_s8] sm:$0x3] %vm2762_vm2, %v2760_v61 }
 0x49a   :  { %v2804_v62 = vpop.eup %2803 }
 0x49b   :  { %v2749_v38 = vsel %vm2742_vm1, %v2804_v62, 0.0 }
 0x49c   :  { %2750 = vadd.xlane.f32.xlu0 %v2749_v38 }
 0x50f   :  { %v2751_v63 = vpop.xlane.xlu0 %2750 }
 0x510   :  { %2805 = vlog2.f32 %v2751_v63 }
 0x516   :  { %v2806_v37 = vpop.eup %2805 }
 0x517   :  { %v2753_v1 = vmul.f32 0.6931472, %v2806_v37 }
 0x519   :  { %v2754_v5 = vadd.f32 %v2753_v1, %v2745_v58 }
 0x51b   :  { %v2755_v6 = vsub.f32 %v2740_v45, %v2754_v5 }
 0x51d   :  { %2756 = vst.msk [vmem:[#allocation11] sm:$0x3] %vm2742_vm1, %v2755_v6 }
 0x51e   :  { %2774 = dma.vmem_to_hbm [thread:$0]  %s2770_s23, 32, %s2772_s26, [#allocation4]  }
 0x51f   :  { %2958 = dma.done.wait [#allocation4], 32  }
 0x520   :  { %2959 = vsyncadd [#allocation4], 4294967264 }
 0x521   :  { %2783 = vsyncpa [#allocation3], 1 }
 0x522   :  { %2784 = vsyncpa [#allocation6], 1 }
 0x523   :  { %2785 = vsyncpa [#allocation9], 1 }
 0x524   :  { %2786 = vsyncpa [#allocation4], 1 }

</bundles_post_ra>
